<compile_context>
chip_gen: v6e
topology: v6e:2x2x1
jax: 0.10.0
libtpu: 0.0.40
codegen_flags: <defaults>
</compile_context>

<pallas_src>
import jax
import jax.numpy as jnp
import numpy as np
from jax.experimental import pallas as pl
from jax.experimental.pallas import tpu as pltpu


# ----------------------------------------------------------------------------
# Deterministic parameter init, mirroring the PyTorch module __init__
# (ICNR init of the conv weight, default Conv2d bias init).
# ----------------------------------------------------------------------------
def icnr_weight(key, in_channels, out_channels, scale=2, ksize=3):
    """ICNR init of an OIHW conv weight of shape (out*scale^2, in, k, k)."""
    ni = out_channels * scale * scale
    nf = in_channels
    ni2 = out_channels
    fan_in = nf * ksize * ksize                       # kaiming_normal_, fan_in, gain sqrt(2)
    std = float(np.sqrt(2.0 / fan_in))
    k0 = jax.random.normal(key, (ni2, nf, ksize, ksize), jnp.float32) * std
    k = jnp.transpose(k0, (1, 0, 2, 3))               # (nf, ni2, k, k)
    k = k.reshape(ni2, nf, -1)                        # row-major reinterpret (== .contiguous().view)
    k = jnp.tile(k, (1, 1, scale * scale))            # repeat taps scale^2 times
    k = k.reshape(nf, ni, ksize, ksize)
    k = jnp.transpose(k, (1, 0, 2, 3))                # (ni, nf, k, k) == OIHW conv weight
    return k


def init_params(key, in_channels, out_channels, scale=2, ksize=3):
    kw, kb = jax.random.split(key)
    weight = icnr_weight(kw, in_channels, out_channels, scale, ksize)
    fan_in = in_channels * ksize * ksize
    bound = 1.0 / float(np.sqrt(fan_in))
    bias = jax.random.uniform(kb, (out_channels * scale * scale,),
                              jnp.float32, -bound, bound)
    return weight, bias


# ----------------------------------------------------------------------------
# Fused Pallas kernel (streaming conv-row pipeline)
# ----------------------------------------------------------------------------
def _make_fused_kernel(cout, th, w, blur):
    w2 = 2 * w

    def kernel(x_ref, w_ref, b_ref, o_ref):
        # x_ref: (1, 1, Cin_pad, TH+3, Wlane) bf16  zero-padded, width-dilated, channels-first
        #        slab (input values on odd lanes; lane dim padded to a 128 multiple)
        # w_ref: (3, 2*Cout, 6*Cin_pad) bf16        per-ky weight blocks; rows = (c, i) sub-rows;
        #                                           cols = (j, kx, ci); 0.25 folded in if blur
        # b_ref: (2*Cout, 2W) f32                   conv bias, pre-broadcast (0.25 folded if blur)
        # o_ref: (1, Cout, 2*TH, 2W) f32            final NCHW output tile (lane dim = 2W)
        bias = b_ref[...]
        wdy = [w_ref[dy] for dy in range(3)]               # 3 x (2*Cout, 6*Cin_pad) bf16

        if blur:
            col0 = jax.lax.broadcasted_iota(jnp.int32, (1, w2), 1) == 0
            even_row = jax.lax.broadcasted_iota(jnp.int32, (2 * cout, 1), 0) % 2 == 0
            is_top = pl.program_id(1) == 0

        def make_rhs(ri):
            # 6 lane-offset tap slices of physical row `ri`, built ONCE and reused by the
            # 3 conv rows whose vertical taps touch it.  Order (j, dx, ci) matches w_ref cols.
            row = x_ref[0, 0, :, ri, :]                     # (Cin_pad, Wlane) bf16
            taps = []
            for j in (0, 1):                                # output-column parity
                for dx in range(3):
                    off = 2 * dx + 1 - j                    # lane offset selecting parity-j cols
                    taps.append(row[:, off:off + w2])
            return jnp.concatenate(taps, axis=0)            # (6*Cin_pad, 2W) bf16

        def conv_row(r0, r1, r2):
            # One conv row = both pixel-shuffled output rows of every channel, columns already
            # interleaved along output-W (dilated-input trick).  3 accumulating MXU matmuls.
            acc = jnp.dot(wdy[0], r0, preferred_element_type=jnp.float32)
            acc = acc + jnp.dot(wdy[1], r1, preferred_element_type=jnp.float32)
            acc = acc + jnp.dot(wdy[2], r2, preferred_element_type=jnp.float32)
            y = acc + bias                                  # (2*Cout, 2W) f32
            if blur:
                # Horizontal half of the 2x2 average with the left ReplicationPad:
                #   h[., b] = y[., b] + y[., max(b - 1, 0)]      (0.25 folded into weights)
                y = y + jnp.where(col0, y, pltpu.roll(y, shift=1, axis=1))
            return y

        # 3-deep window of per-physical-row RHS slabs.
        r0 = make_rhs(0) if blur else None
        r1 = make_rhs(1)
        r2 = make_rhs(2)

        if blur:
            prev = conv_row(r0, r1, r2)                     # halo conv row above the tile

        for rr in range(1, th + 1):                         # conv rows owned by this tile
            r0, r1, r2 = r1, r2, make_rhs(rr + 2)
            cur = conv_row(r0, r1, r2)
            if blur:
                # Vertical half: up[2c] = prev[2c+1], up[2c+1] = cur[2c]
                # (two sublane rolls + a row-parity select; no per-channel gathers).
                up = jnp.where(even_row,
                               pltpu.roll(prev, shift=2 * cout - 1, axis=0),
                               pltpu.roll(cur, shift=1, axis=0))
                if rr == 1:
                    # top ReplicationPad: global output row -1 -> row 0 (top tile only)
                    up = jnp.where(jnp.logical_and(even_row, is_top), cur, up)
                z = cur + up                                # 0.25 already folded in
                prev = cur
            else:
                z = cur
            # Direct per-conv-row store: row-major reshape, lane dim (2W) untouched.
            o_ref[0, :, 2 * (rr - 1):2 * rr, :] = z.reshape(cout, 2, w2)

    return kernel


def _pick_row_tile(h, target):
    """Largest row tile <= target that divides H and keeps the 2*TH output block 8-aligned."""
    for d in range(min(target, h), 0, -1):
        if h % d == 0 and (2 * d) % 8 == 0:
            return d
    # Fallback: whole image in one tile (block == full dim, so it always compiles; stores may
    # be sublane-padded if 2*H % 8 != 0 -- prefer shapes with H a multiple of 4).
    return h


# ----------------------------------------------------------------------------
# Forward wrapper
# ----------------------------------------------------------------------------
def subpixel_upsampling_block(x, weight, bias, upscale_factor=2, blur=True, row_tile=32):
    """x: (N, Cin, H, W) f32 NCHW -> (N, Cout, 2H, 2W) f32 NCHW (same semantics as the module)."""
    if upscale_factor != 2:
        # TODO(synk): generalize the fused kernel to upscale_factor != 2 (r=2 is the module default).
        raise NotImplementedError("fused Pallas kernel is specialized for upscale_factor == 2")

    n, cin, h, w = x.shape
    f = weight.shape[0]
    cout = f // 4
    assert weight.shape == (f, cin, 3, 3) and bias.shape == (f,)

    th = _pick_row_tile(h, row_tile)
    nt = h // th
    w2 = 2 * w
    cin_pad = ((cin + 15) // 16) * 16                 # bf16 sublane-pack granularity
    wlane = ((w2 + 5 + 127) // 128) * 128             # full-vreg (unmasked) slab row loads

    # ---- wrapper-side (cheap, input-sized) prep, all in bf16 ----
    # channel pad, conv zero-pad along W, dilate W by 2 (values on odd lanes),
    # conv/halo zero-pad along H + lane pad, then cut into row tiles with a 3-row halo.
    xb = x.astype(jnp.bfloat16)
    if cin_pad > cin:
        xb = jnp.pad(xb, ((0, 0), (0, cin_pad - cin), (0, 0), (0, 0)))
    xw = jnp.pad(xb, ((0, 0), (0, 0), (0, 0), (1, 1)))                         # (N,Cp,H,W+2)
    xd = jnp.stack([xw, jnp.zeros_like(xw)], axis=-1).reshape(n, cin_pad, h, 2 * (w + 2))
    xd = jnp.pad(xd, ((0, 0), (0, 0), (2, 1), (1, wlane - w2 - 5)))            # (N,Cp,H+3,Wlane)
    xt = jnp.stack([xd[:, :, t * th:t * th + th + 3, :] for t in range(nt)], axis=1)
    # xt: (N, nT, Cp, TH+3, Wlane)

    # ---- weights -> (3, 2*Cout, 6*Cin_pad): per-ky blocks; rows (c,i); cols (j, kx, ci).
    # AvgPool's 0.25 is folded into weights + bias when blur=True.
    scale = 0.25 if blur else 1.0
    w6 = (weight * scale).reshape(cout, 2, 2, cin, 3, 3)       # (c, i, j, ci, ky, kx)
    w6 = jnp.transpose(w6, (4, 0, 1, 2, 5, 3))                 # (ky, c, i, j, kx, ci)
    if cin_pad > cin:
        w6 = jnp.pad(w6, ((0, 0),) * 5 + ((0, cin_pad - cin),))
    wmat = w6.reshape(3, 2 * cout, 6 * cin_pad).astype(jnp.bfloat16)

    # ---- bias -> (2*Cout, 2W): column b of sub-row (c, i) gets bias[4c + 2i + (b % 2)].
    bias2 = (jnp.tile(bias.reshape(2 * cout, 2), (1, w)) * scale).astype(jnp.float32)

    kernel = _make_fused_kernel(cout, th, w, blur)
    out = pl.pallas_call(
        kernel,
        out_shape=jax.ShapeDtypeStruct((n, cout, 2 * h, 2 * w), jnp.float32),
        grid=(n, nt),
        in_specs=[
            pl.BlockSpec((1, 1, cin_pad, th + 3, wlane), lambda i, t: (i, t, 0, 0, 0)),
            pl.BlockSpec((3, 2 * cout, 6 * cin_pad), lambda i, t: (0, 0, 0)),
            pl.BlockSpec((2 * cout, w2), lambda i, t: (0, 0)),
        ],
        out_specs=pl.BlockSpec((1, cout, 2 * th, w2), lambda i, t: (i, 0, t, 0)),
        compiler_params=pltpu.CompilerParams(
            dimension_semantics=("parallel", "parallel"),
            vmem_limit_bytes=48 * 1024 * 1024),
    )(xt, wmat, bias2)
    return out


# ----------------------------------------------------------------------------
# Pure-JAX reference (for correctness check)
# ----------------------------------------------------------------------------
def reference(x_nchw, weight, bias, upscale_factor=2, blur=True):
    y = jax.lax.conv_general_dilated(
        x_nchw, weight, window_strides=(1, 1), padding=((1, 1), (1, 1)),
        dimension_numbers=("NCHW", "OIHW", "NCHW"),
        precision=jax.lax.Precision.HIGHEST)
    y = y + bias[None, :, None, None]
    N, F, H, W = y.shape
    r = upscale_factor
    C = F // (r * r)
    y = y.reshape(N, C, r, r, H, W)
    y = jnp.transpose(y, (0, 1, 4, 2, 5, 3)).reshape(N, C, H * r, W * r)
    if blur:
        y = jnp.concatenate([y[:, :, :1, :], y], axis=2)
        y = jnp.concatenate([y[:, :, :, :1], y], axis=3)
        y = (y[:, :, :-1, :-1] + y[:, :, :-1, 1:]
             + y[:, :, 1:, :-1] + y[:, :, 1:, 1:]) * 0.25
    return y


if __name__ == "__main__":
    key = jax.random.PRNGKey(0)
    kx, kp = jax.random.split(key)

    N, Cin, H, W = 2, 4, 16, 16           # out_channels defaults to in_channels
    upscale = 2
    x = jax.random.normal(kx, (N, Cin, H, W), jnp.float32)
    weight, bias = init_params(kp, Cin, Cin, scale=upscale, ksize=3)

    out = subpixel_upsampling_block(x, weight, bias, upscale_factor=upscale, blur=True)
    out = jax.block_until_ready(out)
    assert out.shape == (N, Cin, upscale * H, upscale * W), out.shape

    # bf16 MXU operands vs. an f32 reference -> 2e-2 tolerance (typical error is a few e-3).
    ref = reference(x, weight, bias, upscale_factor=upscale, blur=True)
    np.testing.assert_allclose(np.asarray(out), np.asarray(ref), atol=2e-2, rtol=2e-2)

    # also exercise the blur=False path (conv + pixel shuffle only)
    out_nb = jax.block_until_ready(
        subpixel_upsampling_block(x, weight, bias, upscale_factor=upscale, blur=False))
    ref_nb = reference(x, weight, bias, upscale_factor=upscale, blur=False)
    np.testing.assert_allclose(np.asarray(out_nb), np.asarray(ref_nb), atol=2e-2, rtol=2e-2)

    print("KERNEL_OK")
</pallas_src>

<mosaic_0001>
module attributes {stable_mosaic.version = 11 : i64} {
  func.func @kernel(%arg0: i32, %arg1: i32, %arg2: memref<1x1x16x19x128xbf16, #tpu.memory_space<vmem>>, %arg3: memref<3x8x96xbf16, #tpu.memory_space<vmem>>, %arg4: memref<8x32xf32, #tpu.memory_space<vmem>>, %arg5: memref<1x4x32x32xf32, #tpu.memory_space<vmem>>) attributes {dimension_semantics = [#tpu.dimension_semantics<parallel>, #tpu.dimension_semantics<parallel>], iteration_bounds = array<i64: 2, 1>, scalar_prefetch = 0 : i64, scratch_operands = 0 : i64, tpu.core_type = #tpu.core_type<tc>, window_params = [{transform_indices = @transform_0, window_bounds = array<i64: 1, 1, 16, 19, 128>}, {pipeline_mode = #tpu.pipeline_mode<synchronous>, transform_indices = @transform_1, window_bounds = array<i64: 3, 8, 96>}, {pipeline_mode = #tpu.pipeline_mode<synchronous>, transform_indices = @transform_2, window_bounds = array<i64: 8, 32>}, {transform_indices = @transform_3, window_bounds = array<i64: 1, 4, 32, 32>}]} {
    %c0 = arith.constant 0 : index
    %c0_0 = arith.constant 0 : index
    %0 = vector.load %arg4[%c0, %c0_0] : memref<8x32xf32, #tpu.memory_space<vmem>>, vector<8x32xf32>
    %c0_1 = arith.constant 0 : index
    %c0_2 = arith.constant 0 : index
    %c0_3 = arith.constant 0 : index
    %1 = vector.load %arg3[%c0_1, %c0_2, %c0_3] : memref<3x8x96xbf16, #tpu.memory_space<vmem>>, vector<1x8x96xbf16>
    %2 = vector.shape_cast %1 : vector<1x8x96xbf16> to vector<8x96xbf16>
    %c1 = arith.constant 1 : index
    %c0_4 = arith.constant 0 : index
    %c0_5 = arith.constant 0 : index
    %3 = vector.load %arg3[%c1, %c0_4, %c0_5] : memref<3x8x96xbf16, #tpu.memory_space<vmem>>, vector<1x8x96xbf16>
    %4 = vector.shape_cast %3 : vector<1x8x96xbf16> to vector<8x96xbf16>
    %c2 = arith.constant 2 : index
    %c0_6 = arith.constant 0 : index
    %c0_7 = arith.constant 0 : index
    %5 = vector.load %arg3[%c2, %c0_6, %c0_7] : memref<3x8x96xbf16, #tpu.memory_space<vmem>>, vector<1x8x96xbf16>
    %6 = vector.shape_cast %5 : vector<1x8x96xbf16> to vector<8x96xbf16>
    %7 = tpu.iota {dimensions = array<i32: 1>} : vector<1x32xi32>
    %c0_i32 = arith.constant 0 : i32
    %8 = vector.broadcast %c0_i32 : i32 to vector<1x32xi32>
    %9 = arith.cmpi eq, %7, %8 : vector<1x32xi32>
    %10 = tpu.iota {dimensions = array<i32: 0>} : vector<8x1xi32>
    %c2_i32 = arith.constant 2 : i32
    %c0_i32_8 = arith.constant 0 : i32
    %11 = arith.cmpi eq, %c2_i32, %c0_i32_8 : i32
    %c1_i32 = arith.constant 1 : i32
    %12 = arith.select %11, %c1_i32, %c2_i32 : i32
    %13 = vector.broadcast %12 : i32 to vector<8x1xi32>
    %14 = arith.remsi %10, %13 : vector<8x1xi32>
    %c0_i32_9 = arith.constant 0 : i32
    %15 = vector.broadcast %c0_i32_9 : i32 to vector<8x1xi32>
    %16 = arith.cmpi ne, %14, %15 : vector<8x1xi32>
    %c0_i32_10 = arith.constant 0 : i32
    %17 = vector.broadcast %c0_i32_10 : i32 to vector<8x1xi32>
    %18 = arith.cmpi slt, %14, %17 : vector<8x1xi32>
    %c0_i32_11 = arith.constant 0 : i32
    %19 = arith.cmpi slt, %12, %c0_i32_11 : i32
    %20 = vector.broadcast %19 : i1 to vector<8x1xi1>
    %21 = vector.broadcast %20 : vector<8x1xi1> to vector<8x1xi1>
    %22 = arith.xori %18, %21 : vector<8x1xi1>
    %23 = arith.andi %22, %16 : vector<8x1xi1>
    %24 = vector.broadcast %12 : i32 to vector<8x1xi32>
    %25 = arith.addi %14, %24 : vector<8x1xi32>
    %26 = arith.select %23, %25, %14 : vector<8x1xi1>, vector<8x1xi32>
    %c0_i32_12 = arith.constant 0 : i32
    %27 = vector.broadcast %c0_i32_12 : i32 to vector<8x1xi32>
    %28 = arith.cmpi eq, %26, %27 : vector<8x1xi32>
    %c0_i32_13 = arith.constant 0 : i32
    %29 = arith.cmpi eq, %arg1, %c0_i32_13 : i32
    %c0_14 = arith.constant 0 : index
    %c0_15 = arith.constant 0 : index
    %c0_16 = arith.constant 0 : index
    %c0_17 = arith.constant 0 : index
    %c0_18 = arith.constant 0 : index
    %30 = vector.load %arg2[%c0_14, %c0_15, %c0_16, %c0_17, %c0_18] : memref<1x1x16x19x128xbf16, #tpu.memory_space<vmem>>, vector<1x1x16x1x128xbf16>
    %31 = vector.shape_cast %30 : vector<1x1x16x1x128xbf16> to vector<16x128xbf16>
    %32 = vector.extract_strided_slice %31 {offsets = [0, 1], sizes = [16, 32], strides = [1, 1]} : vector<16x128xbf16> to vector<16x32xbf16>
    %33 = vector.extract_strided_slice %31 {offsets = [0, 3], sizes = [16, 32], strides = [1, 1]} : vector<16x128xbf16> to vector<16x32xbf16>
    %34 = vector.extract_strided_slice %31 {offsets = [0, 5], sizes = [16, 32], strides = [1, 1]} : vector<16x128xbf16> to vector<16x32xbf16>
    %35 = vector.extract_strided_slice %31 {offsets = [0, 0], sizes = [16, 32], strides = [1, 1]} : vector<16x128xbf16> to vector<16x32xbf16>
    %36 = vector.extract_strided_slice %31 {offsets = [0, 2], sizes = [16, 32], strides = [1, 1]} : vector<16x128xbf16> to vector<16x32xbf16>
    %37 = vector.extract_strided_slice %31 {offsets = [0, 4], sizes = [16, 32], strides = [1, 1]} : vector<16x128xbf16> to vector<16x32xbf16>
    %38 = tpu.concatenate %32, %33, %34, %35, %36, %37 in 0 : vector<16x32xbf16>, vector<16x32xbf16>, vector<16x32xbf16>, vector<16x32xbf16>, vector<16x32xbf16>, vector<16x32xbf16> -> vector<96x32xbf16>
    %c0_19 = arith.constant 0 : index
    %c0_20 = arith.constant 0 : index
    %c0_21 = arith.constant 0 : index
    %c1_22 = arith.constant 1 : index
    %c0_23 = arith.constant 0 : index
    %39 = vector.load %arg2[%c0_19, %c0_20, %c0_21, %c1_22, %c0_23] : memref<1x1x16x19x128xbf16, #tpu.memory_space<vmem>>, vector<1x1x16x1x128xbf16>
    %40 = vector.shape_cast %39 : vector<1x1x16x1x128xbf16> to vector<16x128xbf16>
    %41 = vector.extract_strided_slice %40 {offsets = [0, 1], sizes = [16, 32], strides = [1, 1]} : vector<16x128xbf16> to vector<16x32xbf16>
    %42 = vector.extract_strided_slice %40 {offsets = [0, 3], sizes = [16, 32], strides = [1, 1]} : vector<16x128xbf16> to vector<16x32xbf16>
    %43 = vector.extract_strided_slice %40 {offsets = [0, 5], sizes = [16, 32], strides = [1, 1]} : vector<16x128xbf16> to vector<16x32xbf16>
    %44 = vector.extract_strided_slice %40 {offsets = [0, 0], sizes = [16, 32], strides = [1, 1]} : vector<16x128xbf16> to vector<16x32xbf16>
    %45 = vector.extract_strided_slice %40 {offsets = [0, 2], sizes = [16, 32], strides = [1, 1]} : vector<16x128xbf16> to vector<16x32xbf16>
    %46 = vector.extract_strided_slice %40 {offsets = [0, 4], sizes = [16, 32], strides = [1, 1]} : vector<16x128xbf16> to vector<16x32xbf16>
    %47 = tpu.concatenate %41, %42, %43, %44, %45, %46 in 0 : vector<16x32xbf16>, vector<16x32xbf16>, vector<16x32xbf16>, vector<16x32xbf16>, vector<16x32xbf16>, vector<16x32xbf16> -> vector<96x32xbf16>
    %c0_24 = arith.constant 0 : index
    %c0_25 = arith.constant 0 : index
    %c0_26 = arith.constant 0 : index
    %c2_27 = arith.constant 2 : index
    %c0_28 = arith.constant 0 : index
    %48 = vector.load %arg2[%c0_24, %c0_25, %c0_26, %c2_27, %c0_28] : memref<1x1x16x19x128xbf16, #tpu.memory_space<vmem>>, vector<1x1x16x1x128xbf16>
    %49 = vector.shape_cast %48 : vector<1x1x16x1x128xbf16> to vector<16x128xbf16>
    %50 = vector.extract_strided_slice %49 {offsets = [0, 1], sizes = [16, 32], strides = [1, 1]} : vector<16x128xbf16> to vector<16x32xbf16>
    %51 = vector.extract_strided_slice %49 {offsets = [0, 3], sizes = [16, 32], strides = [1, 1]} : vector<16x128xbf16> to vector<16x32xbf16>
    %52 = vector.extract_strided_slice %49 {offsets = [0, 5], sizes = [16, 32], strides = [1, 1]} : vector<16x128xbf16> to vector<16x32xbf16>
    %53 = vector.extract_strided_slice %49 {offsets = [0, 0], sizes = [16, 32], strides = [1, 1]} : vector<16x128xbf16> to vector<16x32xbf16>
    %54 = vector.extract_strided_slice %49 {offsets = [0, 2], sizes = [16, 32], strides = [1, 1]} : vector<16x128xbf16> to vector<16x32xbf16>
    %55 = vector.extract_strided_slice %49 {offsets = [0, 4], sizes = [16, 32], strides = [1, 1]} : vector<16x128xbf16> to vector<16x32xbf16>
    %56 = tpu.concatenate %50, %51, %52, %53, %54, %55 in 0 : vector<16x32xbf16>, vector<16x32xbf16>, vector<16x32xbf16>, vector<16x32xbf16>, vector<16x32xbf16>, vector<16x32xbf16> -> vector<96x32xbf16>
    %cst = arith.constant dense<0.000000e+00> : vector<8x32xf32>
    %57 = tpu.matmul %2, %38, %cst {dimension_numbers = #tpu.dot_dimension_numbers<[1], [0], [0], [1], [0, 0, 1, 1], [], []>} : vector<8x96xbf16>, vector<96x32xbf16>, vector<8x32xf32> -> vector<8x32xf32>
    %cst_29 = arith.constant dense<0.000000e+00> : vector<8x32xf32>
    %58 = tpu.matmul %4, %47, %cst_29 {dimension_numbers = #tpu.dot_dimension_numbers<[1], [0], [0], [1], [0, 0, 1, 1], [], []>} : vector<8x96xbf16>, vector<96x32xbf16>, vector<8x32xf32> -> vector<8x32xf32>
    %59 = arith.addf %57, %58 : vector<8x32xf32>
    %cst_30 = arith.constant dense<0.000000e+00> : vector<8x32xf32>
    %60 = tpu.matmul %6, %56, %cst_30 {dimension_numbers = #tpu.dot_dimension_numbers<[1], [0], [0], [1], [0, 0, 1, 1], [], []>} : vector<8x96xbf16>, vector<96x32xbf16>, vector<8x32xf32> -> vector<8x32xf32>
    %61 = arith.addf %59, %60 : vector<8x32xf32>
    %62 = arith.addf %61, %0 : vector<8x32xf32>
    %c1_i32_31 = arith.constant 1 : i32
    %63 = tpu.dynamic_rotate %62 by %c1_i32_31 dim 1 : vector<8x32xf32>, i32 -> vector<8x32xf32>
    %64 = vector.shape_cast %9 : vector<1x32xi1> to vector<1x32xi1>
    %65 = vector.broadcast %64 : vector<1x32xi1> to vector<8x32xi1>
    %66 = arith.select %65, %62, %63 : vector<8x32xi1>, vector<8x32xf32>
    %67 = arith.addf %62, %66 : vector<8x32xf32>
    %c0_32 = arith.constant 0 : index
    %c0_33 = arith.constant 0 : index
    %c0_34 = arith.constant 0 : index
    %c3 = arith.constant 3 : index
    %c0_35 = arith.constant 0 : index
    %68 = vector.load %arg2[%c0_32, %c0_33, %c0_34, %c3, %c0_35] : memref<1x1x16x19x128xbf16, #tpu.memory_space<vmem>>, vector<1x1x16x1x128xbf16>
    %69 = vector.shape_cast %68 : vector<1x1x16x1x128xbf16> to vector<16x128xbf16>
    %70 = vector.extract_strided_slice %69 {offsets = [0, 1], sizes = [16, 32], strides = [1, 1]} : vector<16x128xbf16> to vector<16x32xbf16>
    %71 = vector.extract_strided_slice %69 {offsets = [0, 3], sizes = [16, 32], strides = [1, 1]} : vector<16x128xbf16> to vector<16x32xbf16>
    %72 = vector.extract_strided_slice %69 {offsets = [0, 5], sizes = [16, 32], strides = [1, 1]} : vector<16x128xbf16> to vector<16x32xbf16>
    %73 = vector.extract_strided_slice %69 {offsets = [0, 0], sizes = [16, 32], strides = [1, 1]} : vector<16x128xbf16> to vector<16x32xbf16>
    %74 = vector.extract_strided_slice %69 {offsets = [0, 2], sizes = [16, 32], strides = [1, 1]} : vector<16x128xbf16> to vector<16x32xbf16>
    %75 = vector.extract_strided_slice %69 {offsets = [0, 4], sizes = [16, 32], strides = [1, 1]} : vector<16x128xbf16> to vector<16x32xbf16>
    %76 = tpu.concatenate %70, %71, %72, %73, %74, %75 in 0 : vector<16x32xbf16>, vector<16x32xbf16>, vector<16x32xbf16>, vector<16x32xbf16>, vector<16x32xbf16>, vector<16x32xbf16> -> vector<96x32xbf16>
    %cst_36 = arith.constant dense<0.000000e+00> : vector<8x32xf32>
    %77 = tpu.matmul %2, %47, %cst_36 {dimension_numbers = #tpu.dot_dimension_numbers<[1], [0], [0], [1], [0, 0, 1, 1], [], []>} : vector<8x96xbf16>, vector<96x32xbf16>, vector<8x32xf32> -> vector<8x32xf32>
    %cst_37 = arith.constant dense<0.000000e+00> : vector<8x32xf32>
    %78 = tpu.matmul %4, %56, %cst_37 {dimension_numbers = #tpu.dot_dimension_numbers<[1], [0], [0], [1], [0, 0, 1, 1], [], []>} : vector<8x96xbf16>, vector<96x32xbf16>, vector<8x32xf32> -> vector<8x32xf32>
    %79 = arith.addf %77, %78 : vector<8x32xf32>
    %cst_38 = arith.constant dense<0.000000e+00> : vector<8x32xf32>
    %80 = tpu.matmul %6, %76, %cst_38 {dimension_numbers = #tpu.dot_dimension_numbers<[1], [0], [0], [1], [0, 0, 1, 1], [], []>} : vector<8x96xbf16>, vector<96x32xbf16>, vector<8x32xf32> -> vector<8x32xf32>
    %81 = arith.addf %79, %80 : vector<8x32xf32>
    %82 = arith.addf %81, %0 : vector<8x32xf32>
    %c1_i32_39 = arith.constant 1 : i32
    %83 = tpu.dynamic_rotate %82 by %c1_i32_39 dim 1 : vector<8x32xf32>, i32 -> vector<8x32xf32>
    %84 = vector.shape_cast %9 : vector<1x32xi1> to vector<1x32xi1>
    %85 = vector.broadcast %84 : vector<1x32xi1> to vector<8x32xi1>
    %86 = arith.select %85, %82, %83 : vector<8x32xi1>, vector<8x32xf32>
    %87 = arith.addf %82, %86 : vector<8x32xf32>
    %c7_i32 = arith.constant 7 : i32
    %88 = tpu.dynamic_rotate %67 by %c7_i32 dim 0 : vector<8x32xf32>, i32 -> vector<8x32xf32>
    %c1_i32_40 = arith.constant 1 : i32
    %89 = tpu.dynamic_rotate %87 by %c1_i32_40 dim 0 : vector<8x32xf32>, i32 -> vector<8x32xf32>
    %90 = vector.shape_cast %28 : vector<8x1xi1> to vector<8x1xi1>
    %91 = vector.broadcast %90 : vector<8x1xi1> to vector<8x32xi1>
    %92 = arith.select %91, %88, %89 : vector<8x32xi1>, vector<8x32xf32>
    %93 = vector.broadcast %29 : i1 to vector<8x1xi1>
    %94 = arith.andi %28, %93 : vector<8x1xi1>
    %95 = vector.shape_cast %94 : vector<8x1xi1> to vector<8x1xi1>
    %96 = vector.broadcast %95 : vector<8x1xi1> to vector<8x32xi1>
    %97 = arith.select %96, %87, %92 : vector<8x32xi1>, vector<8x32xf32>
    %98 = arith.addf %87, %97 : vector<8x32xf32>
    %99 = vector.shape_cast %98 : vector<8x32xf32> to vector<4x2x32xf32>
    %c0_41 = arith.constant 0 : index
    %c0_42 = arith.constant 0 : index
    %c0_43 = arith.constant 0 : index
    %c0_44 = arith.constant 0 : index
    %100 = vector.load %arg5[%c0_41, %c0_42, %c0_43, %c0_44] : memref<1x4x32x32xf32, #tpu.memory_space<vmem>>, vector<1x4x2x32xf32>
    %101 = vector.shape_cast %100 : vector<1x4x2x32xf32> to vector<4x2x32xf32>
    %102 = vector.shape_cast %99 : vector<4x2x32xf32> to vector<1x4x2x32xf32>
    tpu.vector_store %arg5[%c0_41, %c0_42, %c0_43, %c0_44], %102 {strides = array<i32>} : memref<1x4x32x32xf32, #tpu.memory_space<vmem>>, vector<1x4x2x32xf32>,
    %c0_45 = arith.constant 0 : index
    %c0_46 = arith.constant 0 : index
    %c0_47 = arith.constant 0 : index
    %c4 = arith.constant 4 : index
    %c0_48 = arith.constant 0 : index
    %103 = vector.load %arg2[%c0_45, %c0_46, %c0_47, %c4, %c0_48] : memref<1x1x16x19x128xbf16, #tpu.memory_space<vmem>>, vector<1x1x16x1x128xbf16>
    %104 = vector.shape_cast %103 : vector<1x1x16x1x128xbf16> to vector<16x128xbf16>
    %105 = vector.extract_strided_slice %104 {offsets = [0, 1], sizes = [16, 32], strides = [1, 1]} : vector<16x128xbf16> to vector<16x32xbf16>
    %106 = vector.extract_strided_slice %104 {offsets = [0, 3], sizes = [16, 32], strides = [1, 1]} : vector<16x128xbf16> to vector<16x32xbf16>
    %107 = vector.extract_strided_slice %104 {offsets = [0, 5], sizes = [16, 32], strides = [1, 1]} : vector<16x128xbf16> to vector<16x32xbf16>
    %108 = vector.extract_strided_slice %104 {offsets = [0, 0], sizes = [16, 32], strides = [1, 1]} : vector<16x128xbf16> to vector<16x32xbf16>
    %109 = vector.extract_strided_slice %104 {offsets = [0, 2], sizes = [16, 32], strides = [1, 1]} : vector<16x128xbf16> to vector<16x32xbf16>
    %110 = vector.extract_strided_slice %104 {offsets = [0, 4], sizes = [16, 32], strides = [1, 1]} : vector<16x128xbf16> to vector<16x32xbf16>
    %111 = tpu.concatenate %105, %106, %107, %108, %109, %110 in 0 : vector<16x32xbf16>, vector<16x32xbf16>, vector<16x32xbf16>, vector<16x32xbf16>, vector<16x32xbf16>, vector<16x32xbf16> -> vector<96x32xbf16>
    %cst_49 = arith.constant dense<0.000000e+00> : vector<8x32xf32>
    %112 = tpu.matmul %2, %56, %cst_49 {dimension_numbers = #tpu.dot_dimension_numbers<[1], [0], [0], [1], [0, 0, 1, 1], [], []>} : vector<8x96xbf16>, vector<96x32xbf16>, vector<8x32xf32> -> vector<8x32xf32>
    %cst_50 = arith.constant dense<0.000000e+00> : vector<8x32xf32>
    %113 = tpu.matmul %4, %76, %cst_50 {dimension_numbers = #tpu.dot_dimension_numbers<[1], [0], [0], [1], [0, 0, 1, 1], [], []>} : vector<8x96xbf16>, vector<96x32xbf16>, vector<8x32xf32> -> vector<8x32xf32>
    %114 = arith.addf %112, %113 : vector<8x32xf32>
    %cst_51 = arith.constant dense<0.000000e+00> : vector<8x32xf32>
    %115 = tpu.matmul %6, %111, %cst_51 {dimension_numbers = #tpu.dot_dimension_numbers<[1], [0], [0], [1], [0, 0, 1, 1], [], []>} : vector<8x96xbf16>, vector<96x32xbf16>, vector<8x32xf32> -> vector<8x32xf32>
    %116 = arith.addf %114, %115 : vector<8x32xf32>
    %117 = arith.addf %116, %0 : vector<8x32xf32>
    %c1_i32_52 = arith.constant 1 : i32
    %118 = tpu.dynamic_rotate %117 by %c1_i32_52 dim 1 : vector<8x32xf32>, i32 -> vector<8x32xf32>
    %119 = vector.shape_cast %9 : vector<1x32xi1> to vector<1x32xi1>
    %120 = vector.broadcast %119 : vector<1x32xi1> to vector<8x32xi1>
    %121 = arith.select %120, %117, %118 : vector<8x32xi1>, vector<8x32xf32>
    %122 = arith.addf %117, %121 : vector<8x32xf32>
    %c7_i32_53 = arith.constant 7 : i32
    %123 = tpu.dynamic_rotate %87 by %c7_i32_53 dim 0 : vector<8x32xf32>, i32 -> vector<8x32xf32>
    %c1_i32_54 = arith.constant 1 : i32
    %124 = tpu.dynamic_rotate %122 by %c1_i32_54 dim 0 : vector<8x32xf32>, i32 -> vector<8x32xf32>
    %125 = vector.shape_cast %28 : vector<8x1xi1> to vector<8x1xi1>
    %126 = vector.broadcast %125 : vector<8x1xi1> to vector<8x32xi1>
    %127 = arith.select %126, %123, %124 : vector<8x32xi1>, vector<8x32xf32>
    %128 = arith.addf %122, %127 : vector<8x32xf32>
    %129 = vector.shape_cast %128 : vector<8x32xf32> to vector<4x2x32xf32>
    %c0_55 = arith.constant 0 : index
    %c0_56 = arith.constant 0 : index
    %c2_57 = arith.constant 2 : index
    %c0_58 = arith.constant 0 : index
    %130 = vector.load %arg5[%c0_55, %c0_56, %c2_57, %c0_58] : memref<1x4x32x32xf32, #tpu.memory_space<vmem>>, vector<1x4x2x32xf32>
    %131 = vector.shape_cast %130 : vector<1x4x2x32xf32> to vector<4x2x32xf32>
    %132 = vector.shape_cast %129 : vector<4x2x32xf32> to vector<1x4x2x32xf32>
    tpu.vector_store %arg5[%c0_55, %c0_56, %c2_57, %c0_58], %132 {strides = array<i32>} : memref<1x4x32x32xf32, #tpu.memory_space<vmem>>, vector<1x4x2x32xf32>,
    %c0_59 = arith.constant 0 : index
    %c0_60 = arith.constant 0 : index
    %c0_61 = arith.constant 0 : index
    %c5 = arith.constant 5 : index
    %c0_62 = arith.constant 0 : index
    %133 = vector.load %arg2[%c0_59, %c0_60, %c0_61, %c5, %c0_62] : memref<1x1x16x19x128xbf16, #tpu.memory_space<vmem>>, vector<1x1x16x1x128xbf16>
    %134 = vector.shape_cast %133 : vector<1x1x16x1x128xbf16> to vector<16x128xbf16>
    %135 = vector.extract_strided_slice %134 {offsets = [0, 1], sizes = [16, 32], strides = [1, 1]} : vector<16x128xbf16> to vector<16x32xbf16>
    %136 = vector.extract_strided_slice %134 {offsets = [0, 3], sizes = [16, 32], strides = [1, 1]} : vector<16x128xbf16> to vector<16x32xbf16>
    %137 = vector.extract_strided_slice %134 {offsets = [0, 5], sizes = [16, 32], strides = [1, 1]} : vector<16x128xbf16> to vector<16x32xbf16>
    %138 = vector.extract_strided_slice %134 {offsets = [0, 0], sizes = [16, 32], strides = [1, 1]} : vector<16x128xbf16> to vector<16x32xbf16>
    %139 = vector.extract_strided_slice %134 {offsets = [0, 2], sizes = [16, 32], strides = [1, 1]} : vector<16x128xbf16> to vector<16x32xbf16>
    %140 = vector.extract_strided_slice %134 {offsets = [0, 4], sizes = [16, 32], strides = [1, 1]} : vector<16x128xbf16> to vector<16x32xbf16>
    %141 = tpu.concatenate %135, %136, %137, %138, %139, %140 in 0 : vector<16x32xbf16>, vector<16x32xbf16>, vector<16x32xbf16>, vector<16x32xbf16>, vector<16x32xbf16>, vector<16x32xbf16> -> vector<96x32xbf16>
    %cst_63 = arith.constant dense<0.000000e+00> : vector<8x32xf32>
    %142 = tpu.matmul %2, %76, %cst_63 {dimension_numbers = #tpu.dot_dimension_numbers<[1], [0], [0], [1], [0, 0, 1, 1], [], []>} : vector<8x96xbf16>, vector<96x32xbf16>, vector<8x32xf32> -> vector<8x32xf32>
    %cst_64 = arith.constant dense<0.000000e+00> : vector<8x32xf32>
    %143 = tpu.matmul %4, %111, %cst_64 {dimension_numbers = #tpu.dot_dimension_numbers<[1], [0], [0], [1], [0, 0, 1, 1], [], []>} : vector<8x96xbf16>, vector<96x32xbf16>, vector<8x32xf32> -> vector<8x32xf32>
    %144 = arith.addf %142, %143 : vector<8x32xf32>
    %cst_65 = arith.constant dense<0.000000e+00> : vector<8x32xf32>
    %145 = tpu.matmul %6, %141, %cst_65 {dimension_numbers = #tpu.dot_dimension_numbers<[1], [0], [0], [1], [0, 0, 1, 1], [], []>} : vector<8x96xbf16>, vector<96x32xbf16>, vector<8x32xf32> -> vector<8x32xf32>
    %146 = arith.addf %144, %145 : vector<8x32xf32>
    %147 = arith.addf %146, %0 : vector<8x32xf32>
    %c1_i32_66 = arith.constant 1 : i32
    %148 = tpu.dynamic_rotate %147 by %c1_i32_66 dim 1 : vector<8x32xf32>, i32 -> vector<8x32xf32>
    %149 = vector.shape_cast %9 : vector<1x32xi1> to vector<1x32xi1>
    %150 = vector.broadcast %149 : vector<1x32xi1> to vector<8x32xi1>
    %151 = arith.select %150, %147, %148 : vector<8x32xi1>, vector<8x32xf32>
    %152 = arith.addf %147, %151 : vector<8x32xf32>
    %c7_i32_67 = arith.constant 7 : i32
    %153 = tpu.dynamic_rotate %122 by %c7_i32_67 dim 0 : vector<8x32xf32>, i32 -> vector<8x32xf32>
    %c1_i32_68 = arith.constant 1 : i32
    %154 = tpu.dynamic_rotate %152 by %c1_i32_68 dim 0 : vector<8x32xf32>, i32 -> vector<8x32xf32>
    %155 = vector.shape_cast %28 : vector<8x1xi1> to vector<8x1xi1>
    %156 = vector.broadcast %155 : vector<8x1xi1> to vector<8x32xi1>
    %157 = arith.select %156, %153, %154 : vector<8x32xi1>, vector<8x32xf32>
    %158 = arith.addf %152, %157 : vector<8x32xf32>
    %159 = vector.shape_cast %158 : vector<8x32xf32> to vector<4x2x32xf32>
    %c0_69 = arith.constant 0 : index
    %c0_70 = arith.constant 0 : index
    %c4_71 = arith.constant 4 : index
    %c0_72 = arith.constant 0 : index
    %160 = vector.load %arg5[%c0_69, %c0_70, %c4_71, %c0_72] : memref<1x4x32x32xf32, #tpu.memory_space<vmem>>, vector<1x4x2x32xf32>
    %161 = vector.shape_cast %160 : vector<1x4x2x32xf32> to vector<4x2x32xf32>
    %162 = vector.shape_cast %159 : vector<4x2x32xf32> to vector<1x4x2x32xf32>
    tpu.vector_store %arg5[%c0_69, %c0_70, %c4_71, %c0_72], %162 {strides = array<i32>} : memref<1x4x32x32xf32, #tpu.memory_space<vmem>>, vector<1x4x2x32xf32>,
    %c0_73 = arith.constant 0 : index
    %c0_74 = arith.constant 0 : index
    %c0_75 = arith.constant 0 : index
    %c6 = arith.constant 6 : index
    %c0_76 = arith.constant 0 : index
    %163 = vector.load %arg2[%c0_73, %c0_74, %c0_75, %c6, %c0_76] : memref<1x1x16x19x128xbf16, #tpu.memory_space<vmem>>, vector<1x1x16x1x128xbf16>
    %164 = vector.shape_cast %163 : vector<1x1x16x1x128xbf16> to vector<16x128xbf16>
    %165 = vector.extract_strided_slice %164 {offsets = [0, 1], sizes = [16, 32], strides = [1, 1]} : vector<16x128xbf16> to vector<16x32xbf16>
    %166 = vector.extract_strided_slice %164 {offsets = [0, 3], sizes = [16, 32], strides = [1, 1]} : vector<16x128xbf16> to vector<16x32xbf16>
    %167 = vector.extract_strided_slice %164 {offsets = [0, 5], sizes = [16, 32], strides = [1, 1]} : vector<16x128xbf16> to vector<16x32xbf16>
    %168 = vector.extract_strided_slice %164 {offsets = [0, 0], sizes = [16, 32], strides = [1, 1]} : vector<16x128xbf16> to vector<16x32xbf16>
    %169 = vector.extract_strided_slice %164 {offsets = [0, 2], sizes = [16, 32], strides = [1, 1]} : vector<16x128xbf16> to vector<16x32xbf16>
    %170 = vector.extract_strided_slice %164 {offsets = [0, 4], sizes = [16, 32], strides = [1, 1]} : vector<16x128xbf16> to vector<16x32xbf16>
    %171 = tpu.concatenate %165, %166, %167, %168, %169, %170 in 0 : vector<16x32xbf16>, vector<16x32xbf16>, vector<16x32xbf16>, vector<16x32xbf16>, vector<16x32xbf16>, vector<16x32xbf16> -> vector<96x32xbf16>
    %cst_77 = arith.constant dense<0.000000e+00> : vector<8x32xf32>
    %172 = tpu.matmul %2, %111, %cst_77 {dimension_numbers = #tpu.dot_dimension_numbers<[1], [0], [0], [1], [0, 0, 1, 1], [], []>} : vector<8x96xbf16>, vector<96x32xbf16>, vector<8x32xf32> -> vector<8x32xf32>
    %cst_78 = arith.constant dense<0.000000e+00> : vector<8x32xf32>
    %173 = tpu.matmul %4, %141, %cst_78 {dimension_numbers = #tpu.dot_dimension_numbers<[1], [0], [0], [1], [0, 0, 1, 1], [], []>} : vector<8x96xbf16>, vector<96x32xbf16>, vector<8x32xf32> -> vector<8x32xf32>
    %174 = arith.addf %172, %173 : vector<8x32xf32>
    %cst_79 = arith.constant dense<0.000000e+00> : vector<8x32xf32>
    %175 = tpu.matmul %6, %171, %cst_79 {dimension_numbers = #tpu.dot_dimension_numbers<[1], [0], [0], [1], [0, 0, 1, 1], [], []>} : vector<8x96xbf16>, vector<96x32xbf16>, vector<8x32xf32> -> vector<8x32xf32>
    %176 = arith.addf %174, %175 : vector<8x32xf32>
    %177 = arith.addf %176, %0 : vector<8x32xf32>
    %c1_i32_80 = arith.constant 1 : i32
    %178 = tpu.dynamic_rotate %177 by %c1_i32_80 dim 1 : vector<8x32xf32>, i32 -> vector<8x32xf32>
    %179 = vector.shape_cast %9 : vector<1x32xi1> to vector<1x32xi1>
    %180 = vector.broadcast %179 : vector<1x32xi1> to vector<8x32xi1>
    %181 = arith.select %180, %177, %178 : vector<8x32xi1>, vector<8x32xf32>
    %182 = arith.addf %177, %181 : vector<8x32xf32>
    %c7_i32_81 = arith.constant 7 : i32
    %183 = tpu.dynamic_rotate %152 by %c7_i32_81 dim 0 : vector<8x32xf32>, i32 -> vector<8x32xf32>
    %c1_i32_82 = arith.constant 1 : i32
    %184 = tpu.dynamic_rotate %182 by %c1_i32_82 dim 0 : vector<8x32xf32>, i32 -> vector<8x32xf32>
    %185 = vector.shape_cast %28 : vector<8x1xi1> to vector<8x1xi1>
    %186 = vector.broadcast %185 : vector<8x1xi1> to vector<8x32xi1>
    %187 = arith.select %186, %183, %184 : vector<8x32xi1>, vector<8x32xf32>
    %188 = arith.addf %182, %187 : vector<8x32xf32>
    %189 = vector.shape_cast %188 : vector<8x32xf32> to vector<4x2x32xf32>
    %c0_83 = arith.constant 0 : index
    %c0_84 = arith.constant 0 : index
    %c6_85 = arith.constant 6 : index
    %c0_86 = arith.constant 0 : index
    %190 = vector.load %arg5[%c0_83, %c0_84, %c6_85, %c0_86] : memref<1x4x32x32xf32, #tpu.memory_space<vmem>>, vector<1x4x2x32xf32>
    %191 = vector.shape_cast %190 : vector<1x4x2x32xf32> to vector<4x2x32xf32>
    %192 = vector.shape_cast %189 : vector<4x2x32xf32> to vector<1x4x2x32xf32>
    tpu.vector_store %arg5[%c0_83, %c0_84, %c6_85, %c0_86], %192 {strides = array<i32>} : memref<1x4x32x32xf32, #tpu.memory_space<vmem>>, vector<1x4x2x32xf32>,
    %c0_87 = arith.constant 0 : index
    %c0_88 = arith.constant 0 : index
    %c0_89 = arith.constant 0 : index
    %c7 = arith.constant 7 : index
    %c0_90 = arith.constant 0 : index
    %193 = vector.load %arg2[%c0_87, %c0_88, %c0_89, %c7, %c0_90] : memref<1x1x16x19x128xbf16, #tpu.memory_space<vmem>>, vector<1x1x16x1x128xbf16>
    %194 = vector.shape_cast %193 : vector<1x1x16x1x128xbf16> to vector<16x128xbf16>
    %195 = vector.extract_strided_slice %194 {offsets = [0, 1], sizes = [16, 32], strides = [1, 1]} : vector<16x128xbf16> to vector<16x32xbf16>
    %196 = vector.extract_strided_slice %194 {offsets = [0, 3], sizes = [16, 32], strides = [1, 1]} : vector<16x128xbf16> to vector<16x32xbf16>
    %197 = vector.extract_strided_slice %194 {offsets = [0, 5], sizes = [16, 32], strides = [1, 1]} : vector<16x128xbf16> to vector<16x32xbf16>
    %198 = vector.extract_strided_slice %194 {offsets = [0, 0], sizes = [16, 32], strides = [1, 1]} : vector<16x128xbf16> to vector<16x32xbf16>
    %199 = vector.extract_strided_slice %194 {offsets = [0, 2], sizes = [16, 32], strides = [1, 1]} : vector<16x128xbf16> to vector<16x32xbf16>
    %200 = vector.extract_strided_slice %194 {offsets = [0, 4], sizes = [16, 32], strides = [1, 1]} : vector<16x128xbf16> to vector<16x32xbf16>
    %201 = tpu.concatenate %195, %196, %197, %198, %199, %200 in 0 : vector<16x32xbf16>, vector<16x32xbf16>, vector<16x32xbf16>, vector<16x32xbf16>, vector<16x32xbf16>, vector<16x32xbf16> -> vector<96x32xbf16>
    %cst_91 = arith.constant dense<0.000000e+00> : vector<8x32xf32>
    %202 = tpu.matmul %2, %141, %cst_91 {dimension_numbers = #tpu.dot_dimension_numbers<[1], [0], [0], [1], [0, 0, 1, 1], [], []>} : vector<8x96xbf16>, vector<96x32xbf16>, vector<8x32xf32> -> vector<8x32xf32>
    %cst_92 = arith.constant dense<0.000000e+00> : vector<8x32xf32>
    %203 = tpu.matmul %4, %171, %cst_92 {dimension_numbers = #tpu.dot_dimension_numbers<[1], [0], [0], [1], [0, 0, 1, 1], [], []>} : vector<8x96xbf16>, vector<96x32xbf16>, vector<8x32xf32> -> vector<8x32xf32>
    %204 = arith.addf %202, %203 : vector<8x32xf32>
    %cst_93 = arith.constant dense<0.000000e+00> : vector<8x32xf32>
    %205 = tpu.matmul %6, %201, %cst_93 {dimension_numbers = #tpu.dot_dimension_numbers<[1], [0], [0], [1], [0, 0, 1, 1], [], []>} : vector<8x96xbf16>, vector<96x32xbf16>, vector<8x32xf32> -> vector<8x32xf32>
    %206 = arith.addf %204, %205 : vector<8x32xf32>
    %207 = arith.addf %206, %0 : vector<8x32xf32>
    %c1_i32_94 = arith.constant 1 : i32
    %208 = tpu.dynamic_rotate %207 by %c1_i32_94 dim 1 : vector<8x32xf32>, i32 -> vector<8x32xf32>
    %209 = vector.shape_cast %9 : vector<1x32xi1> to vector<1x32xi1>
    %210 = vector.broadcast %209 : vector<1x32xi1> to vector<8x32xi1>
    %211 = arith.select %210, %207, %208 : vector<8x32xi1>, vector<8x32xf32>
    %212 = arith.addf %207, %211 : vector<8x32xf32>
    %c7_i32_95 = arith.constant 7 : i32
    %213 = tpu.dynamic_rotate %182 by %c7_i32_95 dim 0 : vector<8x32xf32>, i32 -> vector<8x32xf32>
    %c1_i32_96 = arith.constant 1 : i32
    %214 = tpu.dynamic_rotate %212 by %c1_i32_96 dim 0 : vector<8x32xf32>, i32 -> vector<8x32xf32>
    %215 = vector.shape_cast %28 : vector<8x1xi1> to vector<8x1xi1>
    %216 = vector.broadcast %215 : vector<8x1xi1> to vector<8x32xi1>
    %217 = arith.select %216, %213, %214 : vector<8x32xi1>, vector<8x32xf32>
    %218 = arith.addf %212, %217 : vector<8x32xf32>
    %219 = vector.shape_cast %218 : vector<8x32xf32> to vector<4x2x32xf32>
    %c0_97 = arith.constant 0 : index
    %c0_98 = arith.constant 0 : index
    %c8 = arith.constant 8 : index
    %c0_99 = arith.constant 0 : index
    %220 = vector.load %arg5[%c0_97, %c0_98, %c8, %c0_99] : memref<1x4x32x32xf32, #tpu.memory_space<vmem>>, vector<1x4x2x32xf32>
    %221 = vector.shape_cast %220 : vector<1x4x2x32xf32> to vector<4x2x32xf32>
    %222 = vector.shape_cast %219 : vector<4x2x32xf32> to vector<1x4x2x32xf32>
    tpu.vector_store %arg5[%c0_97, %c0_98, %c8, %c0_99], %222 {strides = array<i32>} : memref<1x4x32x32xf32, #tpu.memory_space<vmem>>, vector<1x4x2x32xf32>,
    %c0_100 = arith.constant 0 : index
    %c0_101 = arith.constant 0 : index
    %c0_102 = arith.constant 0 : index
    %c8_103 = arith.constant 8 : index
    %c0_104 = arith.constant 0 : index
    %223 = vector.load %arg2[%c0_100, %c0_101, %c0_102, %c8_103, %c0_104] : memref<1x1x16x19x128xbf16, #tpu.memory_space<vmem>>, vector<1x1x16x1x128xbf16>
    %224 = vector.shape_cast %223 : vector<1x1x16x1x128xbf16> to vector<16x128xbf16>
    %225 = vector.extract_strided_slice %224 {offsets = [0, 1], sizes = [16, 32], strides = [1, 1]} : vector<16x128xbf16> to vector<16x32xbf16>
    %226 = vector.extract_strided_slice %224 {offsets = [0, 3], sizes = [16, 32], strides = [1, 1]} : vector<16x128xbf16> to vector<16x32xbf16>
    %227 = vector.extract_strided_slice %224 {offsets = [0, 5], sizes = [16, 32], strides = [1, 1]} : vector<16x128xbf16> to vector<16x32xbf16>
    %228 = vector.extract_strided_slice %224 {offsets = [0, 0], sizes = [16, 32], strides = [1, 1]} : vector<16x128xbf16> to vector<16x32xbf16>
    %229 = vector.extract_strided_slice %224 {offsets = [0, 2], sizes = [16, 32], strides = [1, 1]} : vector<16x128xbf16> to vector<16x32xbf16>
    %230 = vector.extract_strided_slice %224 {offsets = [0, 4], sizes = [16, 32], strides = [1, 1]} : vector<16x128xbf16> to vector<16x32xbf16>
    %231 = tpu.concatenate %225, %226, %227, %228, %229, %230 in 0 : vector<16x32xbf16>, vector<16x32xbf16>, vector<16x32xbf16>, vector<16x32xbf16>, vector<16x32xbf16>, vector<16x32xbf16> -> vector<96x32xbf16>
    %cst_105 = arith.constant dense<0.000000e+00> : vector<8x32xf32>
    %232 = tpu.matmul %2, %171, %cst_105 {dimension_numbers = #tpu.dot_dimension_numbers<[1], [0], [0], [1], [0, 0, 1, 1], [], []>} : vector<8x96xbf16>, vector<96x32xbf16>, vector<8x32xf32> -> vector<8x32xf32>
    %cst_106 = arith.constant dense<0.000000e+00> : vector<8x32xf32>
    %233 = tpu.matmul %4, %201, %cst_106 {dimension_numbers = #tpu.dot_dimension_numbers<[1], [0], [0], [1], [0, 0, 1, 1], [], []>} : vector<8x96xbf16>, vector<96x32xbf16>, vector<8x32xf32> -> vector<8x32xf32>
    %234 = arith.addf %232, %233 : vector<8x32xf32>
    %cst_107 = arith.constant dense<0.000000e+00> : vector<8x32xf32>
    %235 = tpu.matmul %6, %231, %cst_107 {dimension_numbers = #tpu.dot_dimension_numbers<[1], [0], [0], [1], [0, 0, 1, 1], [], []>} : vector<8x96xbf16>, vector<96x32xbf16>, vector<8x32xf32> -> vector<8x32xf32>
    %236 = arith.addf %234, %235 : vector<8x32xf32>
    %237 = arith.addf %236, %0 : vector<8x32xf32>
    %c1_i32_108 = arith.constant 1 : i32
    %238 = tpu.dynamic_rotate %237 by %c1_i32_108 dim 1 : vector<8x32xf32>, i32 -> vector<8x32xf32>
    %239 = vector.shape_cast %9 : vector<1x32xi1> to vector<1x32xi1>
    %240 = vector.broadcast %239 : vector<1x32xi1> to vector<8x32xi1>
    %241 = arith.select %240, %237, %238 : vector<8x32xi1>, vector<8x32xf32>
    %242 = arith.addf %237, %241 : vector<8x32xf32>
    %c7_i32_109 = arith.constant 7 : i32
    %243 = tpu.dynamic_rotate %212 by %c7_i32_109 dim 0 : vector<8x32xf32>, i32 -> vector<8x32xf32>
    %c1_i32_110 = arith.constant 1 : i32
    %244 = tpu.dynamic_rotate %242 by %c1_i32_110 dim 0 : vector<8x32xf32>, i32 -> vector<8x32xf32>
    %245 = vector.shape_cast %28 : vector<8x1xi1> to vector<8x1xi1>
    %246 = vector.broadcast %245 : vector<8x1xi1> to vector<8x32xi1>
    %247 = arith.select %246, %243, %244 : vector<8x32xi1>, vector<8x32xf32>
    %248 = arith.addf %242, %247 : vector<8x32xf32>
    %249 = vector.shape_cast %248 : vector<8x32xf32> to vector<4x2x32xf32>
    %c0_111 = arith.constant 0 : index
    %c0_112 = arith.constant 0 : index
    %c10 = arith.constant 10 : index
    %c0_113 = arith.constant 0 : index
    %250 = vector.load %arg5[%c0_111, %c0_112, %c10, %c0_113] : memref<1x4x32x32xf32, #tpu.memory_space<vmem>>, vector<1x4x2x32xf32>
    %251 = vector.shape_cast %250 : vector<1x4x2x32xf32> to vector<4x2x32xf32>
    %252 = vector.shape_cast %249 : vector<4x2x32xf32> to vector<1x4x2x32xf32>
    tpu.vector_store %arg5[%c0_111, %c0_112, %c10, %c0_113], %252 {strides = array<i32>} : memref<1x4x32x32xf32, #tpu.memory_space<vmem>>, vector<1x4x2x32xf32>,
    %c0_114 = arith.constant 0 : index
    %c0_115 = arith.constant 0 : index
    %c0_116 = arith.constant 0 : index
    %c9 = arith.constant 9 : index
    %c0_117 = arith.constant 0 : index
    %253 = vector.load %arg2[%c0_114, %c0_115, %c0_116, %c9, %c0_117] : memref<1x1x16x19x128xbf16, #tpu.memory_space<vmem>>, vector<1x1x16x1x128xbf16>
    %254 = vector.shape_cast %253 : vector<1x1x16x1x128xbf16> to vector<16x128xbf16>
    %255 = vector.extract_strided_slice %254 {offsets = [0, 1], sizes = [16, 32], strides = [1, 1]} : vector<16x128xbf16> to vector<16x32xbf16>
    %256 = vector.extract_strided_slice %254 {offsets = [0, 3], sizes = [16, 32], strides = [1, 1]} : vector<16x128xbf16> to vector<16x32xbf16>
    %257 = vector.extract_strided_slice %254 {offsets = [0, 5], sizes = [16, 32], strides = [1, 1]} : vector<16x128xbf16> to vector<16x32xbf16>
    %258 = vector.extract_strided_slice %254 {offsets = [0, 0], sizes = [16, 32], strides = [1, 1]} : vector<16x128xbf16> to vector<16x32xbf16>
    %259 = vector.extract_strided_slice %254 {offsets = [0, 2], sizes = [16, 32], strides = [1, 1]} : vector<16x128xbf16> to vector<16x32xbf16>
    %260 = vector.extract_strided_slice %254 {offsets = [0, 4], sizes = [16, 32], strides = [1, 1]} : vector<16x128xbf16> to vector<16x32xbf16>
    %261 = tpu.concatenate %255, %256, %257, %258, %259, %260 in 0 : vector<16x32xbf16>, vector<16x32xbf16>, vector<16x32xbf16>, vector<16x32xbf16>, vector<16x32xbf16>, vector<16x32xbf16> -> vector<96x32xbf16>
    %cst_118 = arith.constant dense<0.000000e+00> : vector<8x32xf32>
    %262 = tpu.matmul %2, %201, %cst_118 {dimension_numbers = #tpu.dot_dimension_numbers<[1], [0], [0], [1], [0, 0, 1, 1], [], []>} : vector<8x96xbf16>, vector<96x32xbf16>, vector<8x32xf32> -> vector<8x32xf32>
    %cst_119 = arith.constant dense<0.000000e+00> : vector<8x32xf32>
    %263 = tpu.matmul %4, %231, %cst_119 {dimension_numbers = #tpu.dot_dimension_numbers<[1], [0], [0], [1], [0, 0, 1, 1], [], []>} : vector<8x96xbf16>, vector<96x32xbf16>, vector<8x32xf32> -> vector<8x32xf32>
    %264 = arith.addf %262, %263 : vector<8x32xf32>
    %cst_120 = arith.constant dense<0.000000e+00> : vector<8x32xf32>
    %265 = tpu.matmul %6, %261, %cst_120 {dimension_numbers = #tpu.dot_dimension_numbers<[1], [0], [0], [1], [0, 0, 1, 1], [], []>} : vector<8x96xbf16>, vector<96x32xbf16>, vector<8x32xf32> -> vector<8x32xf32>
    %266 = arith.addf %264, %265 : vector<8x32xf32>
    %267 = arith.addf %266, %0 : vector<8x32xf32>
    %c1_i32_121 = arith.constant 1 : i32
    %268 = tpu.dynamic_rotate %267 by %c1_i32_121 dim 1 : vector<8x32xf32>, i32 -> vector<8x32xf32>
    %269 = vector.shape_cast %9 : vector<1x32xi1> to vector<1x32xi1>
    %270 = vector.broadcast %269 : vector<1x32xi1> to vector<8x32xi1>
    %271 = arith.select %270, %267, %268 : vector<8x32xi1>, vector<8x32xf32>
    %272 = arith.addf %267, %271 : vector<8x32xf32>
    %c7_i32_122 = arith.constant 7 : i32
    %273 = tpu.dynamic_rotate %242 by %c7_i32_122 dim 0 : vector<8x32xf32>, i32 -> vector<8x32xf32>
    %c1_i32_123 = arith.constant 1 : i32
    %274 = tpu.dynamic_rotate %272 by %c1_i32_123 dim 0 : vector<8x32xf32>, i32 -> vector<8x32xf32>
    %275 = vector.shape_cast %28 : vector<8x1xi1> to vector<8x1xi1>
    %276 = vector.broadcast %275 : vector<8x1xi1> to vector<8x32xi1>
    %277 = arith.select %276, %273, %274 : vector<8x32xi1>, vector<8x32xf32>
    %278 = arith.addf %272, %277 : vector<8x32xf32>
    %279 = vector.shape_cast %278 : vector<8x32xf32> to vector<4x2x32xf32>
    %c0_124 = arith.constant 0 : index
    %c0_125 = arith.constant 0 : index
    %c12 = arith.constant 12 : index
    %c0_126 = arith.constant 0 : index
    %280 = vector.load %arg5[%c0_124, %c0_125, %c12, %c0_126] : memref<1x4x32x32xf32, #tpu.memory_space<vmem>>, vector<1x4x2x32xf32>
    %281 = vector.shape_cast %280 : vector<1x4x2x32xf32> to vector<4x2x32xf32>
    %282 = vector.shape_cast %279 : vector<4x2x32xf32> to vector<1x4x2x32xf32>
    tpu.vector_store %arg5[%c0_124, %c0_125, %c12, %c0_126], %282 {strides = array<i32>} : memref<1x4x32x32xf32, #tpu.memory_space<vmem>>, vector<1x4x2x32xf32>,
    %c0_127 = arith.constant 0 : index
    %c0_128 = arith.constant 0 : index
    %c0_129 = arith.constant 0 : index
    %c10_130 = arith.constant 10 : index
    %c0_131 = arith.constant 0 : index
    %283 = vector.load %arg2[%c0_127, %c0_128, %c0_129, %c10_130, %c0_131] : memref<1x1x16x19x128xbf16, #tpu.memory_space<vmem>>, vector<1x1x16x1x128xbf16>
    %284 = vector.shape_cast %283 : vector<1x1x16x1x128xbf16> to vector<16x128xbf16>
    %285 = vector.extract_strided_slice %284 {offsets = [0, 1], sizes = [16, 32], strides = [1, 1]} : vector<16x128xbf16> to vector<16x32xbf16>
    %286 = vector.extract_strided_slice %284 {offsets = [0, 3], sizes = [16, 32], strides = [1, 1]} : vector<16x128xbf16> to vector<16x32xbf16>
    %287 = vector.extract_strided_slice %284 {offsets = [0, 5], sizes = [16, 32], strides = [1, 1]} : vector<16x128xbf16> to vector<16x32xbf16>
    %288 = vector.extract_strided_slice %284 {offsets = [0, 0], sizes = [16, 32], strides = [1, 1]} : vector<16x128xbf16> to vector<16x32xbf16>
    %289 = vector.extract_strided_slice %284 {offsets = [0, 2], sizes = [16, 32], strides = [1, 1]} : vector<16x128xbf16> to vector<16x32xbf16>
    %290 = vector.extract_strided_slice %284 {offsets = [0, 4], sizes = [16, 32], strides = [1, 1]} : vector<16x128xbf16> to vector<16x32xbf16>
    %291 = tpu.concatenate %285, %286, %287, %288, %289, %290 in 0 : vector<16x32xbf16>, vector<16x32xbf16>, vector<16x32xbf16>, vector<16x32xbf16>, vector<16x32xbf16>, vector<16x32xbf16> -> vector<96x32xbf16>
    %cst_132 = arith.constant dense<0.000000e+00> : vector<8x32xf32>
    %292 = tpu.matmul %2, %231, %cst_132 {dimension_numbers = #tpu.dot_dimension_numbers<[1], [0], [0], [1], [0, 0, 1, 1], [], []>} : vector<8x96xbf16>, vector<96x32xbf16>, vector<8x32xf32> -> vector<8x32xf32>
    %cst_133 = arith.constant dense<0.000000e+00> : vector<8x32xf32>
    %293 = tpu.matmul %4, %261, %cst_133 {dimension_numbers = #tpu.dot_dimension_numbers<[1], [0], [0], [1], [0, 0, 1, 1], [], []>} : vector<8x96xbf16>, vector<96x32xbf16>, vector<8x32xf32> -> vector<8x32xf32>
    %294 = arith.addf %292, %293 : vector<8x32xf32>
    %cst_134 = arith.constant dense<0.000000e+00> : vector<8x32xf32>
    %295 = tpu.matmul %6, %291, %cst_134 {dimension_numbers = #tpu.dot_dimension_numbers<[1], [0], [0], [1], [0, 0, 1, 1], [], []>} : vector<8x96xbf16>, vector<96x32xbf16>, vector<8x32xf32> -> vector<8x32xf32>
    %296 = arith.addf %294, %295 : vector<8x32xf32>
    %297 = arith.addf %296, %0 : vector<8x32xf32>
    %c1_i32_135 = arith.constant 1 : i32
    %298 = tpu.dynamic_rotate %297 by %c1_i32_135 dim 1 : vector<8x32xf32>, i32 -> vector<8x32xf32>
    %299 = vector.shape_cast %9 : vector<1x32xi1> to vector<1x32xi1>
    %300 = vector.broadcast %299 : vector<1x32xi1> to vector<8x32xi1>
    %301 = arith.select %300, %297, %298 : vector<8x32xi1>, vector<8x32xf32>
    %302 = arith.addf %297, %301 : vector<8x32xf32>
    %c7_i32_136 = arith.constant 7 : i32
    %303 = tpu.dynamic_rotate %272 by %c7_i32_136 dim 0 : vector<8x32xf32>, i32 -> vector<8x32xf32>
    %c1_i32_137 = arith.constant 1 : i32
    %304 = tpu.dynamic_rotate %302 by %c1_i32_137 dim 0 : vector<8x32xf32>, i32 -> vector<8x32xf32>
    %305 = vector.shape_cast %28 : vector<8x1xi1> to vector<8x1xi1>
    %306 = vector.broadcast %305 : vector<8x1xi1> to vector<8x32xi1>
    %307 = arith.select %306, %303, %304 : vector<8x32xi1>, vector<8x32xf32>
    %308 = arith.addf %302, %307 : vector<8x32xf32>
    %309 = vector.shape_cast %308 : vector<8x32xf32> to vector<4x2x32xf32>
    %c0_138 = arith.constant 0 : index
    %c0_139 = arith.constant 0 : index
    %c14 = arith.constant 14 : index
    %c0_140 = arith.constant 0 : index
    %310 = vector.load %arg5[%c0_138, %c0_139, %c14, %c0_140] : memref<1x4x32x32xf32, #tpu.memory_space<vmem>>, vector<1x4x2x32xf32>
    %311 = vector.shape_cast %310 : vector<1x4x2x32xf32> to vector<4x2x32xf32>
    %312 = vector.shape_cast %309 : vector<4x2x32xf32> to vector<1x4x2x32xf32>
    tpu.vector_store %arg5[%c0_138, %c0_139, %c14, %c0_140], %312 {strides = array<i32>} : memref<1x4x32x32xf32, #tpu.memory_space<vmem>>, vector<1x4x2x32xf32>,
    %c0_141 = arith.constant 0 : index
    %c0_142 = arith.constant 0 : index
    %c0_143 = arith.constant 0 : index
    %c11 = arith.constant 11 : index
    %c0_144 = arith.constant 0 : index
    %313 = vector.load %arg2[%c0_141, %c0_142, %c0_143, %c11, %c0_144] : memref<1x1x16x19x128xbf16, #tpu.memory_space<vmem>>, vector<1x1x16x1x128xbf16>
    %314 = vector.shape_cast %313 : vector<1x1x16x1x128xbf16> to vector<16x128xbf16>
    %315 = vector.extract_strided_slice %314 {offsets = [0, 1], sizes = [16, 32], strides = [1, 1]} : vector<16x128xbf16> to vector<16x32xbf16>
    %316 = vector.extract_strided_slice %314 {offsets = [0, 3], sizes = [16, 32], strides = [1, 1]} : vector<16x128xbf16> to vector<16x32xbf16>
    %317 = vector.extract_strided_slice %314 {offsets = [0, 5], sizes = [16, 32], strides = [1, 1]} : vector<16x128xbf16> to vector<16x32xbf16>
    %318 = vector.extract_strided_slice %314 {offsets = [0, 0], sizes = [16, 32], strides = [1, 1]} : vector<16x128xbf16> to vector<16x32xbf16>
    %319 = vector.extract_strided_slice %314 {offsets = [0, 2], sizes = [16, 32], strides = [1, 1]} : vector<16x128xbf16> to vector<16x32xbf16>
    %320 = vector.extract_strided_slice %314 {offsets = [0, 4], sizes = [16, 32], strides = [1, 1]} : vector<16x128xbf16> to vector<16x32xbf16>
    %321 = tpu.concatenate %315, %316, %317, %318, %319, %320 in 0 : vector<16x32xbf16>, vector<16x32xbf16>, vector<16x32xbf16>, vector<16x32xbf16>, vector<16x32xbf16>, vector<16x32xbf16> -> vector<96x32xbf16>
    %cst_145 = arith.constant dense<0.000000e+00> : vector<8x32xf32>
    %322 = tpu.matmul %2, %261, %cst_145 {dimension_numbers = #tpu.dot_dimension_numbers<[1], [0], [0], [1], [0, 0, 1, 1], [], []>} : vector<8x96xbf16>, vector<96x32xbf16>, vector<8x32xf32> -> vector<8x32xf32>
    %cst_146 = arith.constant dense<0.000000e+00> : vector<8x32xf32>
    %323 = tpu.matmul %4, %291, %cst_146 {dimension_numbers = #tpu.dot_dimension_numbers<[1], [0], [0], [1], [0, 0, 1, 1], [], []>} : vector<8x96xbf16>, vector<96x32xbf16>, vector<8x32xf32> -> vector<8x32xf32>
    %324 = arith.addf %322, %323 : vector<8x32xf32>
    %cst_147 = arith.constant dense<0.000000e+00> : vector<8x32xf32>
    %325 = tpu.matmul %6, %321, %cst_147 {dimension_numbers = #tpu.dot_dimension_numbers<[1], [0], [0], [1], [0, 0, 1, 1], [], []>} : vector<8x96xbf16>, vector<96x32xbf16>, vector<8x32xf32> -> vector<8x32xf32>
    %326 = arith.addf %324, %325 : vector<8x32xf32>
    %327 = arith.addf %326, %0 : vector<8x32xf32>
    %c1_i32_148 = arith.constant 1 : i32
    %328 = tpu.dynamic_rotate %327 by %c1_i32_148 dim 1 : vector<8x32xf32>, i32 -> vector<8x32xf32>
    %329 = vector.shape_cast %9 : vector<1x32xi1> to vector<1x32xi1>
    %330 = vector.broadcast %329 : vector<1x32xi1> to vector<8x32xi1>
    %331 = arith.select %330, %327, %328 : vector<8x32xi1>, vector<8x32xf32>
    %332 = arith.addf %327, %331 : vector<8x32xf32>
    %c7_i32_149 = arith.constant 7 : i32
    %333 = tpu.dynamic_rotate %302 by %c7_i32_149 dim 0 : vector<8x32xf32>, i32 -> vector<8x32xf32>
    %c1_i32_150 = arith.constant 1 : i32
    %334 = tpu.dynamic_rotate %332 by %c1_i32_150 dim 0 : vector<8x32xf32>, i32 -> vector<8x32xf32>
    %335 = vector.shape_cast %28 : vector<8x1xi1> to vector<8x1xi1>
    %336 = vector.broadcast %335 : vector<8x1xi1> to vector<8x32xi1>
    %337 = arith.select %336, %333, %334 : vector<8x32xi1>, vector<8x32xf32>
    %338 = arith.addf %332, %337 : vector<8x32xf32>
    %339 = vector.shape_cast %338 : vector<8x32xf32> to vector<4x2x32xf32>
    %c0_151 = arith.constant 0 : index
    %c0_152 = arith.constant 0 : index
    %c16 = arith.constant 16 : index
    %c0_153 = arith.constant 0 : index
    %340 = vector.load %arg5[%c0_151, %c0_152, %c16, %c0_153] : memref<1x4x32x32xf32, #tpu.memory_space<vmem>>, vector<1x4x2x32xf32>
    %341 = vector.shape_cast %340 : vector<1x4x2x32xf32> to vector<4x2x32xf32>
    %342 = vector.shape_cast %339 : vector<4x2x32xf32> to vector<1x4x2x32xf32>
    tpu.vector_store %arg5[%c0_151, %c0_152, %c16, %c0_153], %342 {strides = array<i32>} : memref<1x4x32x32xf32, #tpu.memory_space<vmem>>, vector<1x4x2x32xf32>,
    %c0_154 = arith.constant 0 : index
    %c0_155 = arith.constant 0 : index
    %c0_156 = arith.constant 0 : index
    %c12_157 = arith.constant 12 : index
    %c0_158 = arith.constant 0 : index
    %343 = vector.load %arg2[%c0_154, %c0_155, %c0_156, %c12_157, %c0_158] : memref<1x1x16x19x128xbf16, #tpu.memory_space<vmem>>, vector<1x1x16x1x128xbf16>
    %344 = vector.shape_cast %343 : vector<1x1x16x1x128xbf16> to vector<16x128xbf16>
    %345 = vector.extract_strided_slice %344 {offsets = [0, 1], sizes = [16, 32], strides = [1, 1]} : vector<16x128xbf16> to vector<16x32xbf16>
    %346 = vector.extract_strided_slice %344 {offsets = [0, 3], sizes = [16, 32], strides = [1, 1]} : vector<16x128xbf16> to vector<16x32xbf16>
    %347 = vector.extract_strided_slice %344 {offsets = [0, 5], sizes = [16, 32], strides = [1, 1]} : vector<16x128xbf16> to vector<16x32xbf16>
    %348 = vector.extract_strided_slice %344 {offsets = [0, 0], sizes = [16, 32], strides = [1, 1]} : vector<16x128xbf16> to vector<16x32xbf16>
    %349 = vector.extract_strided_slice %344 {offsets = [0, 2], sizes = [16, 32], strides = [1, 1]} : vector<16x128xbf16> to vector<16x32xbf16>
    %350 = vector.extract_strided_slice %344 {offsets = [0, 4], sizes = [16, 32], strides = [1, 1]} : vector<16x128xbf16> to vector<16x32xbf16>
    %351 = tpu.concatenate %345, %346, %347, %348, %349, %350 in 0 : vector<16x32xbf16>, vector<16x32xbf16>, vector<16x32xbf16>, vector<16x32xbf16>, vector<16x32xbf16>, vector<16x32xbf16> -> vector<96x32xbf16>
    %cst_159 = arith.constant dense<0.000000e+00> : vector<8x32xf32>
    %352 = tpu.matmul %2, %291, %cst_159 {dimension_numbers = #tpu.dot_dimension_numbers<[1], [0], [0], [1], [0, 0, 1, 1], [], []>} : vector<8x96xbf16>, vector<96x32xbf16>, vector<8x32xf32> -> vector<8x32xf32>
    %cst_160 = arith.constant dense<0.000000e+00> : vector<8x32xf32>
    %353 = tpu.matmul %4, %321, %cst_160 {dimension_numbers = #tpu.dot_dimension_numbers<[1], [0], [0], [1], [0, 0, 1, 1], [], []>} : vector<8x96xbf16>, vector<96x32xbf16>, vector<8x32xf32> -> vector<8x32xf32>
    %354 = arith.addf %352, %353 : vector<8x32xf32>
    %cst_161 = arith.constant dense<0.000000e+00> : vector<8x32xf32>
    %355 = tpu.matmul %6, %351, %cst_161 {dimension_numbers = #tpu.dot_dimension_numbers<[1], [0], [0], [1], [0, 0, 1, 1], [], []>} : vector<8x96xbf16>, vector<96x32xbf16>, vector<8x32xf32> -> vector<8x32xf32>
    %356 = arith.addf %354, %355 : vector<8x32xf32>
    %357 = arith.addf %356, %0 : vector<8x32xf32>
    %c1_i32_162 = arith.constant 1 : i32
    %358 = tpu.dynamic_rotate %357 by %c1_i32_162 dim 1 : vector<8x32xf32>, i32 -> vector<8x32xf32>
    %359 = vector.shape_cast %9 : vector<1x32xi1> to vector<1x32xi1>
    %360 = vector.broadcast %359 : vector<1x32xi1> to vector<8x32xi1>
    %361 = arith.select %360, %357, %358 : vector<8x32xi1>, vector<8x32xf32>
    %362 = arith.addf %357, %361 : vector<8x32xf32>
    %c7_i32_163 = arith.constant 7 : i32
    %363 = tpu.dynamic_rotate %332 by %c7_i32_163 dim 0 : vector<8x32xf32>, i32 -> vector<8x32xf32>
    %c1_i32_164 = arith.constant 1 : i32
    %364 = tpu.dynamic_rotate %362 by %c1_i32_164 dim 0 : vector<8x32xf32>, i32 -> vector<8x32xf32>
    %365 = vector.shape_cast %28 : vector<8x1xi1> to vector<8x1xi1>
    %366 = vector.broadcast %365 : vector<8x1xi1> to vector<8x32xi1>
    %367 = arith.select %366, %363, %364 : vector<8x32xi1>, vector<8x32xf32>
    %368 = arith.addf %362, %367 : vector<8x32xf32>
    %369 = vector.shape_cast %368 : vector<8x32xf32> to vector<4x2x32xf32>
    %c0_165 = arith.constant 0 : index
    %c0_166 = arith.constant 0 : index
    %c18 = arith.constant 18 : index
    %c0_167 = arith.constant 0 : index
    %370 = vector.load %arg5[%c0_165, %c0_166, %c18, %c0_167] : memref<1x4x32x32xf32, #tpu.memory_space<vmem>>, vector<1x4x2x32xf32>
    %371 = vector.shape_cast %370 : vector<1x4x2x32xf32> to vector<4x2x32xf32>
    %372 = vector.shape_cast %369 : vector<4x2x32xf32> to vector<1x4x2x32xf32>
    tpu.vector_store %arg5[%c0_165, %c0_166, %c18, %c0_167], %372 {strides = array<i32>} : memref<1x4x32x32xf32, #tpu.memory_space<vmem>>, vector<1x4x2x32xf32>,
    %c0_168 = arith.constant 0 : index
    %c0_169 = arith.constant 0 : index
    %c0_170 = arith.constant 0 : index
    %c13 = arith.constant 13 : index
    %c0_171 = arith.constant 0 : index
    %373 = vector.load %arg2[%c0_168, %c0_169, %c0_170, %c13, %c0_171] : memref<1x1x16x19x128xbf16, #tpu.memory_space<vmem>>, vector<1x1x16x1x128xbf16>
    %374 = vector.shape_cast %373 : vector<1x1x16x1x128xbf16> to vector<16x128xbf16>
    %375 = vector.extract_strided_slice %374 {offsets = [0, 1], sizes = [16, 32], strides = [1, 1]} : vector<16x128xbf16> to vector<16x32xbf16>
    %376 = vector.extract_strided_slice %374 {offsets = [0, 3], sizes = [16, 32], strides = [1, 1]} : vector<16x128xbf16> to vector<16x32xbf16>
    %377 = vector.extract_strided_slice %374 {offsets = [0, 5], sizes = [16, 32], strides = [1, 1]} : vector<16x128xbf16> to vector<16x32xbf16>
    %378 = vector.extract_strided_slice %374 {offsets = [0, 0], sizes = [16, 32], strides = [1, 1]} : vector<16x128xbf16> to vector<16x32xbf16>
    %379 = vector.extract_strided_slice %374 {offsets = [0, 2], sizes = [16, 32], strides = [1, 1]} : vector<16x128xbf16> to vector<16x32xbf16>
    %380 = vector.extract_strided_slice %374 {offsets = [0, 4], sizes = [16, 32], strides = [1, 1]} : vector<16x128xbf16> to vector<16x32xbf16>
    %381 = tpu.concatenate %375, %376, %377, %378, %379, %380 in 0 : vector<16x32xbf16>, vector<16x32xbf16>, vector<16x32xbf16>, vector<16x32xbf16>, vector<16x32xbf16>, vector<16x32xbf16> -> vector<96x32xbf16>
    %cst_172 = arith.constant dense<0.000000e+00> : vector<8x32xf32>
    %382 = tpu.matmul %2, %321, %cst_172 {dimension_numbers = #tpu.dot_dimension_numbers<[1], [0], [0], [1], [0, 0, 1, 1], [], []>} : vector<8x96xbf16>, vector<96x32xbf16>, vector<8x32xf32> -> vector<8x32xf32>
    %cst_173 = arith.constant dense<0.000000e+00> : vector<8x32xf32>
    %383 = tpu.matmul %4, %351, %cst_173 {dimension_numbers = #tpu.dot_dimension_numbers<[1], [0], [0], [1], [0, 0, 1, 1], [], []>} : vector<8x96xbf16>, vector<96x32xbf16>, vector<8x32xf32> -> vector<8x32xf32>
    %384 = arith.addf %382, %383 : vector<8x32xf32>
    %cst_174 = arith.constant dense<0.000000e+00> : vector<8x32xf32>
    %385 = tpu.matmul %6, %381, %cst_174 {dimension_numbers = #tpu.dot_dimension_numbers<[1], [0], [0], [1], [0, 0, 1, 1], [], []>} : vector<8x96xbf16>, vector<96x32xbf16>, vector<8x32xf32> -> vector<8x32xf32>
    %386 = arith.addf %384, %385 : vector<8x32xf32>
    %387 = arith.addf %386, %0 : vector<8x32xf32>
    %c1_i32_175 = arith.constant 1 : i32
    %388 = tpu.dynamic_rotate %387 by %c1_i32_175 dim 1 : vector<8x32xf32>, i32 -> vector<8x32xf32>
    %389 = vector.shape_cast %9 : vector<1x32xi1> to vector<1x32xi1>
    %390 = vector.broadcast %389 : vector<1x32xi1> to vector<8x32xi1>
    %391 = arith.select %390, %387, %388 : vector<8x32xi1>, vector<8x32xf32>
    %392 = arith.addf %387, %391 : vector<8x32xf32>
    %c7_i32_176 = arith.constant 7 : i32
    %393 = tpu.dynamic_rotate %362 by %c7_i32_176 dim 0 : vector<8x32xf32>, i32 -> vector<8x32xf32>
    %c1_i32_177 = arith.constant 1 : i32
    %394 = tpu.dynamic_rotate %392 by %c1_i32_177 dim 0 : vector<8x32xf32>, i32 -> vector<8x32xf32>
    %395 = vector.shape_cast %28 : vector<8x1xi1> to vector<8x1xi1>
    %396 = vector.broadcast %395 : vector<8x1xi1> to vector<8x32xi1>
    %397 = arith.select %396, %393, %394 : vector<8x32xi1>, vector<8x32xf32>
    %398 = arith.addf %392, %397 : vector<8x32xf32>
    %399 = vector.shape_cast %398 : vector<8x32xf32> to vector<4x2x32xf32>
    %c0_178 = arith.constant 0 : index
    %c0_179 = arith.constant 0 : index
    %c20 = arith.constant 20 : index
    %c0_180 = arith.constant 0 : index
    %400 = vector.load %arg5[%c0_178, %c0_179, %c20, %c0_180] : memref<1x4x32x32xf32, #tpu.memory_space<vmem>>, vector<1x4x2x32xf32>
    %401 = vector.shape_cast %400 : vector<1x4x2x32xf32> to vector<4x2x32xf32>
    %402 = vector.shape_cast %399 : vector<4x2x32xf32> to vector<1x4x2x32xf32>
    tpu.vector_store %arg5[%c0_178, %c0_179, %c20, %c0_180], %402 {strides = array<i32>} : memref<1x4x32x32xf32, #tpu.memory_space<vmem>>, vector<1x4x2x32xf32>,
    %c0_181 = arith.constant 0 : index
    %c0_182 = arith.constant 0 : index
    %c0_183 = arith.constant 0 : index
    %c14_184 = arith.constant 14 : index
    %c0_185 = arith.constant 0 : index
    %403 = vector.load %arg2[%c0_181, %c0_182, %c0_183, %c14_184, %c0_185] : memref<1x1x16x19x128xbf16, #tpu.memory_space<vmem>>, vector<1x1x16x1x128xbf16>
    %404 = vector.shape_cast %403 : vector<1x1x16x1x128xbf16> to vector<16x128xbf16>
    %405 = vector.extract_strided_slice %404 {offsets = [0, 1], sizes = [16, 32], strides = [1, 1]} : vector<16x128xbf16> to vector<16x32xbf16>
    %406 = vector.extract_strided_slice %404 {offsets = [0, 3], sizes = [16, 32], strides = [1, 1]} : vector<16x128xbf16> to vector<16x32xbf16>
    %407 = vector.extract_strided_slice %404 {offsets = [0, 5], sizes = [16, 32], strides = [1, 1]} : vector<16x128xbf16> to vector<16x32xbf16>
    %408 = vector.extract_strided_slice %404 {offsets = [0, 0], sizes = [16, 32], strides = [1, 1]} : vector<16x128xbf16> to vector<16x32xbf16>
    %409 = vector.extract_strided_slice %404 {offsets = [0, 2], sizes = [16, 32], strides = [1, 1]} : vector<16x128xbf16> to vector<16x32xbf16>
    %410 = vector.extract_strided_slice %404 {offsets = [0, 4], sizes = [16, 32], strides = [1, 1]} : vector<16x128xbf16> to vector<16x32xbf16>
    %411 = tpu.concatenate %405, %406, %407, %408, %409, %410 in 0 : vector<16x32xbf16>, vector<16x32xbf16>, vector<16x32xbf16>, vector<16x32xbf16>, vector<16x32xbf16>, vector<16x32xbf16> -> vector<96x32xbf16>
    %cst_186 = arith.constant dense<0.000000e+00> : vector<8x32xf32>
    %412 = tpu.matmul %2, %351, %cst_186 {dimension_numbers = #tpu.dot_dimension_numbers<[1], [0], [0], [1], [0, 0, 1, 1], [], []>} : vector<8x96xbf16>, vector<96x32xbf16>, vector<8x32xf32> -> vector<8x32xf32>
    %cst_187 = arith.constant dense<0.000000e+00> : vector<8x32xf32>
    %413 = tpu.matmul %4, %381, %cst_187 {dimension_numbers = #tpu.dot_dimension_numbers<[1], [0], [0], [1], [0, 0, 1, 1], [], []>} : vector<8x96xbf16>, vector<96x32xbf16>, vector<8x32xf32> -> vector<8x32xf32>
    %414 = arith.addf %412, %413 : vector<8x32xf32>
    %cst_188 = arith.constant dense<0.000000e+00> : vector<8x32xf32>
    %415 = tpu.matmul %6, %411, %cst_188 {dimension_numbers = #tpu.dot_dimension_numbers<[1], [0], [0], [1], [0, 0, 1, 1], [], []>} : vector<8x96xbf16>, vector<96x32xbf16>, vector<8x32xf32> -> vector<8x32xf32>
    %416 = arith.addf %414, %415 : vector<8x32xf32>
    %417 = arith.addf %416, %0 : vector<8x32xf32>
    %c1_i32_189 = arith.constant 1 : i32
    %418 = tpu.dynamic_rotate %417 by %c1_i32_189 dim 1 : vector<8x32xf32>, i32 -> vector<8x32xf32>
    %419 = vector.shape_cast %9 : vector<1x32xi1> to vector<1x32xi1>
    %420 = vector.broadcast %419 : vector<1x32xi1> to vector<8x32xi1>
    %421 = arith.select %420, %417, %418 : vector<8x32xi1>, vector<8x32xf32>
    %422 = arith.addf %417, %421 : vector<8x32xf32>
    %c7_i32_190 = arith.constant 7 : i32
    %423 = tpu.dynamic_rotate %392 by %c7_i32_190 dim 0 : vector<8x32xf32>, i32 -> vector<8x32xf32>
    %c1_i32_191 = arith.constant 1 : i32
    %424 = tpu.dynamic_rotate %422 by %c1_i32_191 dim 0 : vector<8x32xf32>, i32 -> vector<8x32xf32>
    %425 = vector.shape_cast %28 : vector<8x1xi1> to vector<8x1xi1>
    %426 = vector.broadcast %425 : vector<8x1xi1> to vector<8x32xi1>
    %427 = arith.select %426, %423, %424 : vector<8x32xi1>, vector<8x32xf32>
    %428 = arith.addf %422, %427 : vector<8x32xf32>
    %429 = vector.shape_cast %428 : vector<8x32xf32> to vector<4x2x32xf32>
    %c0_192 = arith.constant 0 : index
    %c0_193 = arith.constant 0 : index
    %c22 = arith.constant 22 : index
    %c0_194 = arith.constant 0 : index
    %430 = vector.load %arg5[%c0_192, %c0_193, %c22, %c0_194] : memref<1x4x32x32xf32, #tpu.memory_space<vmem>>, vector<1x4x2x32xf32>
    %431 = vector.shape_cast %430 : vector<1x4x2x32xf32> to vector<4x2x32xf32>
    %432 = vector.shape_cast %429 : vector<4x2x32xf32> to vector<1x4x2x32xf32>
    tpu.vector_store %arg5[%c0_192, %c0_193, %c22, %c0_194], %432 {strides = array<i32>} : memref<1x4x32x32xf32, #tpu.memory_space<vmem>>, vector<1x4x2x32xf32>,
    %c0_195 = arith.constant 0 : index
    %c0_196 = arith.constant 0 : index
    %c0_197 = arith.constant 0 : index
    %c15 = arith.constant 15 : index
    %c0_198 = arith.constant 0 : index
    %433 = vector.load %arg2[%c0_195, %c0_196, %c0_197, %c15, %c0_198] : memref<1x1x16x19x128xbf16, #tpu.memory_space<vmem>>, vector<1x1x16x1x128xbf16>
    %434 = vector.shape_cast %433 : vector<1x1x16x1x128xbf16> to vector<16x128xbf16>
    %435 = vector.extract_strided_slice %434 {offsets = [0, 1], sizes = [16, 32], strides = [1, 1]} : vector<16x128xbf16> to vector<16x32xbf16>
    %436 = vector.extract_strided_slice %434 {offsets = [0, 3], sizes = [16, 32], strides = [1, 1]} : vector<16x128xbf16> to vector<16x32xbf16>
    %437 = vector.extract_strided_slice %434 {offsets = [0, 5], sizes = [16, 32], strides = [1, 1]} : vector<16x128xbf16> to vector<16x32xbf16>
    %438 = vector.extract_strided_slice %434 {offsets = [0, 0], sizes = [16, 32], strides = [1, 1]} : vector<16x128xbf16> to vector<16x32xbf16>
    %439 = vector.extract_strided_slice %434 {offsets = [0, 2], sizes = [16, 32], strides = [1, 1]} : vector<16x128xbf16> to vector<16x32xbf16>
    %440 = vector.extract_strided_slice %434 {offsets = [0, 4], sizes = [16, 32], strides = [1, 1]} : vector<16x128xbf16> to vector<16x32xbf16>
    %441 = tpu.concatenate %435, %436, %437, %438, %439, %440 in 0 : vector<16x32xbf16>, vector<16x32xbf16>, vector<16x32xbf16>, vector<16x32xbf16>, vector<16x32xbf16>, vector<16x32xbf16> -> vector<96x32xbf16>
    %cst_199 = arith.constant dense<0.000000e+00> : vector<8x32xf32>
    %442 = tpu.matmul %2, %381, %cst_199 {dimension_numbers = #tpu.dot_dimension_numbers<[1], [0], [0], [1], [0, 0, 1, 1], [], []>} : vector<8x96xbf16>, vector<96x32xbf16>, vector<8x32xf32> -> vector<8x32xf32>
    %cst_200 = arith.constant dense<0.000000e+00> : vector<8x32xf32>
    %443 = tpu.matmul %4, %411, %cst_200 {dimension_numbers = #tpu.dot_dimension_numbers<[1], [0], [0], [1], [0, 0, 1, 1], [], []>} : vector<8x96xbf16>, vector<96x32xbf16>, vector<8x32xf32> -> vector<8x32xf32>
    %444 = arith.addf %442, %443 : vector<8x32xf32>
    %cst_201 = arith.constant dense<0.000000e+00> : vector<8x32xf32>
    %445 = tpu.matmul %6, %441, %cst_201 {dimension_numbers = #tpu.dot_dimension_numbers<[1], [0], [0], [1], [0, 0, 1, 1], [], []>} : vector<8x96xbf16>, vector<96x32xbf16>, vector<8x32xf32> -> vector<8x32xf32>
    %446 = arith.addf %444, %445 : vector<8x32xf32>
    %447 = arith.addf %446, %0 : vector<8x32xf32>
    %c1_i32_202 = arith.constant 1 : i32
    %448 = tpu.dynamic_rotate %447 by %c1_i32_202 dim 1 : vector<8x32xf32>, i32 -> vector<8x32xf32>
    %449 = vector.shape_cast %9 : vector<1x32xi1> to vector<1x32xi1>
    %450 = vector.broadcast %449 : vector<1x32xi1> to vector<8x32xi1>
    %451 = arith.select %450, %447, %448 : vector<8x32xi1>, vector<8x32xf32>
    %452 = arith.addf %447, %451 : vector<8x32xf32>
    %c7_i32_203 = arith.constant 7 : i32
    %453 = tpu.dynamic_rotate %422 by %c7_i32_203 dim 0 : vector<8x32xf32>, i32 -> vector<8x32xf32>
    %c1_i32_204 = arith.constant 1 : i32
    %454 = tpu.dynamic_rotate %452 by %c1_i32_204 dim 0 : vector<8x32xf32>, i32 -> vector<8x32xf32>
    %455 = vector.shape_cast %28 : vector<8x1xi1> to vector<8x1xi1>
    %456 = vector.broadcast %455 : vector<8x1xi1> to vector<8x32xi1>
    %457 = arith.select %456, %453, %454 : vector<8x32xi1>, vector<8x32xf32>
    %458 = arith.addf %452, %457 : vector<8x32xf32>
    %459 = vector.shape_cast %458 : vector<8x32xf32> to vector<4x2x32xf32>
    %c0_205 = arith.constant 0 : index
    %c0_206 = arith.constant 0 : index
    %c24 = arith.constant 24 : index
    %c0_207 = arith.constant 0 : index
    %460 = vector.load %arg5[%c0_205, %c0_206, %c24, %c0_207] : memref<1x4x32x32xf32, #tpu.memory_space<vmem>>, vector<1x4x2x32xf32>
    %461 = vector.shape_cast %460 : vector<1x4x2x32xf32> to vector<4x2x32xf32>
    %462 = vector.shape_cast %459 : vector<4x2x32xf32> to vector<1x4x2x32xf32>
    tpu.vector_store %arg5[%c0_205, %c0_206, %c24, %c0_207], %462 {strides = array<i32>} : memref<1x4x32x32xf32, #tpu.memory_space<vmem>>, vector<1x4x2x32xf32>,
    %c0_208 = arith.constant 0 : index
    %c0_209 = arith.constant 0 : index
    %c0_210 = arith.constant 0 : index
    %c16_211 = arith.constant 16 : index
    %c0_212 = arith.constant 0 : index
    %463 = vector.load %arg2[%c0_208, %c0_209, %c0_210, %c16_211, %c0_212] : memref<1x1x16x19x128xbf16, #tpu.memory_space<vmem>>, vector<1x1x16x1x128xbf16>
    %464 = vector.shape_cast %463 : vector<1x1x16x1x128xbf16> to vector<16x128xbf16>
    %465 = vector.extract_strided_slice %464 {offsets = [0, 1], sizes = [16, 32], strides = [1, 1]} : vector<16x128xbf16> to vector<16x32xbf16>
    %466 = vector.extract_strided_slice %464 {offsets = [0, 3], sizes = [16, 32], strides = [1, 1]} : vector<16x128xbf16> to vector<16x32xbf16>
    %467 = vector.extract_strided_slice %464 {offsets = [0, 5], sizes = [16, 32], strides = [1, 1]} : vector<16x128xbf16> to vector<16x32xbf16>
    %468 = vector.extract_strided_slice %464 {offsets = [0, 0], sizes = [16, 32], strides = [1, 1]} : vector<16x128xbf16> to vector<16x32xbf16>
    %469 = vector.extract_strided_slice %464 {offsets = [0, 2], sizes = [16, 32], strides = [1, 1]} : vector<16x128xbf16> to vector<16x32xbf16>
    %470 = vector.extract_strided_slice %464 {offsets = [0, 4], sizes = [16, 32], strides = [1, 1]} : vector<16x128xbf16> to vector<16x32xbf16>
    %471 = tpu.concatenate %465, %466, %467, %468, %469, %470 in 0 : vector<16x32xbf16>, vector<16x32xbf16>, vector<16x32xbf16>, vector<16x32xbf16>, vector<16x32xbf16>, vector<16x32xbf16> -> vector<96x32xbf16>
    %cst_213 = arith.constant dense<0.000000e+00> : vector<8x32xf32>
    %472 = tpu.matmul %2, %411, %cst_213 {dimension_numbers = #tpu.dot_dimension_numbers<[1], [0], [0], [1], [0, 0, 1, 1], [], []>} : vector<8x96xbf16>, vector<96x32xbf16>, vector<8x32xf32> -> vector<8x32xf32>
    %cst_214 = arith.constant dense<0.000000e+00> : vector<8x32xf32>
    %473 = tpu.matmul %4, %441, %cst_214 {dimension_numbers = #tpu.dot_dimension_numbers<[1], [0], [0], [1], [0, 0, 1, 1], [], []>} : vector<8x96xbf16>, vector<96x32xbf16>, vector<8x32xf32> -> vector<8x32xf32>
    %474 = arith.addf %472, %473 : vector<8x32xf32>
    %cst_215 = arith.constant dense<0.000000e+00> : vector<8x32xf32>
    %475 = tpu.matmul %6, %471, %cst_215 {dimension_numbers = #tpu.dot_dimension_numbers<[1], [0], [0], [1], [0, 0, 1, 1], [], []>} : vector<8x96xbf16>, vector<96x32xbf16>, vector<8x32xf32> -> vector<8x32xf32>
    %476 = arith.addf %474, %475 : vector<8x32xf32>
    %477 = arith.addf %476, %0 : vector<8x32xf32>
    %c1_i32_216 = arith.constant 1 : i32
    %478 = tpu.dynamic_rotate %477 by %c1_i32_216 dim 1 : vector<8x32xf32>, i32 -> vector<8x32xf32>
    %479 = vector.shape_cast %9 : vector<1x32xi1> to vector<1x32xi1>
    %480 = vector.broadcast %479 : vector<1x32xi1> to vector<8x32xi1>
    %481 = arith.select %480, %477, %478 : vector<8x32xi1>, vector<8x32xf32>
    %482 = arith.addf %477, %481 : vector<8x32xf32>
    %c7_i32_217 = arith.constant 7 : i32
    %483 = tpu.dynamic_rotate %452 by %c7_i32_217 dim 0 : vector<8x32xf32>, i32 -> vector<8x32xf32>
    %c1_i32_218 = arith.constant 1 : i32
    %484 = tpu.dynamic_rotate %482 by %c1_i32_218 dim 0 : vector<8x32xf32>, i32 -> vector<8x32xf32>
    %485 = vector.shape_cast %28 : vector<8x1xi1> to vector<8x1xi1>
    %486 = vector.broadcast %485 : vector<8x1xi1> to vector<8x32xi1>
    %487 = arith.select %486, %483, %484 : vector<8x32xi1>, vector<8x32xf32>
    %488 = arith.addf %482, %487 : vector<8x32xf32>
    %489 = vector.shape_cast %488 : vector<8x32xf32> to vector<4x2x32xf32>
    %c0_219 = arith.constant 0 : index
    %c0_220 = arith.constant 0 : index
    %c26 = arith.constant 26 : index
    %c0_221 = arith.constant 0 : index
    %490 = vector.load %arg5[%c0_219, %c0_220, %c26, %c0_221] : memref<1x4x32x32xf32, #tpu.memory_space<vmem>>, vector<1x4x2x32xf32>
    %491 = vector.shape_cast %490 : vector<1x4x2x32xf32> to vector<4x2x32xf32>
    %492 = vector.shape_cast %489 : vector<4x2x32xf32> to vector<1x4x2x32xf32>
    tpu.vector_store %arg5[%c0_219, %c0_220, %c26, %c0_221], %492 {strides = array<i32>} : memref<1x4x32x32xf32, #tpu.memory_space<vmem>>, vector<1x4x2x32xf32>,
    %c0_222 = arith.constant 0 : index
    %c0_223 = arith.constant 0 : index
    %c0_224 = arith.constant 0 : index
    %c17 = arith.constant 17 : index
    %c0_225 = arith.constant 0 : index
    %493 = vector.load %arg2[%c0_222, %c0_223, %c0_224, %c17, %c0_225] : memref<1x1x16x19x128xbf16, #tpu.memory_space<vmem>>, vector<1x1x16x1x128xbf16>
    %494 = vector.shape_cast %493 : vector<1x1x16x1x128xbf16> to vector<16x128xbf16>
    %495 = vector.extract_strided_slice %494 {offsets = [0, 1], sizes = [16, 32], strides = [1, 1]} : vector<16x128xbf16> to vector<16x32xbf16>
    %496 = vector.extract_strided_slice %494 {offsets = [0, 3], sizes = [16, 32], strides = [1, 1]} : vector<16x128xbf16> to vector<16x32xbf16>
    %497 = vector.extract_strided_slice %494 {offsets = [0, 5], sizes = [16, 32], strides = [1, 1]} : vector<16x128xbf16> to vector<16x32xbf16>
    %498 = vector.extract_strided_slice %494 {offsets = [0, 0], sizes = [16, 32], strides = [1, 1]} : vector<16x128xbf16> to vector<16x32xbf16>
    %499 = vector.extract_strided_slice %494 {offsets = [0, 2], sizes = [16, 32], strides = [1, 1]} : vector<16x128xbf16> to vector<16x32xbf16>
    %500 = vector.extract_strided_slice %494 {offsets = [0, 4], sizes = [16, 32], strides = [1, 1]} : vector<16x128xbf16> to vector<16x32xbf16>
    %501 = tpu.concatenate %495, %496, %497, %498, %499, %500 in 0 : vector<16x32xbf16>, vector<16x32xbf16>, vector<16x32xbf16>, vector<16x32xbf16>, vector<16x32xbf16>, vector<16x32xbf16> -> vector<96x32xbf16>
    %cst_226 = arith.constant dense<0.000000e+00> : vector<8x32xf32>
    %502 = tpu.matmul %2, %441, %cst_226 {dimension_numbers = #tpu.dot_dimension_numbers<[1], [0], [0], [1], [0, 0, 1, 1], [], []>} : vector<8x96xbf16>, vector<96x32xbf16>, vector<8x32xf32> -> vector<8x32xf32>
    %cst_227 = arith.constant dense<0.000000e+00> : vector<8x32xf32>
    %503 = tpu.matmul %4, %471, %cst_227 {dimension_numbers = #tpu.dot_dimension_numbers<[1], [0], [0], [1], [0, 0, 1, 1], [], []>} : vector<8x96xbf16>, vector<96x32xbf16>, vector<8x32xf32> -> vector<8x32xf32>
    %504 = arith.addf %502, %503 : vector<8x32xf32>
    %cst_228 = arith.constant dense<0.000000e+00> : vector<8x32xf32>
    %505 = tpu.matmul %6, %501, %cst_228 {dimension_numbers = #tpu.dot_dimension_numbers<[1], [0], [0], [1], [0, 0, 1, 1], [], []>} : vector<8x96xbf16>, vector<96x32xbf16>, vector<8x32xf32> -> vector<8x32xf32>
    %506 = arith.addf %504, %505 : vector<8x32xf32>
    %507 = arith.addf %506, %0 : vector<8x32xf32>
    %c1_i32_229 = arith.constant 1 : i32
    %508 = tpu.dynamic_rotate %507 by %c1_i32_229 dim 1 : vector<8x32xf32>, i32 -> vector<8x32xf32>
    %509 = vector.shape_cast %9 : vector<1x32xi1> to vector<1x32xi1>
    %510 = vector.broadcast %509 : vector<1x32xi1> to vector<8x32xi1>
    %511 = arith.select %510, %507, %508 : vector<8x32xi1>, vector<8x32xf32>
    %512 = arith.addf %507, %511 : vector<8x32xf32>
    %c7_i32_230 = arith.constant 7 : i32
    %513 = tpu.dynamic_rotate %482 by %c7_i32_230 dim 0 : vector<8x32xf32>, i32 -> vector<8x32xf32>
    %c1_i32_231 = arith.constant 1 : i32
    %514 = tpu.dynamic_rotate %512 by %c1_i32_231 dim 0 : vector<8x32xf32>, i32 -> vector<8x32xf32>
    %515 = vector.shape_cast %28 : vector<8x1xi1> to vector<8x1xi1>
    %516 = vector.broadcast %515 : vector<8x1xi1> to vector<8x32xi1>
    %517 = arith.select %516, %513, %514 : vector<8x32xi1>, vector<8x32xf32>
    %518 = arith.addf %512, %517 : vector<8x32xf32>
    %519 = vector.shape_cast %518 : vector<8x32xf32> to vector<4x2x32xf32>
    %c0_232 = arith.constant 0 : index
    %c0_233 = arith.constant 0 : index
    %c28 = arith.constant 28 : index
    %c0_234 = arith.constant 0 : index
    %520 = vector.load %arg5[%c0_232, %c0_233, %c28, %c0_234] : memref<1x4x32x32xf32, #tpu.memory_space<vmem>>, vector<1x4x2x32xf32>
    %521 = vector.shape_cast %520 : vector<1x4x2x32xf32> to vector<4x2x32xf32>
    %522 = vector.shape_cast %519 : vector<4x2x32xf32> to vector<1x4x2x32xf32>
    tpu.vector_store %arg5[%c0_232, %c0_233, %c28, %c0_234], %522 {strides = array<i32>} : memref<1x4x32x32xf32, #tpu.memory_space<vmem>>, vector<1x4x2x32xf32>,
    %c0_235 = arith.constant 0 : index
    %c0_236 = arith.constant 0 : index
    %c0_237 = arith.constant 0 : index
    %c18_238 = arith.constant 18 : index
    %c0_239 = arith.constant 0 : index
    %523 = vector.load %arg2[%c0_235, %c0_236, %c0_237, %c18_238, %c0_239] : memref<1x1x16x19x128xbf16, #tpu.memory_space<vmem>>, vector<1x1x16x1x128xbf16>
    %524 = vector.shape_cast %523 : vector<1x1x16x1x128xbf16> to vector<16x128xbf16>
    %525 = vector.extract_strided_slice %524 {offsets = [0, 1], sizes = [16, 32], strides = [1, 1]} : vector<16x128xbf16> to vector<16x32xbf16>
    %526 = vector.extract_strided_slice %524 {offsets = [0, 3], sizes = [16, 32], strides = [1, 1]} : vector<16x128xbf16> to vector<16x32xbf16>
    %527 = vector.extract_strided_slice %524 {offsets = [0, 5], sizes = [16, 32], strides = [1, 1]} : vector<16x128xbf16> to vector<16x32xbf16>
    %528 = vector.extract_strided_slice %524 {offsets = [0, 0], sizes = [16, 32], strides = [1, 1]} : vector<16x128xbf16> to vector<16x32xbf16>
    %529 = vector.extract_strided_slice %524 {offsets = [0, 2], sizes = [16, 32], strides = [1, 1]} : vector<16x128xbf16> to vector<16x32xbf16>
    %530 = vector.extract_strided_slice %524 {offsets = [0, 4], sizes = [16, 32], strides = [1, 1]} : vector<16x128xbf16> to vector<16x32xbf16>
    %531 = tpu.concatenate %525, %526, %527, %528, %529, %530 in 0 : vector<16x32xbf16>, vector<16x32xbf16>, vector<16x32xbf16>, vector<16x32xbf16>, vector<16x32xbf16>, vector<16x32xbf16> -> vector<96x32xbf16>
    %cst_240 = arith.constant dense<0.000000e+00> : vector<8x32xf32>
    %532 = tpu.matmul %2, %471, %cst_240 {dimension_numbers = #tpu.dot_dimension_numbers<[1], [0], [0], [1], [0, 0, 1, 1], [], []>} : vector<8x96xbf16>, vector<96x32xbf16>, vector<8x32xf32> -> vector<8x32xf32>
    %cst_241 = arith.constant dense<0.000000e+00> : vector<8x32xf32>
    %533 = tpu.matmul %4, %501, %cst_241 {dimension_numbers = #tpu.dot_dimension_numbers<[1], [0], [0], [1], [0, 0, 1, 1], [], []>} : vector<8x96xbf16>, vector<96x32xbf16>, vector<8x32xf32> -> vector<8x32xf32>
    %534 = arith.addf %532, %533 : vector<8x32xf32>
    %cst_242 = arith.constant dense<0.000000e+00> : vector<8x32xf32>
    %535 = tpu.matmul %6, %531, %cst_242 {dimension_numbers = #tpu.dot_dimension_numbers<[1], [0], [0], [1], [0, 0, 1, 1], [], []>} : vector<8x96xbf16>, vector<96x32xbf16>, vector<8x32xf32> -> vector<8x32xf32>
    %536 = arith.addf %534, %535 : vector<8x32xf32>
    %537 = arith.addf %536, %0 : vector<8x32xf32>
    %c1_i32_243 = arith.constant 1 : i32
    %538 = tpu.dynamic_rotate %537 by %c1_i32_243 dim 1 : vector<8x32xf32>, i32 -> vector<8x32xf32>
    %539 = vector.shape_cast %9 : vector<1x32xi1> to vector<1x32xi1>
    %540 = vector.broadcast %539 : vector<1x32xi1> to vector<8x32xi1>
    %541 = arith.select %540, %537, %538 : vector<8x32xi1>, vector<8x32xf32>
    %542 = arith.addf %537, %541 : vector<8x32xf32>
    %c7_i32_244 = arith.constant 7 : i32
    %543 = tpu.dynamic_rotate %512 by %c7_i32_244 dim 0 : vector<8x32xf32>, i32 -> vector<8x32xf32>
    %c1_i32_245 = arith.constant 1 : i32
    %544 = tpu.dynamic_rotate %542 by %c1_i32_245 dim 0 : vector<8x32xf32>, i32 -> vector<8x32xf32>
    %545 = vector.shape_cast %28 : vector<8x1xi1> to vector<8x1xi1>
    %546 = vector.broadcast %545 : vector<8x1xi1> to vector<8x32xi1>
    %547 = arith.select %546, %543, %544 : vector<8x32xi1>, vector<8x32xf32>
    %548 = arith.addf %542, %547 : vector<8x32xf32>
    %549 = vector.shape_cast %548 : vector<8x32xf32> to vector<4x2x32xf32>
    %c0_246 = arith.constant 0 : index
    %c0_247 = arith.constant 0 : index
    %c30 = arith.constant 30 : index
    %c0_248 = arith.constant 0 : index
    %550 = vector.load %arg5[%c0_246, %c0_247, %c30, %c0_248] : memref<1x4x32x32xf32, #tpu.memory_space<vmem>>, vector<1x4x2x32xf32>
    %551 = vector.shape_cast %550 : vector<1x4x2x32xf32> to vector<4x2x32xf32>
    %552 = vector.shape_cast %549 : vector<4x2x32xf32> to vector<1x4x2x32xf32>
    tpu.vector_store %arg5[%c0_246, %c0_247, %c30, %c0_248], %552 {strides = array<i32>} : memref<1x4x32x32xf32, #tpu.memory_space<vmem>>, vector<1x4x2x32xf32>,
    return
  }
  func.func @transform_0(%arg0: i32, %arg1: i32) -> (i32, i32, i32, i32, i32) {
    %c0_i32 = arith.constant 0 : i32
    %c0_i32_0 = arith.constant 0 : i32
    %c0_i32_1 = arith.constant 0 : i32
    %c0_i32_2 = arith.constant 0 : i32
    return %arg0, %arg1, %c0_i32, %c0_i32_0, %c0_i32_1 : i32, i32, i32, i32, i32
  }
  func.func @transform_1(%arg0: i32, %arg1: i32) -> (i32, i32, i32) {
    %c0_i32 = arith.constant 0 : i32
    %c0_i32_0 = arith.constant 0 : i32
    %c0_i32_1 = arith.constant 0 : i32
    %c0_i32_2 = arith.constant 0 : i32
    return %c0_i32, %c0_i32_0, %c0_i32_1 : i32, i32, i32
  }
  func.func @transform_2(%arg0: i32, %arg1: i32) -> (i32, i32) {
    %c0_i32 = arith.constant 0 : i32
    %c0_i32_0 = arith.constant 0 : i32
    %c0_i32_1 = arith.constant 0 : i32
    return %c0_i32, %c0_i32_0 : i32, i32
  }
  func.func @transform_3(%arg0: i32, %arg1: i32) -> (i32, i32, i32, i32) {
    %c0_i32 = arith.constant 0 : i32
    %c0_i32_0 = arith.constant 0 : i32
    %c0_i32_1 = arith.constant 0 : i32
    return %arg0, %c0_i32, %arg1, %c0_i32_0 : i32, i32, i32, i32
  }
}

</mosaic_0001>

<bundles_post_ra>
// kernel: tpu_custom_call.1
= control target key start
LH: loop header
LB: loop body
LE: loop exit
PB: predicated region body
PF: predicated region fallthrough
CT: control target
= control target key end

     0   :  { %8 = vsyncpa [#allocation3], 0  ;;  %s10210_s0 = inlined_call_operand.vmem [shape: bf16[2,1,16,19,128], index: 0, kind: input, shape index: {}]   ;;  %s10211_s1 = inlined_call_operand.vmem [shape: bf16[3,8,96], index: 1, kind: input, shape index: {}]   ;;  %s10212_s2 = inlined_call_operand.vmem [shape: f32[8,32], index: 2, kind: input, shape index: {}]   ;;  %s10213_s3 = inlined_call_operand.hbm [shape: f32[2,4,32,32], index: 3, kind: output, shape index: {}]  }
   0x1   :  { %10 = vsyncpa [#allocation3 + $0x1], 0  ;;  %s7486_s12 = smov 0   ;;  %s7488_s13 = smov 0  }
   0x2   :  { %s7490_s14 = smov 0   ;;  %s7492_s15 = smov 0  }
   0x3   :  { %s7494_s16 = smov 0   ;;  %s7496_s17 = smov 0  }
   0x4 LB: > { %s5515_s18 = sadd.s32 4294967295, %s7451_s17   ;;  %s5516_s19 = sadd.s32 4294967294, %s7451_s17   ;;  %s7451_s17 = sphi %s7496_s17, %s16_s17   ;;  %s7447_s16 = sphi %s7494_s16, %s10250_s16   ;;  %s7443_s15 = sphi %s7492_s15, %s10249_s15   ;;  %s7439_s14 = sphi %s7490_s14, %s10248_s14   ;;  %s7435_s13 = sphi %s7488_s13, %s10247_s13   ;;  %s7431_s12 = sphi %s7486_s12, %s10246_s12  }
   0x5   : > { %s28_s20 = sadd.s32 1, %s7447_s16  ;;  %s107_s21 = sadd.s32 1, %s7439_s14 }
   0x6   : > { %p30_p0 = scmp.ge.s32.totalorder %s28_s20, 2  ;;  %p117_p1 = scmp.ne.s32.totalorder %s7439_s14, %s7435_s13 }
   0x7   : > { %p118_p2 = scmp.eq.s32.totalorder %s5515_s18, 1  ;;  %p123_p3 = scmp.ne.s32.totalorder %s7435_s13, %s7431_s12 }
   0x8   : > { %s10252_s20 = smov (%p30_p0, %s28_s20), 0  ;;  %p124_p5 = scmp.eq.s32.totalorder %s5516_s19, 1 }
   0x9   : > { %p7526_p4 = por %p118_p2, %p117_p1  ;;  %s102_s23 = ssub.s32 %s7447_s16, %s10252_s20 }
   0xa   : > { %p5519_p6 = scmp.ge.s32.totalorder %s7451_s17, 1  ;;  %p105_p7 = scmp.eq.s32.totalorder %s102_s23, 0 }
   0xb   : > { %p7533_p8 = por %p124_p5, %p123_p3  ;;  %p160_p9 = scmp.lt.s32.totalorder %s7451_s17, 3 }
   0xc   : > { %s7539_s25 = scalar_select %p105_p7, %s7439_s14, %s107_s21  }
   0xd   : > { %p161_p10 = pnand %p5519_p6, %p160_p9 }
   0xe   : > { %p188_p11 = scmp.lt.s32.totalorder (!%p161_p10), %s7443_s15, 1  ;;  %s7453_s4 = smov (!%p161_p10), 125  }
   0xf   : > { %164 = sbr.rel (%p161_p10) target bundleno = 1918 (0x77e), region = 32  ;;  %s7454_s5 = smov (!%p161_p10), 1  }
  0x10   : > { %s7455_s6 = smov (!%p161_p10), 127   ;;  %s7456_s7 = smov (!%p161_p10), 124  }
  0x11   : > { %s7457_s8 = smov (!%p161_p10), 126   ;;  %s7461_s29 = smov (!%p161_p10), 97  }
  0x12   : > { %s185_s9 = sand.u32 (!%p161_p10), 1, %s7435_s13   ;;  %s5852_s18 = sshll.u32 (!%p161_p10), %s7443_s15, 11 }
  0x13   : > { %s5520_s10 = sshll.u32 (!%p161_p10), %s185_s9, 7 }
  0x14   : > { %s189_s26 = scalar_select %p188_p11, %s7443_s15, 1  ;;  %vm305_vm0 = vcmask 1041409   ;;  %vm308_vm1 = vcmask 1042434   ;;  %vm311_vm2 = vcmask 1043459   ;;  %vm314_vm3 = vcmask 1044484  }
  0x15   : > { %vm317_vm4 = vcmask 1045509   ;;  %vm320_vm5 = vcmask 1046534   ;;  %vm323_vm6 = vcmask 1047559   ;;  %vm7459_vm7 = vmmov 0   ;;  %s9914_s11 = scalar_lea.vmem [#allocation2], %s5520_s10  ;;  %s10165_s15 = scalar_lea.sflag [#allocation3], %s185_s9 }
  0x16   : > { %s7026_s27 = smul.u32 192, %s189_s26  ;;  %vm524_vm8 = vcmask 785408   ;;  %vm688_vm9 = vcmask 1047808   ;;  %vm927_vm12 = vcmask 254976   ;;  %s5433_s19 = sshll.u32 %s9914_s11, 4  ;;  %s10155_s19 = int_to_ptr.vmem [resolvable:$true] %s5433_s19 }
  0x17   : > { %s7375_s26 = scalar_lea.vmem %s10155_s19, 2048 }
  0x18   : > { %s7546_s30 = scalar_lea.vmem %s10210_s0, %s7026_s27  ;;  %p7376_p12 = scmp.ne.s32.totalorder %s10155_s19, %s7375_s26 }
  0x19   : > { %v7549_v0 = vld [vmem:[%s7546_s30] ss:$0 sps:$4 sm:$0x11]   ;;  %v7095_v1 = vld [vmem:[%s7546_s30 + $0xc] ss:$0 sps:$4 sm:$0x11]  }
  0x1a   : > { %v7096_v2 = vld [vmem:[%s7546_s30 + $0x18] ss:$0 sps:$4 sm:$0x11]   ;;  %v7554_v3 = vld [vmem:[%s7546_s30 + $0x24] ss:$0 sps:$4 sm:$0x11]   ;;  %v288_v9 = vunpack.c.l.b16 %v7549_v0  ;;  %v289_v17 = vunpack.c.l.b16 %v7095_v1  ;;  %p7377_p13 = pnand %p7376_p12, %p7526_p4 }
  0x1b   : > { %v7557_v4 = vld [vmem:[%s7546_s30 + $0x30] ss:$0 sps:$4 sm:$0x11]   ;;  %v7560_v5 = vld [vmem:[%s7546_s30 + $0x3c] ss:$0 sps:$4 sm:$0x11]   ;;  %v290_v10 = vunpack.c.l.b16 %v7096_v2  ;;  %v291_v13 = vunpack.c.l.b16 %v7554_v3 }
  0x1c   : > { %v7563_v6 = vld [vmem:[%s7546_s30 + $0x48] ss:$0 sps:$4 sm:$0x11]   ;;  %v7566_v7 = vld [vmem:[%s7546_s30 + $0x54] ss:$0 sps:$4 sm:$0x11]   ;;  %v292_v14 = vunpack.c.l.b16 %v7557_v4  ;;  %v293_v18 = vunpack.c.l.b16 %v7560_v5  ;;  %p7378_p0 = pneg %p7377_p13 }
  0x1d   : > { %v7569_v8 = vld [vmem:[%s7546_s30 + $0x60] ss:$0 sps:$4 sm:$0x11]   ;;  %v7573_v11 = vld [vmem:[%s7546_s30 + $0x6c] ss:$0 sps:$4 sm:$0x11]   ;;  %v294_v19 = vunpack.c.l.b16 %v7563_v6  ;;  %v295_v22 = vunpack.c.l.b16 %v7566_v7 }
  0x1e   : > { %v7576_v12 = vld [vmem:[%s7546_s30 + $0x78] ss:$0 sps:$4 sm:$0x11]   ;;  %v7581_v15 = vld [vmem:[%s7546_s30 + $0x84] ss:$0 sps:$4 sm:$0x11]   ;;  %v296_v23 = vunpack.c.l.b16 %v7569_v8  ;;  %v297_v24 = vunpack.c.l.b16 %v7573_v11 }
  0x1f   : > { %v7584_v16 = vld [vmem:[%s7546_s30 + $0x90] ss:$0 sps:$4 sm:$0x11]   ;;  %v7589_v20 = vld [vmem:[%s7546_s30 + $0x9c] ss:$0 sps:$4 sm:$0x11]   ;;  %v298_v25 = vunpack.c.l.b16 %v7576_v12  ;;  %v299_v27 = vunpack.c.l.b16 %v7581_v15 }
  0x20   : > { %v7592_v21 = vld [vmem:[%s7546_s30 + $0xa8] ss:$0 sps:$4 sm:$0x11]   ;;  %v7599_v26 = vld [vmem:[%s7546_s30 + $0xb4] ss:$0 sps:$4 sm:$0x11]   ;;  %v300_v28 = vunpack.c.l.b16 %v7584_v16  ;;  %v10218_v31 = vunpack.c.l.b16 %v7589_v20 }
  0x21   : > { %v350_v29 = vrot.slane %v288_v9, 1  ;;  %v352_v30 = vrot.slane %v290_v10, 7  ;;  %v10217_v32 = vunpack.c.l.b16 %v7592_v21  ;;  %v354_v33 = vrot.slane %v291_v13, 6  ;;  %v7645_v60 = vld [vmem:[%s7546_s30] ss:$0 sps:$4 sm:$0x22]  }
  0x22   : > { %v356_v34 = vrot.slane %v292_v14, 5  ;;  %v10216_v35 = vunpack.c.l.b16 %v7599_v26  ;;  %v358_v37 = vrot.slane %v293_v18, 4  ;;  %v360_v38 = vrot.slane %v294_v19, 3  ;;  %v7648_v61 = vld [vmem:[%s7546_s30 + $0xc] ss:$0 sps:$4 sm:$0x22]  }
  0x23   : > { %v351_v36 = vsel %vm305_vm0, %v289_v17, %v350_v29  ;;  %v362_v40 = vrot.slane %v295_v22, 2  ;;  %v364_v41 = vrot.slane %v296_v23, 1  ;;  %v366_v42 = vrot.slane %v298_v25, 7  ;;  %v7652_v63 = vld [vmem:[%s7546_s30 + $0x18] ss:$0 sps:$4 sm:$0x22]  }
  0x24   : > { %v353_v39 = vsel %vm308_vm1, %v352_v30, %v351_v36  ;;  %v368_v44 = vrot.slane %v299_v27, 6  ;;  %v370_v45 = vrot.slane %v300_v28, 5  ;;  %v372_v46 = vrot.slane %v10218_v31, 4  ;;  %v7655_v0 = vld [vmem:[%s7546_s30 + $0x24] ss:$0 sps:$4 sm:$0x22]  }
  0x25   : > { %v355_v43 = vsel %vm311_vm2, %v354_v33, %v353_v39  ;;  %v365_v48 = vsel %vm305_vm0, %v297_v24, %v364_v41  ;;  %v374_v49 = vrot.slane %v10217_v32, 3  ;;  %v376_v50 = vrot.slane %v10216_v35, 2  ;;  %v7659_v2 = vld [vmem:[%s7546_s30 + $0x30] ss:$0 sps:$4 sm:$0x22]  }
  0x26   : > { %v357_v47 = vsel %vm314_vm3, %v356_v34, %v355_v43  ;;  %v367_v52 = vsel %vm308_vm1, %v366_v42, %v365_v48  ;;  %v304_v56 = vrot.slane %v289_v17, 7  ;;  %v307_v57 = vrot.slane %v290_v10, 6  ;;  %v7662_v10 = vld [vmem:[%s7546_s30 + $0x3c] ss:$0 sps:$4 sm:$0x22]  }
  0x27   : > { %v359_v51 = vsel %vm317_vm4, %v358_v37, %v357_v47  ;;  %v369_v54 = vsel %vm311_vm2, %v368_v44, %v367_v52  ;;  %v7666_v30 = vld [vmem:[%s7546_s30 + $0x48] ss:$0 sps:$4 sm:$0x22]   ;;  %v7669_v33 = vld [vmem:[%s7546_s30 + $0x54] ss:$0 sps:$4 sm:$0x22]   ;;  %v10214_v37 = vunpack.c.l.b16 %v7645_v60  ;;  %v10220_v41 = vunpack.c.l.b16 %v7659_v2 }
  0x28   : > { %v361_v53 = vsel %vm320_vm5, %v360_v38, %v359_v51  ;;  %v371_v55 = vsel %vm314_vm3, %v370_v45, %v369_v54  ;;  %v306_v17 = vsel %vm305_vm0, %v304_v56, %v288_v9  ;;  %v7672_v34 = vld [vmem:[%s7546_s30 + $0x60] ss:$0 sps:$4 sm:$0x22]   ;;  %v7675_v36 = vld [vmem:[%s7546_s30 + $0x6c] ss:$0 sps:$4 sm:$0x22]   ;;  %v10215_v38 = vunpack.c.l.b16 %v7648_v61 }
  0x29   : > { %v363_v58 = vsel %vm323_vm6, %v362_v40, %v361_v53  ;;  %v373_v59 = vsel %vm317_vm4, %v372_v46, %v371_v55  ;;  %v7682_v9 = vld [vmem:[%s7546_s30 + $0x78] ss:$0 sps:$4 sm:$0x22]   ;;  %v7685_v39 = vld [vmem:[%s7546_s30 + $0x84] ss:$0 sps:$4 sm:$0x22]   ;;  %v10219_v40 = vunpack.c.l.b16 %v7655_v0  ;;  %v309_v42 = vsel %vm308_vm1, %v307_v57, %v306_v17 }
  0x2a   : > { %v375_v62 = vsel %vm320_vm5, %v374_v49, %v373_v59  ;;  %v7691_v43 = vld [vmem:[%s7546_s30 + $0x90] ss:$0 sps:$4 sm:$0x22]   ;;  %v7694_v44 = vld [vmem:[%s7546_s30 + $0x9c] ss:$0 sps:$4 sm:$0x22]   ;;  %v455_v45 = vunpack.c.l.b16 %v7652_v63  ;;  %v458_v46 = vunpack.c.l.b16 %v7662_v10  ;;  %v10221_v47 = vunpack.c.l.b16 %v7666_v30 }
  0x2b   : > { %v377_v1 = vsel %vm323_vm6, %v376_v50, %v375_v62  ;;  %v10222_v48 = vunpack.c.l.b16 %v7669_v33  ;;  %v7701_v49 = vld [vmem:[%s7546_s30 + $0xa8] ss:$0 sps:$4 sm:$0x22]   ;;  %v7704_v50 = vld [vmem:[%s7546_s30 + $0xb4] ss:$0 sps:$4 sm:$0x22]   ;;  %v10223_v51 = vunpack.c.l.b16 %v7672_v34  ;;  %v10224_v52 = vunpack.c.l.b16 %v7675_v36 }
  0x2c   : > { %v378_v29 = vpack.c.b16 %v377_v1, %v363_v58  ;;  %v463_v53 = vunpack.c.l.b16 %v7682_v9  ;;  %v10225_v54 = vunpack.c.l.b16 %v7685_v39  ;;  %v465_v55 = vunpack.c.l.b16 %v7691_v43 }
  0x2d   : > { %v10226_v56 = vunpack.c.l.b16 %v7694_v44  ;;  %v469_v57 = vrot.slane %v10214_v37, 2  ;;  %v470_v58 = vrot.slane %v10215_v38, 1  ;;  %v10227_v59 = vunpack.c.l.b16 %v7701_v49 }
  0x2e   : > { %387 = vrot.lane.b32.xlu0 %v378_v29, %s7453_s4  ;;  %383 = vrot.lane.b32.xlu1 %v378_v29, %s7454_s5  ;;  %v468_v62 = vunpack.c.l.b16 %v7704_v50  ;;  %v473_v1 = vrot.slane %v10219_v40, 7  ;;  %v475_v17 = vrot.slane %v10220_v41, 6  ;;  %v477_v38 = vrot.slane %v458_v46, 5 }
  0x2f   : > { %v471_v37 = vsel %vm305_vm0, %v470_v58, %v469_v57  ;;  %v479_v35 = vrot.slane %v10221_v47, 4  ;;  %v481_v32 = vrot.slane %v10222_v48, 3  ;;  %v483_v40 = vrot.slane %v10223_v51, 2 }
  0x30   : > { %v472_v31 = vsel %vm308_vm1, %v455_v45, %v471_v37  ;;  %v484_v41 = vrot.slane %v10224_v52, 1  ;;  %v487_v57 = vrot.slane %v10225_v54, 7  ;;  %v489_v47 = vrot.slane %v465_v55, 6 }
  0x31   : > { %v474_v58 = vsel %vm311_vm2, %v473_v1, %v472_v31  ;;  %v491_v48 = vrot.slane %v10226_v56, 5  ;;  %v493_v37 = vrot.slane %v10227_v59, 4  ;;  %v495_v54 = vrot.slane %v468_v62, 3 }
  0x32   : > { %385 = vrot.lane.b32.xlu0 %v378_v29, %s7455_s6  ;;  %381 = vrot.lane.b32.xlu1 %v378_v29, %s7456_s7  ;;  %v476_v51 = vsel %vm314_vm3, %v475_v17, %v474_v58  ;;  %v485_v52 = vsel %vm305_vm0, %v484_v41, %v483_v40  ;;  %v310_v31 = vrot.slane %v291_v13, 5  ;;  %v313_v59 = vrot.slane %v292_v14, 4 }
  0x33   : > { %v478_v1 = vsel %vm317_vm4, %v477_v38, %v476_v51  ;;  %v486_v56 = vsel %vm308_vm1, %v463_v53, %v485_v52  ;;  %v319_v3 = vrot.slane %v294_v19, 2  ;;  %v322_v4 = vrot.slane %v295_v22, 1 }
  0x34   : > { %v480_v40 = vsel %vm320_vm5, %v479_v35, %v478_v1  ;;  %v488_v41 = vsel %vm311_vm2, %v487_v57, %v486_v56  ;;  %v312_v17 = vsel %vm311_vm2, %v310_v31, %v309_v42  ;;  %v327_v6 = vrot.slane %v298_v25, 6 }
  0x35   : > { %v482_v13 = vsel %vm323_vm6, %v481_v32, %v480_v40  ;;  %v490_v38 = vsel %vm314_vm3, %v489_v47, %v488_v41  ;;  %v315_v51 = vsel %vm314_vm3, %v313_v59, %v312_v17  ;;  %v329_v32 = vrot.slane %v299_v27, 5 }
  0x36   : > { %379 = vrot.lane.b32.xlu0 %v378_v29, %s7457_s8  ;;  %v316_v29 = vrot.slane %v293_v18, 3  ;;  %v492_v5 = vsel %vm317_vm4, %v491_v48, %v490_v38  ;;  %v325_v18 = vrot.slane %v297_v24, 7  ;;  %v331_v35 = vrot.slane %v300_v28, 4 }
  0x37   : > { %v494_v19 = vsel %vm320_vm5, %v493_v37, %v492_v5  ;;  %v10230_v24 = vunpack.c.l.b16 %v7589_v20  ;;  %v10231_v15 = vunpack.c.l.b16 %v7592_v21  ;;  %v10232_v16 = vunpack.c.l.b16 %v7599_v26 }
  0x38   : > { %v318_v14 = vsel %vm317_vm4, %v316_v29, %v315_v51  ;;  %v496_v7 = vsel %vm323_vm6, %v495_v54, %v494_v19  ;;  %v326_v11 = vsel %vm305_vm0, %v325_v18, %v296_v23  ;;  %v10233_v48 = vunpack.c.l.b16 %v7645_v60  ;;  %v7127_v19 = vld [vmem:[%s7546_s30 + $0xc] ss:$0 sps:$4 sm:$0x44]  }
  0x39   : > { %v321_v22 = vsel %vm320_vm5, %v319_v3, %v318_v14  ;;  %v333_v12 = vrot.slane %v10230_v24, 3  ;;  %v497_v25 = vpack.c.b16 %v496_v7, %v482_v13  ;;  %v328_v42 = vsel %vm308_vm1, %v327_v6, %v326_v11  ;;  %v7126_v6 = vld [vmem:[%s7546_s30] ss:$0 sps:$4 sm:$0x44]  }
  0x3a   : > { %v335_v27 = vrot.slane %v10231_v15, 2  ;;  %v337_v28 = vrot.slane %v10232_v16, 1  ;;  %v330_v47 = vsel %vm311_vm2, %v329_v32, %v328_v42  ;;  %v703_v52 = vrot.slane %v10233_v48, 3  ;;  %v7134_v7 = vld [vmem:[%s7546_s30 + $0x60] ss:$0 sps:$4 sm:$0x44]  }
  0x3b   : > { %v10234_v8 = vunpack.c.l.b16 %v7648_v61  ;;  %v706_v20 = vrot.slane %v455_v45, 1  ;;  %506 = vrot.lane.b32.xlu0 %v497_v25, %s7453_s4  ;;  %v324_v54 = vsel %vm323_vm6, %v322_v4, %v321_v22  ;;  %v332_v21 = vsel %vm314_vm3, %v331_v35, %v330_v47  ;;  %v7135_v22 = vld [vmem:[%s7546_s30 + $0x6c] ss:$0 sps:$4 sm:$0x44]  }
  0x3c   : > { %v10235_v26 = vunpack.c.l.b16 %v7659_v2  ;;  %v711_v59 = vrot.slane %v458_v46, 6  ;;  %v334_v60 = vsel %vm317_vm4, %v333_v12, %v332_v21  ;;  %v10236_v57 = vunpack.c.l.b16 %v7666_v30  ;;  %v7128_v11 = vld [vmem:[%s7546_s30 + $0x18] ss:$0 sps:$4 sm:$0x44]  }
  0x3d   : > { %v704_v23 = vrot.slane %v10234_v8, 2  ;;  %v10237_v45 = vunpack.c.l.b16 %v7672_v34  ;;  %v336_v37 = vsel %vm320_vm5, %v335_v27, %v334_v60  ;;  %v10238_v2 = vunpack.c.l.b16 %v7675_v36  ;;  %v7136_v24 = vld [vmem:[%s7546_s30 + $0x78] ss:$0 sps:$4 sm:$0x44]  }
  0x3e   : > { %v709_v56 = vrot.slane %v10235_v26, 7  ;;  %v713_v63 = vrot.slane %v10236_v57, 5  ;;  %v720_v10 = vrot.slane %v463_v53, 1  ;;  %v338_v46 = vsel %vm323_vm6, %v337_v28, %v336_v37  ;;  %v7129_v27 = vld [vmem:[%s7546_s30 + $0x24] ss:$0 sps:$4 sm:$0x44]  }
  0x3f   : > { %v705_v61 = vsel %vm305_vm0, %v704_v23, %v703_v52  ;;  %v717_v58 = vrot.slane %v10237_v45, 3  ;;  %v718_v1 = vrot.slane %v10238_v2, 2  ;;  %v10239_v29 = vunpack.c.l.b16 %v7655_v0  ;;  %504 = vrot.lane.b32.xlu0 %v497_v25, %s7455_s6  ;;  %v7137_v28 = vld [vmem:[%s7546_s30 + $0x84] ss:$0 sps:$4 sm:$0x44]  }
  0x40   : > { %v707_v31 = vsel %vm308_vm1, %v706_v20, %v705_v61  ;;  %v10240_v40 = vunpack.c.l.b16 %v7669_v33  ;;  %v723_v41 = vrot.slane %v465_v55, 7  ;;  %v339_v17 = vpack.c.b16 %v338_v46, %v324_v54  ;;  %v7131_v60 = vld [vmem:[%s7546_s30 + $0x3c] ss:$0 sps:$4 sm:$0x44]  }
  0x41   : > { %v708_v30 = vsel %vm311_vm2, %v10239_v29, %v707_v31  ;;  %v719_v9 = vsel %vm305_vm0, %v718_v1, %v717_v58  ;;  %v10241_v53 = vunpack.c.l.b16 %v7694_v44  ;;  %v10242_v33 = vunpack.c.l.b16 %v7701_v49  ;;  %v7139_v61 = vld [vmem:[%s7546_s30 + $0x9c] ss:$0 sps:$4 sm:$0x44]   ;;  %v7130_v45 = vld [vmem:[%s7546_s30 + $0x30] ss:$0 sps:$4 sm:$0x44]  }
  0x42   : > { %v715_v34 = vrot.slane %v10240_v40, 4  ;;  %v710_v36 = vsel %vm314_vm3, %v709_v56, %v708_v30  ;;  %v721_v13 = vsel %vm308_vm1, %v720_v10, %v719_v9  ;;  %348 = vrot.lane.b32.xlu1 %v339_v17, %s7453_s4  ;;  %v10243_v55 = vunpack.c.l.b16 %v7685_v39  ;;  %v7138_v58 = vld [vmem:[%s7546_s30 + $0x90] ss:$0 sps:$4 sm:$0x44]  }
  0x43   : > { %v725_v3 = vrot.slane %v10241_v53, 6  ;;  %v712_v0 = vsel %vm317_vm4, %v711_v59, %v710_v36  ;;  %v727_v38 = vrot.slane %v10242_v33, 5  ;;  %v729_v4 = vrot.slane %v468_v62, 4  ;;  %502 = vrot.lane.b32.xlu0 %v497_v25, %s7454_s5  ;;  %v7132_v1 = vld [vmem:[%s7546_s30 + $0x48] ss:$0 sps:$4 sm:$0x44]  }
  0x44   : > { %v714_v43 = vsel %vm320_vm5, %v713_v63, %v712_v0  ;;  %v722_v51 = vsel %vm311_vm2, %v10243_v55, %v721_v13  ;;  %v7458_v50 = vmov 0.0   ;;  %v996_v12 = vunpack.c.l.b16 %v7126_v6  ;;  %v7140_v10 = vld [vmem:[%s7546_s30 + $0xa8] ss:$0 sps:$4 sm:$0x44]  }
  0x45   : > { %v716_v44 = vsel %vm323_vm6, %v715_v34, %v714_v43  ;;  %v724_v5 = vsel %vm314_vm3, %v723_v41, %v722_v51  ;;  %6210 = vmatprep.subr.bf16.mxu0 %v7458_v50  ;;  %6226 = vmatprep.subr.bf16.mxu1 %v7458_v50  ;;  %v1004_v42 = vunpack.c.l.b16 %v7134_v7  ;;  %v1005_v15 = vunpack.c.l.b16 %v7135_v22  ;;  %v7141_v36 = vld [vmem:[%s7546_s30 + $0xb4] ss:$0 sps:$4 sm:$0x44]  }
  0x46   : > { %v726_v49 = vsel %vm317_vm4, %v725_v3, %v724_v5  ;;  %346 = vrot.lane.b32.xlu1 %v339_v17, %s7455_s6  ;;  %v998_v47 = vunpack.c.l.b16 %v7128_v11  ;;  %v1006_v48 = vunpack.c.l.b16 %v7136_v24  ;;  %6222 = vmatprep.mubr.msk.bf16.mxu0 %vm7459_vm7, %v7458_v50  ;;  %v1012_v8 = vrot.slane %v996_v12, 4 }
  0x47   : > { %v728_v14 = vsel %vm320_vm5, %v727_v38, %v726_v49  ;;  %500 = vrot.lane.b32.xlu0 %v497_v25, %s7456_s7  ;;  %6238 = vmatprep.mubr.msk.bf16.mxu1 %vm7459_vm7, %v7458_v50  ;;  %v1026_v20 = vrot.slane %v1004_v42, 4  ;;  %v1027_v54 = vrot.slane %v1005_v15, 3  ;;  %v999_v21 = vunpack.c.l.b16 %v7129_v27 }
  0x48   : > { %v730_v39 = vsel %vm323_vm6, %v729_v4, %v728_v14  ;;  %v1007_v26 = vunpack.c.l.b16 %v7137_v28  ;;  %v1015_v56 = vrot.slane %v998_v47, 2  ;;  %v1029_v59 = vrot.slane %v1006_v48, 2  ;;  %v7143_v28 = vld [vmem:[%s7546_s30 + $0xc] ss:$0 sps:$4 sm:$0x44]  }
  0x49   : > { %v731_v18 = vpack.c.b16 %v730_v39, %v716_v44  ;;  %v1028_v63 = vsel %vm305_vm0, %v1027_v54, %v1026_v20  ;;  %v1017_v31 = vrot.slane %v999_v21, 1  ;;  %v1001_v30 = vunpack.c.l.b16 %v7131_v60  ;;  %v7150_v47 = vld [vmem:[%s7546_s30 + $0x60] ss:$0 sps:$4 sm:$0x44]  }
  0x4a   : > { %344 = vrot.lane.b32.xlu1 %v339_v17, %s7454_s5  ;;  %v1031_v2 = vrot.slane %v1007_v26, 1  ;;  %v1030_v29 = vsel %vm308_vm1, %v1029_v59, %v1028_v63  ;;  %v1009_v40 = vunpack.c.l.b16 %v7139_v61  ;;  %v1000_v34 = vunpack.c.l.b16 %v7130_v45  ;;  %v7151_v48 = vld [vmem:[%s7546_s30 + $0x6c] ss:$0 sps:$4 sm:$0x44]  }
  0x4b   : > { %498 = vrot.lane.b32.xlu0 %v497_v25, %s7457_s8  ;;  %v997_v25 = vunpack.c.l.b16 %v7127_v19  ;;  %v1008_v41 = vunpack.c.l.b16 %v7138_v58  ;;  %v1002_v0 = vunpack.c.l.b16 %v7132_v1  ;;  %v1010_v13 = vunpack.c.l.b16 %v7140_v10  ;;  %v7145_v26 = vld [vmem:[%s7546_s30 + $0x24] ss:$0 sps:$4 sm:$0x44]   ;;  %v7146_v58 = vld [vmem:[%s7546_s30 + $0x30] ss:$0 sps:$4 sm:$0x44]  }
  0x4c   : > { %v1032_v53 = vsel %vm311_vm2, %v1031_v2, %v1030_v29  ;;  %v1020_v38 = vrot.slane %v1001_v30, 7  ;;  %v1034_v43 = vrot.slane %v1009_v40, 7  ;;  %v1011_v44 = vunpack.c.l.b16 %v7141_v36  ;;  %v7156_v36 = vld [vmem:[%s7546_s30 + $0xa8] ss:$0 sps:$4 sm:$0x44]  }
  0x4d   : > { %v1013_v23 = vrot.slane %v997_v25, 3  ;;  %v1033_v51 = vsel %vm314_vm3, %v1008_v41, %v1032_v53  ;;  %v1022_v49 = vrot.slane %v1002_v0, 6  ;;  %v1036_v14 = vrot.slane %v1010_v13, 6  ;;  %v7155_v0 = vld [vmem:[%s7546_s30 + $0x9c] ss:$0 sps:$4 sm:$0x44]  }
  0x4e   : > { %342 = vrot.lane.b32.xlu1 %v339_v17, %s7456_s7  ;;  %v1038_v19 = vrot.slane %v1011_v44, 5  ;;  %v1296_v20 = vunpack.c.l.b16 %v7143_v28  ;;  %v1303_v54 = vunpack.c.l.b16 %v7150_v47  ;;  %v1304_v21 = vunpack.c.l.b16 %v7151_v48 }
  0x4f   : > { %v1014_v57 = vsel %vm305_vm0, %v1013_v23, %v1012_v8  ;;  %v7152_v8 = vld [vmem:[%s7546_s30 + $0x78] ss:$0 sps:$4 sm:$0x44]   ;;  %v1299_v30 = vunpack.c.l.b16 %v7146_v58 }
  0x50   : > { %v1016_v46 = vsel %vm308_vm1, %v1015_v56, %v1014_v57  ;;  %v7153_v56 = vld [vmem:[%s7546_s30 + $0x84] ss:$0 sps:$4 sm:$0x44]   ;;  %v1305_v60 = vunpack.c.l.b16 %v7152_v8  ;;  %v1312_v57 = vrot.slane %v1296_v20, 4  ;;  %v1325_v63 = vrot.slane %v1303_v54, 5 }
  0x51   : > { %v1018_v9 = vsel %vm311_vm2, %v1017_v31, %v1016_v46  ;;  %v1326_v45 = vrot.slane %v1304_v21, 4  ;;  %v1298_v31 = vunpack.c.l.b16 %v7145_v26  ;;  %v1306_v2 = vunpack.c.l.b16 %v7153_v56  ;;  %v7158_v26 = vld [vmem:[%s7546_s30] ss:$0 sps:$4 sm:$0x88]  }
  0x52   : > { %340 = vrot.lane.b32.xlu1 %v339_v17, %s7457_s8  ;;  %v7133_v17 = vld [vmem:[%s7546_s30 + $0x54] ss:$0 sps:$4 sm:$0x44]   ;;  %v1019_v55 = vsel %vm314_vm3, %v1000_v34, %v1018_v9  ;;  %v1328_v10 = vrot.slane %v1305_v60, 3  ;;  %v1318_v13 = vrot.slane %v1299_v30, 1  ;;  %v1594_v58 = vunpack.c.l.b16 %v7158_v26 }
  0x53   : > { %v1003_v4 = vunpack.c.l.b16 %v7133_v17  ;;  %v1327_v29 = vsel %vm305_vm0, %v1326_v45, %v1325_v63  ;;  %v1316_v34 = vrot.slane %v1298_v31, 2  ;;  %v1330_v41 = vrot.slane %v1306_v2, 2  ;;  %v7148_v17 = vld [vmem:[%s7546_s30 + $0x48] ss:$0 sps:$4 sm:$0x44]  }
  0x54   : > { %v1329_v53 = vsel %vm308_vm1, %v1328_v10, %v1327_v29  ;;  %v1301_v44 = vunpack.c.l.b16 %v7148_v17  ;;  %v7159_v56 = vld [vmem:[%s7546_s30 + $0xc] ss:$0 sps:$4 sm:$0x88]   ;;  %v7168_v63 = vld [vmem:[%s7546_s30 + $0x78] ss:$0 sps:$4 sm:$0x88]  }
  0x55   : > { %v1024_v6 = vrot.slane %v1003_v4, 5  ;;  %v1331_v4 = vsel %vm311_vm2, %v1330_v41, %v1329_v53  ;;  %v7167_v60 = vld [vmem:[%s7546_s30 + $0x6c] ss:$0 sps:$4 sm:$0x88]   ;;  %v8001_v45 = vld [vmem:[%s10211_s1 + $0x4] sm:$0xf] }
  0x56   : > { %v1603_v2 = vunpack.c.l.b16 %v7167_v60  ;;  %v7161_v10 = vld [vmem:[%s7546_s30 + $0x24] ss:$0 sps:$4 sm:$0x88]   ;;  %v7170_v53 = vld [vmem:[%s7546_s30 + $0x90] ss:$0 sps:$4 sm:$0x88]  }
  0xa0   : > { %v388_v62 = vpop.permute.xlu0 %387  ;;  %v384_v35 = vpop.permute.xlu1 %383 }
  0xa1   : > { %516 = vrot.lane.b32.xlu1 %v388_v62, %s7455_s6  ;;  %v1035_v62 = vsel %vm317_vm4, %v1034_v43, %v1033_v51  ;;  %v7149_v43 = vld [vmem:[%s7546_s30 + $0x54] ss:$0 sps:$4 sm:$0x44]  }
  0xa2   : > { %v1037_v22 = vsel %vm320_vm5, %v1036_v14, %v1035_v62 }
  0xa3   : > { %v1039_v12 = vsel %vm323_vm6, %v1038_v19, %v1037_v22 }
  0xa4   : > { %v7862_v32 = vpop.permute.xlu0 %385  ;;  %v382_v16 = vpop.permute.xlu1 %381 }
  0xa5   : > { %514 = vrot.lane.b32.xlu0 %v7862_v32, %s7455_s6  ;;  %740 = vrot.lane.b32.xlu1 %v731_v18, %s7453_s4 }
  0xa8   : > { %v380_v52 = vpop.permute.xlu0 %379 }
  0xa9   : > { %736 = vrot.lane.b32.xlu0 %v731_v18, %s7454_s5  ;;  %512 = vrot.lane.b32.xlu1 %v384_v35, %s7455_s6 }
  0xad   : > { %510 = vrot.lane.b32.xlu0 %v382_v16, %s7455_s6  ;;  %738 = vrot.lane.b32.xlu1 %v731_v18, %s7455_s6  ;;  %v507_v37 = vpop.permute.xlu0 %506  ;;  %v7142_v16 = vld [vmem:[%s7546_s30] ss:$0 sps:$4 sm:$0x44]  }
  0xae   : > { %v1295_v23 = vunpack.c.l.b16 %v7142_v16 }
  0xb0   : > { %v1311_v61 = vrot.slane %v1295_v23, 5 }
  0xb1   : > { %508 = vrot.lane.b32.xlu0 %v380_v52, %s7455_s6  ;;  %734 = vrot.lane.b32.xlu1 %v731_v18, %s7456_s7  ;;  %v7899_v33 = vpop.permute.xlu0 %504  ;;  %v7144_v52 = vld [vmem:[%s7546_s30 + $0x18] ss:$0 sps:$4 sm:$0x44]  }
  0xb2   : > { %v1297_v59 = vunpack.c.l.b16 %v7144_v52  ;;  %v1313_v46 = vsel %vm305_vm0, %v1312_v57, %v1311_v61  ;;  %v7160_v57 = vld [vmem:[%s7546_s30 + $0x18] ss:$0 sps:$4 sm:$0x88]  }
  0xb3   : > { %v1596_v30 = vunpack.c.l.b16 %v7160_v57 }
  0xb4   : > { %v349_v3 = vpop.permute.xlu1 %348  ;;  %v1314_v1 = vrot.slane %v1297_v59, 3  ;;  %v7166_v59 = vld [vmem:[%s7546_s30 + $0x60] ss:$0 sps:$4 sm:$0x88]  }
  0xb5   : > { %732 = vrot.lane.b32.xlu0 %v731_v18, %s7457_s8  ;;  %576 = vrot.lane.b32.xlu1 %v349_v3, %s7455_s6  ;;  %v503_v39 = vpop.permute.xlu0 %502  ;;  %v1021_v18 = vsel %vm317_vm4, %v1020_v38, %v1019_v55  ;;  %v7147_v3 = vld [vmem:[%s7546_s30 + $0x3c] ss:$0 sps:$4 sm:$0x44]   ;;  %v7157_v55 = vld [vmem:[%s7546_s30 + $0xb4] ss:$0 sps:$4 sm:$0x44]   ;;  %v1602_v31 = vunpack.c.l.b16 %v7166_v59 }
  0xb6   : > { %v1023_v7 = vsel %vm320_vm5, %v1022_v49, %v1021_v18  ;;  %v1315_v9 = vsel %vm308_vm1, %v1314_v1, %v1313_v46  ;;  %v1309_v49 = vunpack.c.l.b16 %v7156_v36  ;;  %v1300_v14 = vunpack.c.l.b16 %v7147_v3  ;;  %v7169_v46 = vld [vmem:[%s7546_s30 + $0x84] ss:$0 sps:$4 sm:$0x88]  }
  0xb7   : > { %v1025_v24 = vsel %vm323_vm6, %v1024_v6, %v1023_v7  ;;  %v1317_v51 = vsel %vm311_vm2, %v1316_v34, %v1315_v9  ;;  %v1302_v6 = vunpack.c.l.b16 %v7149_v43  ;;  %v1310_v19 = vunpack.c.l.b16 %v7157_v55  ;;  %v7162_v9 = vld [vmem:[%s7546_s30 + $0x30] ss:$0 sps:$4 sm:$0x88]  }
  0xb8   : > { %v7904_v5 = vpop.permute.xlu1 %346  ;;  %v1040_v42 = vpack.c.b16 %v1039_v12, %v1025_v24  ;;  %v1319_v18 = vsel %vm314_vm3, %v1318_v13, %v1317_v51  ;;  %v1321_v7 = vrot.slane %v1301_v44, 7  ;;  %v1335_v22 = vrot.slane %v1309_v49, 7  ;;  %v7163_v51 = vld [vmem:[%s7546_s30 + $0x3c] ss:$0 sps:$4 sm:$0x88]  }
  0xb9   : > { %635 = vrot.lane.b32.xlu0 %v507_v37, %s7455_s6  ;;  %633 = vrot.lane.b32.xlu1 %v7899_v33, %s7455_s6  ;;  %v501_v11 = vpop.permute.xlu0 %500  ;;  %v7154_v37 = vld [vmem:[%s7546_s30 + $0x90] ss:$0 sps:$4 sm:$0x44]   ;;  %v1323_v12 = vrot.slane %v1302_v6, 6  ;;  %v1610_v34 = vrot.slane %v1594_v58, 6  ;;  %v1624_v17 = vrot.slane %v1602_v31, 6  ;;  %v1605_v13 = vunpack.c.l.b16 %v7169_v46 }
  0xba   : > { %v1307_v40 = vunpack.c.l.b16 %v7154_v37  ;;  %v1595_v37 = vunpack.c.l.b16 %v7159_v56  ;;  %v1625_v36 = vrot.slane %v1603_v2, 5  ;;  %v1613_v43 = vrot.slane %v1596_v30, 4 }
  0xbb   : > { %v1629_v6 = vrot.slane %v1605_v13, 3 }
  0xbc   : > { %v345_v35 = vpop.permute.xlu1 %344  ;;  %v1332_v38 = vrot.slane %v1307_v40, 1  ;;  %v1604_v40 = vunpack.c.l.b16 %v7168_v63  ;;  %v1611_v41 = vrot.slane %v1595_v37, 5  ;;  %v1626_v49 = vsel %vm305_vm0, %v1625_v36, %v1624_v17  ;;  %v8070_v17 = vld [vmem:[%s10211_s1] sm:$0xf] }
  0xbd   : > { %574 = vrot.lane.b32.xlu0 %v7904_v5, %s7455_s6  ;;  %572 = vrot.lane.b32.xlu1 %v345_v35, %s7455_s6  ;;  %v499_v27 = vpop.permute.xlu0 %498 }
  0xbe   : > { %v1333_v62 = vsel %vm314_vm3, %v1332_v38, %v1331_v4  ;;  %v1627_v55 = vrot.slane %v1604_v40, 4  ;;  %v7171_v4 = vld [vmem:[%s7546_s30 + $0x9c] ss:$0 sps:$4 sm:$0x88]   ;;  %v1612_v44 = vsel %vm305_vm0, %v1611_v41, %v1610_v34 }
  0xc0   : > { %v343_v25 = vpop.permute.xlu1 %342 }
  0xc1   : > { %631 = vrot.lane.b32.xlu0 %v503_v39, %s7455_s6  ;;  %570 = vrot.lane.b32.xlu1 %v343_v25, %s7455_s6  ;;  %v1308_v39 = vunpack.c.l.b16 %v7155_v0  ;;  %v1337_v25 = vrot.slane %v1310_v19, 6  ;;  %v1597_v0 = vunpack.c.l.b16 %v7161_v10 }
  0xc3   : > { %v1334_v24 = vsel %vm317_vm4, %v1308_v39, %v1333_v62  ;;  %v1606_v39 = vunpack.c.l.b16 %v7170_v53  ;;  %v1615_v62 = vrot.slane %v1597_v0, 3  ;;  %v8079_v0 = vld [vmem:[%s10211_s1 + $0x8] sm:$0xf] }
  0xc4   : > { %v341_v15 = vpop.permute.xlu1 %340  ;;  %v1336_v16 = vsel %vm320_vm5, %v1335_v22, %v1334_v24  ;;  %v1628_v22 = vsel %vm308_vm1, %v1627_v55, %v1626_v49  ;;  %v1607_v24 = vunpack.c.l.b16 %v7171_v4  ;;  %v7185_v49 = vld [vmem:[%s7546_s30 + $0x84] ss:$0 sps:$4 sm:$0x88]  }
  0xc5   : > { %629 = vrot.lane.b32.xlu0 %v501_v11, %s7455_s6  ;;  %568 = vrot.lane.b32.xlu1 %v341_v15, %s7455_s6  ;;  %v1320_v11 = vsel %vm317_vm4, %v1300_v14, %v1319_v18  ;;  %v1338_v47 = vsel %vm323_vm6, %v1337_v25, %v1336_v16  ;;  %v1598_v14 = vunpack.c.l.b16 %v7162_v9  ;;  %v1631_v25 = vrot.slane %v1606_v39, 2  ;;  %v7173_v16 = vld [vmem:[%s7546_s30 + $0xb4] ss:$0 sps:$4 sm:$0x88]  }
  0xc6   : > { %v1633_v56 = vrot.slane %v1607_v24, 1  ;;  %v1609_v63 = vunpack.c.l.b16 %v7173_v16  ;;  %v7179_v16 = vld [vmem:[%s7546_s30 + $0x3c] ss:$0 sps:$4 sm:$0x88]  }
  0xc8   : > { %v1636_v30 = vrot.slane %v1609_v63, 7 }
  0xc9   : > { %1049 = vrot.lane.b32.xlu0 %v1040_v42, %s7453_s4  ;;  %627 = vrot.lane.b32.xlu1 %v499_v27, %s7455_s6  ;;  %v1322_v27 = vsel %vm320_vm5, %v1321_v7, %v1320_v11  ;;  %v1614_v7 = vsel %vm308_vm1, %v1613_v43, %v1612_v44  ;;  %v1599_v11 = vunpack.c.l.b16 %v7163_v51  ;;  %v7177_v44 = vld [vmem:[%s7546_s30 + $0x24] ss:$0 sps:$4 sm:$0x88]  }
  0xca   : > { %v1324_v28 = vsel %vm323_vm6, %v1323_v12, %v1322_v27  ;;  %v1617_v12 = vrot.slane %v1598_v14, 2  ;;  %v7165_v27 = vld [vmem:[%s7546_s30 + $0x54] ss:$0 sps:$4 sm:$0x88]   ;;  %v1896_v24 = vunpack.c.l.b16 %v7177_v44 }
  0xcb   : > { %v7971_v8 = vpack.c.b16 %v1338_v47, %v1324_v28  ;;  %v1616_v28 = vsel %vm311_vm2, %v1615_v62, %v1614_v7  ;;  %v1630_v47 = vsel %vm311_vm2, %v1629_v6, %v1628_v22  ;;  %v1619_v26 = vrot.slane %v1599_v11, 1  ;;  %v7178_v22 = vld [vmem:[%s7546_s30 + $0x30] ss:$0 sps:$4 sm:$0x88]  }
  0xcc   : > { %v1618_v59 = vsel %vm314_vm3, %v1617_v12, %v1616_v28  ;;  %v1632_v60 = vsel %vm314_vm3, %v1631_v25, %v1630_v47  ;;  %v1601_v57 = vunpack.c.l.b16 %v7165_v27  ;;  %v7186_v11 = vld [vmem:[%s7546_s30 + $0x90] ss:$0 sps:$4 sm:$0x88]   ;;  %v1904_v12 = vunpack.c.l.b16 %v7185_v49  ;;  %v7187_v28 = vld [vmem:[%s7546_s30 + $0x9c] ss:$0 sps:$4 sm:$0x88]  }
  0xcd   : > { %1047 = vrot.lane.b32.xlu0 %v1040_v42, %s7455_s6  ;;  %1045 = vrot.lane.b32.xlu1 %v1040_v42, %s7454_s5  ;;  %v1620_v2 = vsel %vm317_vm4, %v1619_v26, %v1618_v59  ;;  %v1905_v26 = vunpack.c.l.b16 %v7186_v11  ;;  %v7199_v11 = vld [vmem:[%s7546_s30 + $0x70] ss:$0 sps:$4 sm:$0x11]  }
  0xce   : > { %v1622_v46 = vrot.slane %v1601_v57, 7  ;;  %v1928_v59 = vrot.slane %v1904_v12, 4  ;;  %v7192_v12 = vld [vmem:[%s7546_s30 + $0x1c] ss:$0 sps:$4 sm:$0x11]  }
  0xd1   : > { %1043 = vrot.lane.b32.xlu0 %v1040_v42, %s7456_s7  ;;  %1041 = vrot.lane.b32.xlu1 %v1040_v42, %s7457_s8 }
 0x113   : > { %v7951_v35 = vpop.permute.xlu1 %516 }
 0x114   : > { %6211 = vmatpush3.bf16.msra.mxu0 %v7951_v35 }
 0x115   : > { %6212 = vmatprep.subr.bf16.mxu0 %v7458_v50 }
 0x117   : > { %v7957_v42 = vpop.permute.xlu0 %514  ;;  %v741_v15 = vpop.permute.xlu1 %740 }
 0x118   : > { %6213 = vmatpush3.bf16.msra.mxu0 %v7957_v42  ;;  %830 = vrot.lane.b32.xlu0 %v741_v15, %s7455_s6 }
 0x119   : > { %6214 = vmatprep.subr.bf16.mxu0 %v7458_v50 }
 0x11b   : > { %v737_v48 = vpop.permute.xlu0 %736  ;;  %v7966_v52 = vpop.permute.xlu1 %512 }
 0x11c   : > { %826 = vrot.lane.b32.xlu0 %v737_v48, %s7455_s6  ;;  %6215 = vmatpush3.bf16.msra.mxu0 %v7966_v52 }
 0x11d   : > { %6216 = vmatprep.subr.bf16.mxu0 %v7458_v50 }
 0x11f   : > { %v7973_v23 = vpop.permute.xlu0 %510  ;;  %v7975_v20 = vpop.permute.xlu1 %738 }
 0x120   : > { %6217 = vmatpush3.bf16.msra.mxu0 %v7973_v23  ;;  %828 = vrot.lane.b32.xlu1 %v7975_v20, %s7455_s6 }
 0x121   : > { %6218 = vmatprep.subr.bf16.mxu0 %v7458_v50  ;;  %1348 = vrot.lane.b32.xlu0 %v7971_v8, %s7453_s4 }
 0x123   : > { %v7983_v54 = vpop.permute.xlu0 %508  ;;  %v735_v21 = vpop.permute.xlu1 %734 }
 0x124   : > { %6219 = vmatpush3.bf16.msra.mxu0 %v7983_v54  ;;  %824 = vrot.lane.b32.xlu1 %v735_v21, %s7455_s6  ;;  %v7172_v21 = vld [vmem:[%s7546_s30 + $0xa8] ss:$0 sps:$4 sm:$0x88]  }
 0x125   : > { %6220 = vmatprep.subr.bf16.mxu0 %v7458_v50  ;;  %1346 = vrot.lane.b32.xlu0 %v7971_v8, %s7455_s6  ;;  %v1608_v31 = vunpack.c.l.b16 %v7172_v21  ;;  %v1897_v21 = vunpack.c.l.b16 %v7178_v22  ;;  %v7191_v22 = vld [vmem:[%s7546_s30 + $0x10] ss:$0 sps:$4 sm:$0x11]  }
 0x127   : > { %v733_v61 = vpop.permute.xlu0 %732  ;;  %v577_v1 = vpop.permute.xlu1 %576 }
 0x128   : > { %6221 = vmatpush3.bf16.msra.mxu0 %v7862_v32  ;;  %822 = vrot.lane.b32.xlu1 %v733_v61, %s7455_s6 }
 0x129   : > { %6242 = vmatprep.subr.bf16.mxu0 %v7458_v50  ;;  %6227 = vmatpush3.bf16.msra.mxu1 %v577_v1  ;;  %v1634_v1 = vsel %vm317_vm4, %v1633_v56, %v1632_v60  ;;  %v1914_v56 = vrot.slane %v1896_v24, 4  ;;  %v7180_v60 = vld [vmem:[%s7546_s30 + $0x48] ss:$0 sps:$4 sm:$0x88]  }
 0x12a   : > { %6228 = vmatprep.subr.bf16.mxu1 %v7458_v50  ;;  %v1635_v41 = vsel %vm320_vm5, %v1608_v31, %v1634_v1  ;;  %v1906_v31 = vunpack.c.l.b16 %v7187_v28  ;;  %v1930_v1 = vrot.slane %v1905_v26, 3  ;;  %v2193_v28 = vunpack.c.l.b16 %v7191_v22 }
 0x12b   : > { %v8006_v29 = vpop.permute.xlu0 %635  ;;  %6223 = vmatmul.mubr.msk.bf16.vlgmr.msra.gmra.mxu0 %vm524_vm8, %v8001_v45  ;;  %v8017_v3 = vpop.permute.xlu1 %633  ;;  %v1637_v53 = vsel %vm323_vm6, %v1636_v30, %v1635_v41  ;;  %v1899_v41 = vunpack.c.l.b16 %v7180_v60 }
 0x12c   : > { %6243 = vmatpush3.bf16.msra.mxu0 %v8006_v29  ;;  %1344 = vrot.lane.b32.xlu1 %v7971_v8, %s7454_s5  ;;  %v2208_v60 = vrot.slane %v2193_v28, 7 }
 0x12d   : > { %6244 = vmatprep.subr.bf16.mxu0 %v7458_v50  ;;  %6254 = vmatprep.mubr.msk.bf16.mxu0 %vm7459_vm7, %v7458_v50 }
 0x12f   : > { %v575_v38 = vpop.permute.xlu0 %574  ;;  %v573_v18 = vpop.permute.xlu1 %572 }
 0x130   : > { %1342 = vrot.lane.b32.xlu1 %v7971_v8, %s7456_s7  ;;  %6229 = vmatpush3.bf16.msra.mxu1 %v575_v38 }
 0x131   : > { %6245 = vmatpush3.bf16.msra.mxu0 %v8017_v3  ;;  %6230 = vmatprep.subr.bf16.mxu1 %v7458_v50 }
 0x132   : > { %6246 = vmatprep.subr.bf16.mxu0 %v7458_v50 }
 0x133   : > { %v8030_v19 = vpop.permute.xlu0 %631  ;;  %v571_v15 = vpop.permute.xlu1 %570 }
 0x134   : > { %1340 = vrot.lane.b32.xlu1 %v7971_v8, %s7457_s8  ;;  %6231 = vmatpush3.bf16.msra.mxu1 %v573_v18  ;;  %v7164_v8 = vld [vmem:[%s7546_s30 + $0x48] ss:$0 sps:$4 sm:$0x88]  }
 0x135   : > { %6247 = vmatpush3.bf16.msra.mxu0 %v8030_v19  ;;  %6232 = vmatprep.subr.bf16.mxu1 %v7458_v50  ;;  %v1600_v37 = vunpack.c.l.b16 %v7164_v8 }
 0x136   : > { %6248 = vmatprep.subr.bf16.mxu0 %v7458_v50 }
 0x137   : > { %v8043_v48 = vpop.permute.xlu0 %629  ;;  %v569_v61 = vpop.permute.xlu1 %568  ;;  %v1621_v34 = vsel %vm320_vm5, %v1600_v37, %v1620_v2  ;;  %v1898_v37 = vunpack.c.l.b16 %v7179_v16  ;;  %v1916_v2 = vrot.slane %v1897_v21, 3  ;;  %v7198_v16 = vld [vmem:[%s7546_s30 + $0x64] ss:$0 sps:$4 sm:$0x11]   ;;  %v2194_v21 = vunpack.c.l.b16 %v7192_v12 }
 0x138   : > { %6233 = vmatpush3.bf16.msra.mxu1 %v571_v15  ;;  %v1623_v9 = vsel %vm323_vm6, %v1622_v46, %v1621_v34 }
 0x139   : > { %6249 = vmatpush3.bf16.msra.mxu0 %v8043_v48  ;;  %6234 = vmatprep.subr.bf16.mxu1 %v7458_v50  ;;  %v1638_v13 = vpack.c.b16 %v1637_v53, %v1623_v9  ;;  %v1918_v53 = vrot.slane %v1898_v37, 2 }
 0x13a   : > { %6250 = vmatprep.subr.bf16.mxu0 %v7458_v50 }
 0x13b   : > { %v1050_v58 = vpop.permute.xlu0 %1049  ;;  %v8056_v10 = vpop.permute.xlu1 %627 }
 0x13c   : > { %1139 = vrot.lane.b32.xlu0 %v1050_v58, %s7455_s6  ;;  %6235 = vmatpush3.bf16.msra.mxu1 %v569_v61  ;;  %v7188_v61 = vld [vmem:[%s7546_s30 + $0xa8] ss:$0 sps:$4 sm:$0x88]  }
 0x13d   : > { %6236 = vmatprep.subr.bf16.mxu1 %v7458_v50  ;;  %6251 = vmatpush3.bf16.msra.mxu0 %v8056_v10 }
 0x13e   : > { %6252 = vmatprep.subr.bf16.mxu0 %v7458_v50 }
 0x13f   : > { %v8059_v40 = vpop.permute.xlu0 %1047  ;;  %v1046_v36 = vpop.permute.xlu1 %1045 }
 0x140   : > { %1137 = vrot.lane.b32.xlu0 %v8059_v40, %s7455_s6  ;;  %6237 = vmatpush3.bf16.msra.mxu1 %v7904_v5 }
 0x141   : > { %6258 = vmatprep.subr.bf16.mxu1 %v7458_v50  ;;  %6253 = vmatpush3.bf16.msra.mxu0 %v7899_v33 }
 0x142   : > { %6274 = vmatprep.subr.bf16.mxu0 %v7458_v50 }
 0x143   : > { %6239 = vmatmul.mubr.msk.bf16.vlgmr.msra.gmra.mxu1 %vm524_vm8, %v8070_v17  ;;  %v1044_v5 = vpop.permute.xlu0 %1043  ;;  %v1042_v38 = vpop.permute.xlu1 %1041 }
 0x144   : > { %6259 = vmatpush3.bf16.msra.mxu1 %v8006_v29  ;;  %1135 = vrot.lane.b32.xlu0 %v1046_v36, %s7455_s6  ;;  %v1907_v36 = vunpack.c.l.b16 %v7188_v61 }
 0x145   : > { %6255 = vmatmul.mubr.msk.bf16.vlgmr.msra.gmra.mxu0 %vm524_vm8, %v8079_v0  ;;  %6260 = vmatprep.subr.bf16.mxu1 %v7458_v50 }
 0x146   : > { %6275 = vmatpush3.bf16.msra.mxu0 %v7951_v35  ;;  %1133 = vrot.lane.b32.xlu1 %v1044_v5, %s7455_s6  ;;  %v7174_v35 = vld [vmem:[%s7546_s30] ss:$0 sps:$4 sm:$0x88]   ;;  %v1932_v5 = vrot.slane %v1906_v31, 2 }
 0x147   : > { %6276 = vmatprep.subr.bf16.mxu0 %v7458_v50  ;;  %6270 = vmatprep.mubr.msk.bf16.mxu1 %vm7459_vm7, %v7458_v50  ;;  %v1893_v43 = vunpack.c.l.b16 %v7174_v35  ;;  %v7181_v35 = vld [vmem:[%s7546_s30 + $0x54] ss:$0 sps:$4 sm:$0x88]  }
 0x148   : > { %6261 = vmatpush3.bf16.msra.mxu1 %v8017_v3  ;;  %1647 = vrot.lane.b32.xlu0 %v1638_v13, %s7453_s4 }
 0x149   : > { %6262 = vmatprep.subr.bf16.mxu1 %v7458_v50  ;;  %6286 = vmatprep.mubr.msk.bf16.mxu0 %vm7459_vm7, %v7458_v50  ;;  %v1909_v18 = vrot.slane %v1893_v43, 7 }
 0x14a   : > { %6277 = vmatpush3.bf16.msra.mxu0 %v7957_v42  ;;  %1131 = vrot.lane.b32.xlu1 %v1042_v38, %s7455_s6  ;;  %v7175_v42 = vld [vmem:[%s7546_s30 + $0xc] ss:$0 sps:$4 sm:$0x88]  }
 0x14b   : > { %6278 = vmatprep.subr.bf16.mxu0 %v7458_v50  ;;  %v1894_v55 = vunpack.c.l.b16 %v7175_v42  ;;  %v7189_v42 = vld [vmem:[%s7546_s30 + $0xb4] ss:$0 sps:$4 sm:$0x88]  }
 0x14c   : > { %6263 = vmatpush3.bf16.msra.mxu1 %v8030_v19  ;;  %1645 = vrot.lane.b32.xlu0 %v1638_v13, %s7455_s6 }
 0x14d   : > { %6264 = vmatprep.subr.bf16.mxu1 %v7458_v50  ;;  %v1910_v62 = vrot.slane %v1894_v55, 6 }
 0x14e   : > { %6279 = vmatpush3.bf16.msra.mxu0 %v7966_v52  ;;  %1643 = vrot.lane.b32.xlu1 %v1638_v13, %s7454_s5  ;;  %v7182_v52 = vld [vmem:[%s7546_s30 + $0x60] ss:$0 sps:$4 sm:$0x88]  }
 0x14f   : > { %6280 = vmatprep.subr.bf16.mxu0 %v7458_v50  ;;  %v1901_v51 = vunpack.c.l.b16 %v7182_v52  ;;  %v1911_v47 = vsel %vm305_vm0, %v1910_v62, %v1909_v18 }
 0x150   : > { %6265 = vmatpush3.bf16.msra.mxu1 %v8043_v48  ;;  %1641 = vrot.lane.b32.xlu0 %v1638_v13, %s7456_s7 }
 0x151   : > { %6266 = vmatprep.subr.bf16.mxu1 %v7458_v50  ;;  %v1923_v6 = vrot.slane %v1901_v51, 7  ;;  %v1900_v51 = vunpack.c.l.b16 %v7181_v35  ;;  %v7204_v35 = vld [vmem:[%s7546_s30 + $0xac] ss:$0 sps:$4 sm:$0x11]  }
 0x152   : > { %6281 = vmatpush3.bf16.msra.mxu0 %v7973_v23  ;;  %1639 = vrot.lane.b32.xlu1 %v1638_v13, %s7457_s8  ;;  %v7176_v23 = vld [vmem:[%s7546_s30 + $0x18] ss:$0 sps:$4 sm:$0x88]  }
 0x153   : > { %6282 = vmatprep.subr.bf16.mxu0 %v7458_v50  ;;  %v1895_v14 = vunpack.c.l.b16 %v7176_v23  ;;  %v1934_v23 = vrot.slane %v1907_v36, 1 }
 0x154   : > { %6267 = vmatpush3.bf16.msra.mxu1 %v8056_v10 }
 0x155   : > { %6268 = vmatprep.subr.bf16.mxu1 %v7458_v50  ;;  %v1912_v15 = vrot.slane %v1895_v14, 5 }
 0x156   : > { %6283 = vmatpush3.bf16.msra.mxu0 %v7983_v54  ;;  %v7184_v54 = vld [vmem:[%s7546_s30 + $0x78] ss:$0 sps:$4 sm:$0x88]  }
 0x157   : > { %6284 = vmatprep.subr.bf16.mxu0 %v7458_v50  ;;  %v1903_v39 = vunpack.c.l.b16 %v7184_v54  ;;  %v1913_v57 = vsel %vm308_vm1, %v1912_v15, %v1911_v47  ;;  %v7200_v15 = vld [vmem:[%s7546_s30 + $0x7c] ss:$0 sps:$4 sm:$0x11]   ;;  %v2201_v47 = vunpack.c.l.b16 %v7199_v11 }
 0x158   : > { %6269 = vmatpush3.bf16.msra.mxu1 %v7899_v33  ;;  %v1915_v46 = vsel %vm311_vm2, %v1914_v56, %v1913_v57  ;;  %v2202_v26 = vunpack.c.l.b16 %v7200_v15  ;;  %v7194_v57 = vld [vmem:[%s7546_s30 + $0x34] ss:$0 sps:$4 sm:$0x11]  }
 0x159   : > { %6290 = vmatprep.subr.bf16.mxu1 %v7458_v50  ;;  %v1926_v27 = vrot.slane %v1903_v39, 5  ;;  %v1917_v13 = vsel %vm314_vm3, %v1916_v2, %v1915_v46  ;;  %v2222_v61 = vrot.slane %v2201_v47, 7  ;;  %v7195_v46 = vld [vmem:[%s7546_s30 + $0x40] ss:$0 sps:$4 sm:$0x11]  }
 0x15a   : > { %6285 = vmatpush3.bf16.msra.mxu0 %v7862_v32  ;;  %v7183_v32 = vld [vmem:[%s7546_s30 + $0x6c] ss:$0 sps:$4 sm:$0x88]   ;;  %v1919_v43 = vsel %vm317_vm4, %v1918_v53, %v1917_v13 }
 0x15b   : > { %6306 = vmatprep.subr.bf16.mxu0 %v7458_v50  ;;  %6271 = vmatmul.mubr.msk.bf16.vlgmr.msra.gmra.mxu1 %vm524_vm8, %v8001_v45  ;;  %v1902_v4 = vunpack.c.l.b16 %v7183_v32  ;;  %v1920_v32 = vrot.slane %v1899_v41, 1 }
 0x15c   : > { %6302 = vmatprep.mubr.msk.bf16.mxu1 %vm7459_vm7, %v7458_v50 }
 0x15d   : > { %6287 = vmatmul.mubr.msk.bf16.vlgmr.msra.gmra.mxu0 %vm524_vm8, %v8070_v17  ;;  %v1924_v7 = vrot.slane %v1902_v4, 6  ;;  %v1908_v4 = vunpack.c.l.b16 %v7189_v42  ;;  %v1921_v49 = vsel %vm320_vm5, %v1920_v32, %v1919_v43 }
 0x15e   : > { %6318 = vmatprep.mubr.msk.bf16.mxu0 %vm7459_vm7, %v7458_v50  ;;  %v1922_v39 = vsel %vm323_vm6, %v1900_v51, %v1921_v49  ;;  %v7205_v49 = vld [vmem:[%s7546_s30 + $0xb8] ss:$0 sps:$4 sm:$0x11]  }
 0x15f   : > { %v1925_v8 = vsel %vm305_vm0, %v1924_v7, %v1923_v6  ;;  %v2207_v15 = vunpack.c.l.b16 %v7205_v49 }
 0x160   : > { %v1927_v63 = vsel %vm308_vm1, %v1926_v27, %v1925_v8  ;;  %v7190_v27 = vld [vmem:[%s7546_s30 + $0x4] ss:$0 sps:$4 sm:$0x11]   ;;  %v7201_v8 = vld [vmem:[%s7546_s30 + $0x88] ss:$0 sps:$4 sm:$0x11]  }
 0x161   : > { %v1929_v30 = vsel %vm311_vm2, %v1928_v59, %v1927_v63  ;;  %v2192_v56 = vunpack.c.l.b16 %v7190_v27  ;;  %v2200_v59 = vunpack.c.l.b16 %v7198_v16  ;;  %v7202_v63 = vld [vmem:[%s7546_s30 + $0x94] ss:$0 sps:$4 sm:$0x11]   ;;  %v2203_v31 = vunpack.c.l.b16 %v7201_v8 }
 0x162   : > { %v1931_v38 = vsel %vm314_vm3, %v1930_v1, %v1929_v30  ;;  %v2210_v1 = vrot.slane %v2194_v21, 6  ;;  %v7203_v30 = vld [vmem:[%s7546_s30 + $0xa0] ss:$0 sps:$4 sm:$0x11]   ;;  %v2204_v53 = vunpack.c.l.b16 %v7202_v63  ;;  %v2234_v21 = vrot.slane %v2207_v15, 1 }
 0x163   : > { %v1933_v55 = vsel %vm317_vm4, %v1932_v5, %v1931_v38  ;;  %v2209_v41 = vsel %vm305_vm0, %v2208_v60, %v2192_v56  ;;  %v2223_v36 = vsel %vm305_vm0, %v2222_v61, %v2200_v59  ;;  %v7196_v38 = vld [vmem:[%s7546_s30 + $0x4c] ss:$0 sps:$4 sm:$0x11]   ;;  %v2205_v43 = vunpack.c.l.b16 %v7203_v30 }
 0x164   : > { %v1935_v14 = vsel %vm320_vm5, %v1934_v23, %v1933_v55  ;;  %v2211_v42 = vsel %vm308_vm1, %v2210_v1, %v2209_v41  ;;  %v2197_v23 = vunpack.c.l.b16 %v7195_v46  ;;  %v2228_v51 = vrot.slane %v2204_v53, 4  ;;  %v7209_v46 = vld [vmem:[%s7546_s30 + $0x28] ss:$0 sps:$4 sm:$0x11]  }
 0x165   : > { %v1936_v18 = vsel %vm323_vm6, %v1908_v4, %v1935_v14  ;;  %v7197_v4 = vld [vmem:[%s7546_s30 + $0x58] ss:$0 sps:$4 sm:$0x11]  }
 0x166   : > { %v8195_v6 = vpack.c.b16 %v1936_v18, %v1922_v39  ;;  %v2206_v18 = vunpack.c.l.b16 %v7204_v35  ;;  %v2199_v12 = vunpack.c.l.b16 %v7197_v4  ;;  %v7218_v35 = vld [vmem:[%s7546_s30 + $0x94] ss:$0 sps:$4 sm:$0x11]  }
 0x168   : > { %v2232_v16 = vrot.slane %v2206_v18, 2  ;;  %v2220_v8 = vrot.slane %v2199_v12, 1 }
 0x18a   : > { %v8140_v25 = vpop.permute.xlu0 %830 }
 0x18b   : > { %6291 = vmatpush3.bf16.msra.mxu1 %v8140_v25  ;;  %6307 = vmatpush3.bf16.msra.mxu0 %v8140_v25 }
 0x18c   : > { %6292 = vmatprep.subr.bf16.mxu1 %v7458_v50  ;;  %6308 = vmatprep.subr.bf16.mxu0 %v7458_v50 }
 0x18e   : > { %v8154_v58 = vpop.permute.xlu0 %826 }
 0x192   : > { %v8158_v34 = vpop.permute.xlu1 %828 }
 0x193   : > { %6293 = vmatpush3.bf16.msra.mxu1 %v8158_v34  ;;  %6309 = vmatpush3.bf16.msra.mxu0 %v8158_v34  ;;  %v1349_v9 = vpop.permute.xlu0 %1348 }
 0x194   : > { %6294 = vmatprep.subr.bf16.mxu1 %v7458_v50  ;;  %6310 = vmatprep.subr.bf16.mxu0 %v7458_v50 }
 0x195   : > { %1438 = vrot.lane.b32.xlu0 %v1349_v9, %s7455_s6  ;;  %v2196_v9 = vunpack.c.l.b16 %v7194_v57 }
 0x196   : > { %v8169_v52 = vpop.permute.xlu1 %824 }
 0x197   : > { %6295 = vmatpush3.bf16.msra.mxu1 %v8154_v58  ;;  %6311 = vmatpush3.bf16.msra.mxu0 %v8154_v58  ;;  %v8173_v54 = vpop.permute.xlu0 %1346  ;;  %v2214_v55 = vrot.slane %v2196_v9, 4 }
 0x198   : > { %6296 = vmatprep.subr.bf16.mxu1 %v7458_v50  ;;  %6312 = vmatprep.subr.bf16.mxu0 %v7458_v50 }
 0x199   : > { %1436 = vrot.lane.b32.xlu1 %v8173_v54, %s7455_s6 }
 0x19a   : > { %v8181_v44 = vpop.permute.xlu1 %822 }
 0x19b   : > { %6297 = vmatpush3.bf16.msra.mxu1 %v8169_v52  ;;  %6313 = vmatpush3.bf16.msra.mxu0 %v8169_v52 }
 0x19c   : > { %6298 = vmatprep.subr.bf16.mxu1 %v7458_v50  ;;  %6314 = vmatprep.subr.bf16.mxu0 %v7458_v50 }
 0x19e   : > { %v1345_v62 = vpop.permute.xlu1 %1344 }
 0x19f   : > { %6299 = vmatpush3.bf16.msra.mxu1 %v8181_v44  ;;  %6315 = vmatpush3.bf16.msra.mxu0 %v8181_v44 }
 0x1a0   : > { %1434 = vrot.lane.b32.xlu0 %v1345_v62, %s7455_s6  ;;  %6300 = vmatprep.subr.bf16.mxu1 %v7458_v50 }
 0x1a1   : > { %6316 = vmatprep.subr.bf16.mxu0 %v7458_v50 }
 0x1a2   : > { %v1343_v7 = vpop.permute.xlu1 %1342 }
 0x1a3   : > { %6301 = vmatpush3.bf16.msra.mxu1 %v7975_v20  ;;  %6317 = vmatpush3.bf16.msra.mxu0 %v7975_v20 }
 0x1a4   : > { %1946 = vrot.lane.b32.xlu0 %v8195_v6, %s7453_s4  ;;  %1432 = vrot.lane.b32.xlu1 %v1343_v7, %s7455_s6  ;;  %v2216_v7 = vrot.slane %v2197_v23, 3 }
 0x1a5   : > { %6322 = vmatprep.subr.bf16.mxu1 %v7458_v50  ;;  %6338 = vmatprep.subr.bf16.mxu0 %v7458_v50 }
 0x1a6   : > { %v1341_v24 = vpop.permute.xlu1 %1340  ;;  %6303 = vmatmul.mubr.msk.bf16.vlgmr.msra.gmra.mxu1 %vm524_vm8, %v8079_v0  ;;  %6319 = vmatmul.mubr.msk.bf16.vlgmr.msra.gmra.mxu0 %vm524_vm8, %v8001_v45 }
 0x1a7   : > { %6323 = vmatpush3.bf16.msra.mxu1 %v8006_v29  ;;  %6334 = vmatprep.mubr.msk.bf16.mxu1 %vm7459_vm7, %v7458_v50  ;;  %v7193_v29 = vld [vmem:[%s7546_s30 + $0x28] ss:$0 sps:$4 sm:$0x11]  }
 0x1a8   : > { %1944 = vrot.lane.b32.xlu0 %v8195_v6, %s7455_s6  ;;  %1430 = vrot.lane.b32.xlu1 %v1341_v24, %s7455_s6  ;;  %v2195_v37 = vunpack.c.l.b16 %v7193_v29 }
 0x1a9   : > { %6324 = vmatprep.subr.bf16.mxu1 %v7458_v50  ;;  %6350 = vmatprep.mubr.msk.bf16.mxu0 %vm7459_vm7, %v7458_v50 }
 0x1aa   : > { %v2212_v5 = vrot.slane %v2195_v37, 5 }
 0x1ab   : > { %6325 = vmatpush3.bf16.msra.mxu1 %v8017_v3  ;;  %v2224_v3 = vrot.slane %v2202_v26, 6 }
 0x1ac   : > { %1942 = vrot.lane.b32.xlu1 %v8195_v6, %s7454_s5  ;;  %6326 = vmatprep.subr.bf16.mxu1 %v7458_v50  ;;  %v2213_v14 = vsel %vm311_vm2, %v2212_v5, %v2211_v42  ;;  %v2494_v42 = vunpack.c.l.b16 %v7209_v46 }
 0x1ad   : > { %v2225_v32 = vsel %vm308_vm1, %v2224_v3, %v2223_v36  ;;  %v2215_v22 = vsel %vm314_vm3, %v2214_v55, %v2213_v14  ;;  %v7211_v55 = vld [vmem:[%s7546_s30 + $0x40] ss:$0 sps:$4 sm:$0x11]  }
 0x1ae   : > { %v8232_v2 = vpop.permute.xlu0 %1139  ;;  %v2511_v18 = vrot.slane %v2494_v42, 6  ;;  %v2496_v15 = vunpack.c.l.b16 %v7211_v55  ;;  %v7222_v42 = vld [vmem:[%s7546_s30 + $0x4] ss:$0 sps:$4 sm:$0x22]  }
 0x1af   : > { %6327 = vmatpush3.bf16.msra.mxu1 %v8030_v19  ;;  %6339 = vmatpush3.bf16.msra.mxu0 %v8232_v2  ;;  %v2226_v19 = vrot.slane %v2203_v31, 5  ;;  %v7207_v31 = vld [vmem:[%s7546_s30 + $0x10] ss:$0 sps:$4 sm:$0x11]   ;;  %v2790_v55 = vunpack.c.l.b16 %v7222_v42 }
 0x1b0   : > { %1940 = vrot.lane.b32.xlu1 %v8195_v6, %s7456_s7  ;;  %6328 = vmatprep.subr.bf16.mxu1 %v7458_v50  ;;  %v2492_v36 = vunpack.c.l.b16 %v7207_v31 }
 0x1b1   : > { %6340 = vmatprep.subr.bf16.mxu0 %v7458_v50  ;;  %v2227_v39 = vsel %vm311_vm2, %v2226_v19, %v2225_v32 }
 0x1b2   : > { %v8244_v13 = vpop.permute.xlu0 %1137  ;;  %v2229_v11 = vsel %vm314_vm3, %v2228_v51, %v2227_v39  ;;  %v7219_v51 = vld [vmem:[%s7546_s30 + $0xa0] ss:$0 sps:$4 sm:$0x11]  }
 0x1b3   : > { %6329 = vmatpush3.bf16.msra.mxu1 %v8043_v48  ;;  %6341 = vmatpush3.bf16.msra.mxu0 %v8244_v13  ;;  %v2198_v48 = vunpack.c.l.b16 %v7196_v38  ;;  %v7210_v38 = vld [vmem:[%s7546_s30 + $0x34] ss:$0 sps:$4 sm:$0x11]  }
 0x1b4   : > { %1938 = vrot.lane.b32.xlu1 %v8195_v6, %s7457_s8  ;;  %6330 = vmatprep.subr.bf16.mxu1 %v7458_v50  ;;  %v2230_v6 = vrot.slane %v2205_v43, 3  ;;  %v2495_v39 = vunpack.c.l.b16 %v7210_v38 }
 0x1b5   : > { %6342 = vmatprep.subr.bf16.mxu0 %v7458_v50  ;;  %v2218_v27 = vrot.slane %v2198_v48, 2  ;;  %v2503_v48 = vunpack.c.l.b16 %v7218_v35 }
 0x1b6   : > { %v8260_v62 = vpop.permute.xlu0 %1135  ;;  %v2231_v47 = vsel %vm317_vm4, %v2230_v6, %v2229_v11  ;;  %v7212_v6 = vld [vmem:[%s7546_s30 + $0x4c] ss:$0 sps:$4 sm:$0x11]  }
 0x1b7   : > { %6331 = vmatpush3.bf16.msra.mxu1 %v8056_v10  ;;  %6343 = vmatpush3.bf16.msra.mxu0 %v8260_v62  ;;  %v2217_v10 = vsel %vm317_vm4, %v2216_v7, %v2215_v22  ;;  %v2233_v26 = vsel %vm320_vm5, %v2232_v16, %v2231_v47  ;;  %v7220_v22 = vld [vmem:[%s7546_s30 + $0xac] ss:$0 sps:$4 sm:$0x11]   ;;  %v2513_v16 = vrot.slane %v2495_v39, 5 }
 0x1b8   : > { %6332 = vmatprep.subr.bf16.mxu1 %v7458_v50  ;;  %6344 = vmatprep.subr.bf16.mxu0 %v7458_v50  ;;  %v8268_v24 = vpop.permute.xlu1 %1133  ;;  %v2235_v61 = vsel %vm323_vm6, %v2234_v21, %v2233_v26  ;;  %v7221_v47 = vld [vmem:[%s7546_s30 + $0xb8] ss:$0 sps:$4 sm:$0x11]   ;;  %v2505_v26 = vunpack.c.l.b16 %v7220_v22  ;;  %v7233_v39 = vld [vmem:[%s7546_s30 + $0x88] ss:$0 sps:$4 sm:$0x22]  }
 0x1ba   : > { %v1648_v28 = vpop.permute.xlu0 %1647 }
 0x1bb   : > { %6333 = vmatpush3.bf16.msra.mxu1 %v7899_v33  ;;  %1737 = vrot.lane.b32.xlu0 %v1648_v28, %s7455_s6  ;;  %v2219_v33 = vsel %vm320_vm5, %v2218_v27, %v2217_v10  ;;  %v2504_v27 = vunpack.c.l.b16 %v7219_v51  ;;  %v2527_v28 = vrot.slane %v2503_v48, 5  ;;  %v7213_v10 = vld [vmem:[%s7546_s30 + $0x58] ss:$0 sps:$4 sm:$0x11]  }
 0x1bc   : > { %6345 = vmatpush3.bf16.msra.mxu0 %v8268_v24  ;;  %6354 = vmatprep.subr.bf16.mxu1 %v7458_v50  ;;  %v8277_v29 = vpop.permute.xlu1 %1131  ;;  %v2221_v60 = vsel %vm323_vm6, %v2220_v8, %v2219_v33  ;;  %v2497_v33 = vunpack.c.l.b16 %v7212_v6  ;;  %v7224_v48 = vld [vmem:[%s7546_s30 + $0x1c] ss:$0 sps:$4 sm:$0x22]  }
 0x1bd   : > { %6346 = vmatprep.subr.bf16.mxu0 %v7458_v50  ;;  %v2236_v63 = vpack.c.b16 %v2235_v61, %v2221_v60  ;;  %v2515_v60 = vrot.slane %v2496_v15, 4  ;;  %v2529_v61 = vrot.slane %v2504_v27, 4  ;;  %v2801_v27 = vunpack.c.l.b16 %v7233_v39 }
 0x1be   : > { %6335 = vmatmul.mubr.msk.bf16.vlgmr.msra.gmra.mxu1 %vm524_vm8, %v8070_v17  ;;  %v8283_v56 = vpop.permute.xlu0 %1645 }
 0x1bf   : > { %6355 = vmatpush3.bf16.msra.mxu1 %v8232_v2  ;;  %6366 = vmatprep.mubr.msk.bf16.mxu1 %vm7459_vm7, %v7458_v50 }
 0x1c0   : > { %1735 = vrot.lane.b32.xlu0 %v8283_v56, %s7455_s6  ;;  %6347 = vmatpush3.bf16.msra.mxu0 %v8277_v29  ;;  %v1644_v59 = vpop.permute.xlu1 %1643 }
 0x1c1   : > { %6348 = vmatprep.subr.bf16.mxu0 %v7458_v50  ;;  %6356 = vmatprep.subr.bf16.mxu1 %v7458_v50 }
 0x1c2   : > { %v1642_v57 = vpop.permute.xlu0 %1641 }
 0x1c3   : > { %6357 = vmatpush3.bf16.msra.mxu1 %v8244_v13  ;;  %1731 = vrot.lane.b32.xlu1 %v1642_v57, %s7455_s6 }
 0x1c4   : > { %6349 = vmatpush3.bf16.msra.mxu0 %v8059_v40  ;;  %1733 = vrot.lane.b32.xlu0 %v1644_v59, %s7455_s6  ;;  %v1640_v37 = vpop.permute.xlu1 %1639 }
 0x1c5   : > { %6358 = vmatprep.subr.bf16.mxu1 %v7458_v50  ;;  %6370 = vmatprep.subr.bf16.mxu0 %v7458_v50 }
 0x1c7   : > { %6359 = vmatpush3.bf16.msra.mxu1 %v8260_v62  ;;  %6351 = vmatmul.mubr.msk.bf16.vlgmr.msra.gmra.mxu0 %vm524_vm8, %v8079_v0 }
 0x1c8   : > { %6371 = vmatpush3.bf16.msra.mxu0 %v8140_v25  ;;  %2245 = vrot.lane.b32.xlu0 %v2236_v63, %s7453_s4  ;;  %v7206_v25 = vld [vmem:[%s7546_s30 + $0x4] ss:$0 sps:$4 sm:$0x11]  }
 0x1c9   : > { %6360 = vmatprep.subr.bf16.mxu1 %v7458_v50  ;;  %6372 = vmatprep.subr.bf16.mxu0 %v7458_v50  ;;  %v2491_v1 = vunpack.c.l.b16 %v7206_v25  ;;  %v2506_v25 = vunpack.c.l.b16 %v7221_v47  ;;  %v7235_v47 = vld [vmem:[%s7546_s30 + $0xa0] ss:$0 sps:$4 sm:$0x22]  }
 0x1ca   : > { %1729 = vrot.lane.b32.xlu1 %v1640_v37, %s7455_s6  ;;  %6382 = vmatprep.mubr.msk.bf16.mxu0 %vm7459_vm7, %v7458_v50  ;;  %v2498_v37 = vunpack.c.l.b16 %v7213_v10  ;;  %v7227_v10 = vld [vmem:[%s7546_s30 + $0x40] ss:$0 sps:$4 sm:$0x22]  }
 0x1cb   : > { %6361 = vmatpush3.bf16.msra.mxu1 %v8268_v24  ;;  %v2507_v53 = vrot.slane %v2491_v1, 1  ;;  %v2533_v46 = vrot.slane %v2506_v25, 2 }
 0x1cc   : > { %6373 = vmatpush3.bf16.msra.mxu0 %v8158_v34  ;;  %2243 = vrot.lane.b32.xlu0 %v2236_v63, %s7455_s6  ;;  %v7208_v34 = vld [vmem:[%s7546_s30 + $0x1c] ss:$0 sps:$4 sm:$0x11]  }
 0x1cd   : > { %6362 = vmatprep.subr.bf16.mxu1 %v7458_v50  ;;  %6374 = vmatprep.subr.bf16.mxu0 %v7458_v50  ;;  %v2493_v30 = vunpack.c.l.b16 %v7208_v34  ;;  %v2508_v4 = vsel %vm305_vm0, %v2492_v36, %v2507_v53  ;;  %v2531_v34 = vrot.slane %v2505_v26, 3 }
 0x1ce   : > { %2241 = vrot.lane.b32.xlu1 %v2236_v63, %s7454_s5 }
 0x1cf   : > { %6363 = vmatpush3.bf16.msra.mxu1 %v8277_v29  ;;  %v2509_v23 = vrot.slane %v2493_v30, 7 }
 0x1d0   : > { %6375 = vmatpush3.bf16.msra.mxu0 %v8154_v58  ;;  %6364 = vmatprep.subr.bf16.mxu1 %v7458_v50  ;;  %v7214_v58 = vld [vmem:[%s7546_s30 + $0x64] ss:$0 sps:$4 sm:$0x11]  }
 0x1d1   : > { %6376 = vmatprep.subr.bf16.mxu0 %v7458_v50  ;;  %2239 = vrot.lane.b32.xlu0 %v2236_v63, %s7456_s7  ;;  %v2499_v3 = vunpack.c.l.b16 %v7214_v58  ;;  %v2510_v11 = vsel %vm308_vm1, %v2509_v23, %v2508_v4  ;;  %v2517_v58 = vrot.slane %v2497_v33, 3  ;;  %v7230_v23 = vld [vmem:[%s7546_s30 + $0x64] ss:$0 sps:$4 sm:$0x22]  }
 0x1d2   : > { %2237 = vrot.lane.b32.xlu1 %v2236_v63, %s7457_s8  ;;  %v2512_v8 = vsel %vm311_vm2, %v2511_v18, %v2510_v11  ;;  %v2798_v4 = vunpack.c.l.b16 %v7230_v23  ;;  %v7232_v18 = vld [vmem:[%s7546_s30 + $0x7c] ss:$0 sps:$4 sm:$0x22]   ;;  %v7226_v11 = vld [vmem:[%s7546_s30 + $0x34] ss:$0 sps:$4 sm:$0x22]  }
 0x1d3   : > { %6365 = vmatpush3.bf16.msra.mxu1 %v8059_v40  ;;  %v2521_v5 = vrot.slane %v2499_v3, 1  ;;  %v2514_v57 = vsel %vm314_vm3, %v2513_v16, %v2512_v8  ;;  %v2519_v3 = vrot.slane %v2498_v37, 2  ;;  %v2794_v33 = vunpack.c.l.b16 %v7226_v11 }
 0x1d4   : > { %6377 = vmatpush3.bf16.msra.mxu0 %v8169_v52  ;;  %6386 = vmatprep.subr.bf16.mxu1 %v7458_v50  ;;  %v7216_v52 = vld [vmem:[%s7546_s30 + $0x7c] ss:$0 sps:$4 sm:$0x11]   ;;  %v2820_v6 = vrot.slane %v2798_v4, 2 }
 0x1d5   : > { %6378 = vmatprep.subr.bf16.mxu0 %v7458_v50  ;;  %v2501_v41 = vunpack.c.l.b16 %v7216_v52 }
 0x1d6   : > { %6367 = vmatmul.mubr.msk.bf16.vlgmr.msra.gmra.mxu1 %vm524_vm8, %v8001_v45 }
 0x1d7   : > { %6398 = vmatprep.mubr.msk.bf16.mxu1 %vm7459_vm7, %v7458_v50  ;;  %v2523_v43 = vrot.slane %v2501_v41, 7 }
 0x1d8   : > { %6379 = vmatpush3.bf16.msra.mxu0 %v8181_v44  ;;  %v7215_v44 = vld [vmem:[%s7546_s30 + $0x70] ss:$0 sps:$4 sm:$0x11]  }
 0x1d9   : > { %6380 = vmatprep.subr.bf16.mxu0 %v7458_v50  ;;  %v2500_v9 = vunpack.c.l.b16 %v7215_v44  ;;  %v2516_v44 = vsel %vm317_vm4, %v2515_v60, %v2514_v57  ;;  %v7228_v57 = vld [vmem:[%s7546_s30 + $0x4c] ss:$0 sps:$4 sm:$0x22]  }
 0x1db   : > { %v2522_v49 = vsel %vm305_vm0, %v2500_v9, %v2521_v5 }
 0x1dc   : > { %6381 = vmatpush3.bf16.msra.mxu0 %v7975_v20  ;;  %v7217_v20 = vld [vmem:[%s7546_s30 + $0x88] ss:$0 sps:$4 sm:$0x11]   ;;  %v2524_v12 = vsel %vm308_vm1, %v2523_v43, %v2522_v49  ;;  %v7231_v43 = vld [vmem:[%s7546_s30 + $0x70] ss:$0 sps:$4 sm:$0x22]  }
 0x1dd   : > { %6402 = vmatprep.subr.bf16.mxu0 %v7458_v50  ;;  %v2502_v32 = vunpack.c.l.b16 %v7217_v20  ;;  %v2518_v20 = vsel %vm320_vm5, %v2517_v58, %v2516_v44  ;;  %v2799_v49 = vunpack.c.l.b16 %v7231_v43  ;;  %v2795_v58 = vunpack.c.l.b16 %v7227_v10 }
 0x1de   : > { %v2520_v9 = vsel %vm323_vm6, %v2519_v3, %v2518_v20  ;;  %v7237_v3 = vld [vmem:[%s7546_s30 + $0xb8] ss:$0 sps:$4 sm:$0x22]  }
 0x1df   : > { %6383 = vmatmul.mubr.msk.bf16.vlgmr.msra.gmra.mxu0 %vm524_vm8, %v8070_v17  ;;  %v2525_v7 = vrot.slane %v2502_v32, 6  ;;  %v7223_v32 = vld [vmem:[%s7546_s30 + $0x10] ss:$0 sps:$4 sm:$0x22]   ;;  %v2821_v22 = vrot.slane %v2799_v49, 1  ;;  %v2805_v23 = vunpack.c.l.b16 %v7237_v3 }
 0x1e0   : > { %6414 = vmatprep.mubr.msk.bf16.mxu0 %vm7459_vm7, %v7458_v50  ;;  %v2791_v51 = vunpack.c.l.b16 %v7223_v32 }
 0x1e1   : > { %v2526_v21 = vsel %vm311_vm2, %v2525_v7, %v2524_v12  ;;  %v7234_v12 = vld [vmem:[%s7546_s30 + $0x94] ss:$0 sps:$4 sm:$0x22]  }
 0x1e2   : > { %v2528_v63 = vsel %vm314_vm3, %v2527_v28, %v2526_v21  ;;  %v2807_v7 = vrot.slane %v2791_v51, 1  ;;  %v2792_v28 = vunpack.c.l.b16 %v7224_v48  ;;  %v2822_v21 = vsel %vm305_vm0, %v2821_v22, %v2820_v6 }
 0x1e3   : > { %v2530_v1 = vsel %vm317_vm4, %v2529_v61, %v2528_v63  ;;  %v2802_v26 = vunpack.c.l.b16 %v7234_v12  ;;  %v7236_v63 = vld [vmem:[%s7546_s30 + $0xac] ss:$0 sps:$4 sm:$0x22]   ;;  %v7248_v12 = vld [vmem:[%s7546_s30 + $0x7c] ss:$0 sps:$4 sm:$0x22]  }
 0x1e4   : > { %v2532_v30 = vsel %vm320_vm5, %v2531_v34, %v2530_v1  ;;  %v2803_v34 = vunpack.c.l.b16 %v7235_v47  ;;  %v7229_v1 = vld [vmem:[%s7546_s30 + $0x58] ss:$0 sps:$4 sm:$0x22]   ;;  %v3099_v47 = vunpack.c.l.b16 %v7248_v12 }
 0x1e5   : > { %v2534_v53 = vsel %vm323_vm6, %v2533_v46, %v2532_v30  ;;  %v2826_v44 = vrot.slane %v2802_v26, 6  ;;  %v2796_v30 = vunpack.c.l.b16 %v7228_v57  ;;  %v2797_v32 = vunpack.c.l.b16 %v7229_v1 }
 0x1e6   : > { %v8406_v38 = vpack.c.b16 %v2534_v53, %v2520_v9  ;;  %v2804_v9 = vunpack.c.l.b16 %v7236_v63  ;;  %v2814_v53 = vrot.slane %v2795_v58, 5  ;;  %v7241_v63 = vld [vmem:[%s7546_s30 + $0x28] ss:$0 sps:$4 sm:$0x22]   ;;  %v3122_v58 = vrot.slane %v3099_v47, 1 }
 0x1e7   : > { %v2818_v49 = vrot.slane %v2797_v32, 3 }
 0x207   : > { %v8347_v19 = vpop.permute.xlu0 %1438 }
 0x208   : > { %6387 = vmatpush3.bf16.msra.mxu1 %v8347_v19  ;;  %6403 = vmatpush3.bf16.msra.mxu0 %v8347_v19 }
 0x209   : > { %6388 = vmatprep.subr.bf16.mxu1 %v7458_v50  ;;  %6404 = vmatprep.subr.bf16.mxu0 %v7458_v50 }
 0x20b   : > { %v8359_v14 = vpop.permute.xlu1 %1436 }
 0x20c   : > { %6389 = vmatpush3.bf16.msra.mxu1 %v8359_v14  ;;  %6405 = vmatpush3.bf16.msra.mxu0 %v8359_v14 }
 0x20d   : > { %6390 = vmatprep.subr.bf16.mxu1 %v7458_v50  ;;  %6406 = vmatprep.subr.bf16.mxu0 %v7458_v50 }
 0x212   : > { %v8373_v59 = vpop.permute.xlu0 %1434 }
 0x213   : > { %6391 = vmatpush3.bf16.msra.mxu1 %v8373_v59  ;;  %6407 = vmatpush3.bf16.msra.mxu0 %v8373_v59 }
 0x214   : > { %6392 = vmatprep.subr.bf16.mxu1 %v7458_v50  ;;  %6408 = vmatprep.subr.bf16.mxu0 %v7458_v50 }
 0x216   : > { %v1947_v52 = vpop.permute.xlu0 %1946  ;;  %v8381_v31 = vpop.permute.xlu1 %1432 }
 0x217   : > { %2036 = vrot.lane.b32.xlu0 %v1947_v52, %s7455_s6  ;;  %6393 = vmatpush3.bf16.msra.mxu1 %v8381_v31  ;;  %v2812_v52 = vrot.slane %v2794_v33, 6 }
 0x218   : > { %6409 = vmatpush3.bf16.msra.mxu0 %v8381_v31  ;;  %6394 = vmatprep.subr.bf16.mxu1 %v7458_v50 }
 0x219   : > { %6410 = vmatprep.subr.bf16.mxu0 %v7458_v50 }
 0x21a   : > { %v8392_v41 = vpop.permute.xlu0 %1944  ;;  %v8394_v36 = vpop.permute.xlu1 %1430 }
 0x21b   : > { %2034 = vrot.lane.b32.xlu1 %v8392_v41, %s7455_s6  ;;  %6395 = vmatpush3.bf16.msra.mxu1 %v8394_v36 }
 0x21c   : > { %6411 = vmatpush3.bf16.msra.mxu0 %v8394_v36  ;;  %6396 = vmatprep.subr.bf16.mxu1 %v7458_v50 }
 0x21d   : > { %6412 = vmatprep.subr.bf16.mxu0 %v7458_v50 }
 0x21e   : > { %v1943_v5 = vpop.permute.xlu1 %1942 }
 0x21f   : > { %6397 = vmatpush3.bf16.msra.mxu1 %v8173_v54  ;;  %2032 = vrot.lane.b32.xlu0 %v1943_v5, %s7455_s6  ;;  %v2828_v5 = vrot.slane %v2803_v34, 5  ;;  %v7243_v34 = vld [vmem:[%s7546_s30 + $0x40] ss:$0 sps:$4 sm:$0x22]  }
 0x220   : > { %6413 = vmatpush3.bf16.msra.mxu0 %v8173_v54  ;;  %6418 = vmatprep.subr.bf16.mxu1 %v7458_v50  ;;  %v3094_v32 = vunpack.c.l.b16 %v7243_v34  ;;  %v7256_v34 = vld [vmem:[%s7546_s30 + $0x1c] ss:$0 sps:$4 sm:$0x44]  }
 0x221   : > { %6434 = vmatprep.subr.bf16.mxu0 %v7458_v50 }
 0x222   : > { %v1941_v35 = vpop.permute.xlu1 %1940  ;;  %6399 = vmatmul.mubr.msk.bf16.vlgmr.msra.gmra.mxu1 %vm524_vm8, %v8079_v0 }
 0x223   : > { %6419 = vmatpush3.bf16.msra.mxu1 %v8232_v2  ;;  %2544 = vrot.lane.b32.xlu0 %v8406_v38, %s7453_s4 }
 0x224   : > { %2030 = vrot.lane.b32.xlu1 %v1941_v35, %s7455_s6  ;;  %6420 = vmatprep.subr.bf16.mxu1 %v7458_v50 }
 0x225   : > { %6415 = vmatmul.mubr.msk.bf16.vlgmr.msra.gmra.mxu0 %vm524_vm8, %v8001_v45  ;;  %6430 = vmatprep.mubr.msk.bf16.mxu1 %vm7459_vm7, %v7458_v50  ;;  %v7225_v45 = vld [vmem:[%s7546_s30 + $0x28] ss:$0 sps:$4 sm:$0x22]  }
 0x226   : > { %v1939_v2 = vpop.permute.xlu1 %1938  ;;  %6446 = vmatprep.mubr.msk.bf16.mxu0 %vm7459_vm7, %v7458_v50  ;;  %v2793_v15 = vunpack.c.l.b16 %v7225_v45 }
 0x227   : > { %6421 = vmatpush3.bf16.msra.mxu1 %v8244_v13  ;;  %2542 = vrot.lane.b32.xlu0 %v8406_v38, %s7455_s6  ;;  %v2806_v13 = vrot.slane %v2790_v55, 2 }
 0x228   : > { %2028 = vrot.lane.b32.xlu1 %v1939_v2, %s7455_s6  ;;  %6422 = vmatprep.subr.bf16.mxu1 %v7458_v50  ;;  %v2810_v60 = vrot.slane %v2793_v15, 7  ;;  %v2830_v2 = vrot.slane %v2804_v9, 4 }
 0x229   : > { %v2808_v8 = vsel %vm305_vm0, %v2807_v7, %v2806_v13 }
 0x22a   : > { %v2809_v37 = vsel %vm308_vm1, %v2792_v28, %v2808_v8 }
 0x22b   : > { %6423 = vmatpush3.bf16.msra.mxu1 %v8260_v62  ;;  %v2800_v62 = vunpack.c.l.b16 %v7232_v18  ;;  %v2811_v46 = vsel %vm311_vm2, %v2810_v60, %v2809_v37  ;;  %v7242_v60 = vld [vmem:[%s7546_s30 + $0x34] ss:$0 sps:$4 sm:$0x22]   ;;  %v7249_v37 = vld [vmem:[%s7546_s30 + $0x88] ss:$0 sps:$4 sm:$0x22]  }
 0x22c   : > { %2540 = vrot.lane.b32.xlu1 %v8406_v38, %s7454_s5  ;;  %6424 = vmatprep.subr.bf16.mxu1 %v7458_v50  ;;  %v2813_v35 = vsel %vm314_vm3, %v2812_v52, %v2811_v46  ;;  %v7251_v52 = vld [vmem:[%s7546_s30 + $0xa0] ss:$0 sps:$4 sm:$0x22]   ;;  %v3093_v3 = vunpack.c.l.b16 %v7242_v60  ;;  %v3100_v9 = vunpack.c.l.b16 %v7249_v37  ;;  %v7254_v60 = vld [vmem:[%s7546_s30 + $0x4] ss:$0 sps:$4 sm:$0x44]  }
 0x22d   : > { %v8443_v16 = vpop.permute.xlu0 %1737  ;;  %v2823_v25 = vsel %vm308_vm1, %v2800_v62, %v2822_v21  ;;  %v2815_v55 = vsel %vm317_vm4, %v2814_v53, %v2813_v35  ;;  %v7244_v53 = vld [vmem:[%s7546_s30 + $0x4c] ss:$0 sps:$4 sm:$0x22]   ;;  %v8635_v37 = vld [vmem:[%s10211_s1 + $0x8] sm:$0xf] }
 0x22e   : > { %6435 = vmatpush3.bf16.msra.mxu0 %v8443_v16 }
 0x22f   : > { %6425 = vmatpush3.bf16.msra.mxu1 %v8268_v24  ;;  %6436 = vmatprep.subr.bf16.mxu0 %v7458_v50  ;;  %v2824_v24 = vrot.slane %v2801_v27, 7 }
 0x230   : > { %2538 = vrot.lane.b32.xlu1 %v8406_v38, %s7456_s7  ;;  %6426 = vmatprep.subr.bf16.mxu1 %v7458_v50 }
 0x231   : > { %v2825_v20 = vsel %vm311_vm2, %v2824_v24, %v2823_v25  ;;  %v7250_v24 = vld [vmem:[%s7546_s30 + $0x94] ss:$0 sps:$4 sm:$0x22]  }
 0x232   : > { %v8455_v61 = vpop.permute.xlu0 %1735  ;;  %v2827_v42 = vsel %vm314_vm3, %v2826_v44, %v2825_v20  ;;  %v3101_v46 = vunpack.c.l.b16 %v7250_v24  ;;  %v7255_v24 = vld [vmem:[%s7546_s30 + $0x10] ss:$0 sps:$4 sm:$0x44]  }
 0x233   : > { %6427 = vmatpush3.bf16.msra.mxu1 %v8277_v29  ;;  %6437 = vmatpush3.bf16.msra.mxu0 %v8455_v61  ;;  %v2829_v51 = vsel %vm317_vm4, %v2828_v5, %v2827_v42  ;;  %v7252_v5 = vld [vmem:[%s7546_s30 + $0xac] ss:$0 sps:$4 sm:$0x22]  }
 0x234   : > { %2536 = vrot.lane.b32.xlu1 %v8406_v38, %s7457_s8  ;;  %6428 = vmatprep.subr.bf16.mxu1 %v7458_v50  ;;  %v2831_v48 = vsel %vm320_vm5, %v2830_v2, %v2829_v51  ;;  %v7253_v51 = vld [vmem:[%s7546_s30 + $0xb8] ss:$0 sps:$4 sm:$0x22]  }
 0x235   : > { %6438 = vmatprep.subr.bf16.mxu0 %v7458_v50  ;;  %v8477_v38 = vpop.permute.xlu1 %1731 }
 0x236   : > { %v8471_v29 = vpop.permute.xlu0 %1733 }
 0x237   : > { %6429 = vmatpush3.bf16.msra.mxu1 %v8059_v40  ;;  %6439 = vmatpush3.bf16.msra.mxu0 %v8471_v29  ;;  %v2816_v40 = vrot.slane %v2796_v30, 4  ;;  %v3092_v30 = vunpack.c.l.b16 %v7241_v63 }
 0x238   : > { %6440 = vmatprep.subr.bf16.mxu0 %v7458_v50  ;;  %6450 = vmatprep.subr.bf16.mxu1 %v7458_v50 }
 0x239   : > { %v2817_v39 = vsel %vm320_vm5, %v2816_v40, %v2815_v55  ;;  %v3125_v40 = vrot.slane %v3101_v46, 7  ;;  %v7245_v55 = vld [vmem:[%s7546_s30 + $0x58] ss:$0 sps:$4 sm:$0x22]  }
 0x23a   : > { %v2246_v43 = vpop.permute.xlu0 %2245  ;;  %6431 = vmatmul.mubr.msk.bf16.vlgmr.msra.gmra.mxu1 %vm524_vm8, %v8070_v17  ;;  %v2832_v17 = vrot.slane %v2805_v23, 3  ;;  %v2819_v13 = vsel %vm323_vm6, %v2818_v49, %v2817_v39  ;;  %v3102_v23 = vunpack.c.l.b16 %v7251_v52  ;;  %v3095_v39 = vunpack.c.l.b16 %v7244_v53  ;;  %v7264_v52 = vld [vmem:[%s7546_s30 + $0x7c] ss:$0 sps:$4 sm:$0x44]  }
 0x23b   : > { %6451 = vmatpush3.bf16.msra.mxu1 %v8443_v16  ;;  %2335 = vrot.lane.b32.xlu0 %v2246_v43, %s7455_s6  ;;  %v3111_v43 = vrot.slane %v3093_v3, 7  ;;  %v3390_v53 = vunpack.c.l.b16 %v7256_v34 }
 0x23c   : > { %6441 = vmatpush3.bf16.msra.mxu0 %v8477_v38  ;;  %6452 = vmatprep.subr.bf16.mxu1 %v7458_v50  ;;  %v8489_v4 = vpop.permute.xlu1 %1729  ;;  %v2833_v7 = vsel %vm323_vm6, %v2832_v17, %v2831_v48  ;;  %v3103_v48 = vunpack.c.l.b16 %v7252_v5  ;;  %v3398_v5 = vunpack.c.l.b16 %v7264_v52 }
 0x23d   : > { %6442 = vmatprep.subr.bf16.mxu0 %v7458_v50  ;;  %6462 = vmatprep.mubr.msk.bf16.mxu1 %vm7459_vm7, %v7458_v50  ;;  %v2834_v22 = vpack.c.b16 %v2833_v7, %v2819_v13  ;;  %v3127_v13 = vrot.slane %v3102_v23, 6 }
 0x23e   : > { %v8494_v45 = vpop.permute.xlu0 %2243 }
 0x23f   : > { %6453 = vmatpush3.bf16.msra.mxu1 %v8455_v61  ;;  %2333 = vrot.lane.b32.xlu0 %v8494_v45, %s7455_s6 }
 0x240   : > { %6443 = vmatpush3.bf16.msra.mxu0 %v8489_v4  ;;  %6454 = vmatprep.subr.bf16.mxu1 %v7458_v50  ;;  %v2242_v18 = vpop.permute.xlu1 %2241 }
 0x241   : > { %6444 = vmatprep.subr.bf16.mxu0 %v7458_v50 }
 0x243   : > { %6455 = vmatpush3.bf16.msra.mxu1 %v8471_v29  ;;  %2331 = vrot.lane.b32.xlu0 %v2242_v18, %s7455_s6  ;;  %v2240_v6 = vpop.permute.xlu0 %2239  ;;  %v3113_v18 = vrot.slane %v3094_v32, 6 }
 0x244   : > { %6445 = vmatpush3.bf16.msra.mxu0 %v8283_v56  ;;  %6456 = vmatprep.subr.bf16.mxu1 %v7458_v50  ;;  %v2238_v11 = vpop.permute.xlu1 %2237 }
 0x245   : > { %6466 = vmatprep.subr.bf16.mxu0 %v7458_v50  ;;  %2329 = vrot.lane.b32.xlu1 %v2240_v6, %s7455_s6 }
 0x247   : > { %6447 = vmatmul.mubr.msk.bf16.vlgmr.msra.gmra.mxu0 %vm524_vm8, %v8079_v0  ;;  %6457 = vmatpush3.bf16.msra.mxu1 %v8477_v38  ;;  %v8537_v0 = vld [vmem:[%s10211_s1 + $0x4] sm:$0xf] }
 0x248   : > { %6467 = vmatpush3.bf16.msra.mxu0 %v8347_v19  ;;  %2843 = vrot.lane.b32.xlu0 %v2834_v22, %s7453_s4  ;;  %v8552_v19 = vld [vmem:[%s10211_s1] sm:$0xf] }
 0x249   : > { %6458 = vmatprep.subr.bf16.mxu1 %v7458_v50  ;;  %6468 = vmatprep.subr.bf16.mxu0 %v7458_v50 }
 0x24a   : > { %2327 = vrot.lane.b32.xlu1 %v2238_v11, %s7455_s6  ;;  %6478 = vmatprep.mubr.msk.bf16.mxu0 %vm7459_vm7, %v7458_v50  ;;  %v3096_v11 = vunpack.c.l.b16 %v7245_v55  ;;  %v3407_v55 = vrot.slane %v3390_v53, 2 }
 0x24b   : > { %6459 = vmatpush3.bf16.msra.mxu1 %v8489_v4 }
 0x24c   : > { %6469 = vmatpush3.bf16.msra.mxu0 %v8359_v14  ;;  %2841 = vrot.lane.b32.xlu0 %v2834_v22, %s7455_s6  ;;  %v7238_v14 = vld [vmem:[%s7546_s30 + $0x4] ss:$0 sps:$4 sm:$0x22]  }
 0x24d   : > { %6460 = vmatprep.subr.bf16.mxu1 %v7458_v50  ;;  %6470 = vmatprep.subr.bf16.mxu0 %v7458_v50  ;;  %v3089_v15 = vunpack.c.l.b16 %v7238_v14  ;;  %v3104_v14 = vunpack.c.l.b16 %v7253_v51  ;;  %v3421_v51 = vrot.slane %v3398_v5, 2 }
 0x24e   : > { %2839 = vrot.lane.b32.xlu1 %v2834_v22, %s7454_s5 }
 0x24f   : > { %6461 = vmatpush3.bf16.msra.mxu1 %v8283_v56  ;;  %v3105_v8 = vrot.slane %v3089_v15, 3 }
 0x250   : > { %6471 = vmatpush3.bf16.msra.mxu0 %v8373_v59  ;;  %2837 = vrot.lane.b32.xlu0 %v2834_v22, %s7456_s7  ;;  %v7239_v59 = vld [vmem:[%s7546_s30 + $0x10] ss:$0 sps:$4 sm:$0x22]  }
 0x251   : > { %6472 = vmatprep.subr.bf16.mxu0 %v7458_v50  ;;  %6482 = vmatprep.subr.bf16.mxu1 %v7458_v50  ;;  %v3090_v27 = vunpack.c.l.b16 %v7239_v59 }
 0x252   : > { %2835 = vrot.lane.b32.xlu1 %v2834_v22, %s7457_s8  ;;  %6463 = vmatmul.mubr.msk.bf16.vlgmr.msra.gmra.mxu1 %vm524_vm8, %v8537_v0 }
 0x253   : > { %6494 = vmatprep.mubr.msk.bf16.mxu1 %vm7459_vm7, %v7458_v50  ;;  %v3106_v21 = vrot.slane %v3090_v27, 2  ;;  %v3117_v27 = vrot.slane %v3096_v11, 4  ;;  %v7268_v11 = vld [vmem:[%s7546_s30 + $0xac] ss:$0 sps:$4 sm:$0x44]  }
 0x254   : > { %6473 = vmatpush3.bf16.msra.mxu0 %v8381_v31  ;;  %v7246_v31 = vld [vmem:[%s7546_s30 + $0x64] ss:$0 sps:$4 sm:$0x22]  }
 0x255   : > { %6474 = vmatprep.subr.bf16.mxu0 %v7458_v50  ;;  %v3097_v28 = vunpack.c.l.b16 %v7246_v31  ;;  %v3107_v44 = vsel %vm305_vm0, %v3106_v21, %v3105_v8  ;;  %v3115_v31 = vrot.slane %v3095_v39, 5 }
 0x257   : > { %v3119_v33 = vrot.slane %v3097_v28, 3  ;;  %v3131_v28 = vrot.slane %v3104_v14, 4 }
 0x258   : > { %6475 = vmatpush3.bf16.msra.mxu0 %v8394_v36  ;;  %v7247_v36 = vld [vmem:[%s7546_s30 + $0x70] ss:$0 sps:$4 sm:$0x22]  }
 0x259   : > { %6476 = vmatprep.subr.bf16.mxu0 %v7458_v50  ;;  %v3098_v62 = vunpack.c.l.b16 %v7247_v36  ;;  %v3129_v36 = vrot.slane %v3103_v48, 5  ;;  %v7258_v48 = vld [vmem:[%s7546_s30 + $0x34] ss:$0 sps:$4 sm:$0x44]  }
 0x25b   : > { %v3120_v26 = vrot.slane %v3098_v62, 2 }
 0x25c   : > { %6477 = vmatpush3.bf16.msra.mxu0 %v8173_v54  ;;  %v7240_v54 = vld [vmem:[%s7546_s30 + $0x1c] ss:$0 sps:$4 sm:$0x22]  }
 0x25d   : > { %6498 = vmatprep.subr.bf16.mxu0 %v7458_v50  ;;  %v3091_v10 = vunpack.c.l.b16 %v7240_v54  ;;  %v3121_v1 = vsel %vm305_vm0, %v3120_v26, %v3119_v33 }
 0x25e   : > { %v3123_v42 = vsel %vm308_vm1, %v3122_v58, %v3121_v1  ;;  %v7263_v58 = vld [vmem:[%s7546_s30 + $0x70] ss:$0 sps:$4 sm:$0x44]   ;;  %v3388_v1 = vunpack.c.l.b16 %v7254_v60 }
 0x25f   : > { %6479 = vmatmul.mubr.msk.bf16.vlgmr.msra.gmra.mxu0 %vm524_vm8, %v8552_v19  ;;  %v3108_v25 = vrot.slane %v3091_v10, 1  ;;  %v3124_v17 = vsel %vm311_vm2, %v3100_v9, %v3123_v42  ;;  %v3397_v46 = vunpack.c.l.b16 %v7263_v58  ;;  %v7265_v9 = vld [vmem:[%s7546_s30 + $0x88] ss:$0 sps:$4 sm:$0x44]  }
 0x260   : > { %6510 = vmatprep.mubr.msk.bf16.mxu0 %vm7459_vm7, %v7458_v50  ;;  %v3126_v6 = vsel %vm314_vm3, %v3125_v40, %v3124_v17  ;;  %v7267_v17 = vld [vmem:[%s7546_s30 + $0xa0] ss:$0 sps:$4 sm:$0x44]  }
 0x261   : > { %v3109_v35 = vsel %vm308_vm1, %v3108_v25, %v3107_v44  ;;  %v3128_v12 = vsel %vm317_vm4, %v3127_v13, %v3126_v6  ;;  %v7262_v25 = vld [vmem:[%s7546_s30 + $0x64] ss:$0 sps:$4 sm:$0x44]   ;;  %v3419_v23 = vrot.slane %v3397_v46, 3 }
 0x262   : > { %v3110_v49 = vsel %vm311_vm2, %v3092_v30, %v3109_v35  ;;  %v3130_v47 = vsel %vm320_vm5, %v3129_v36, %v3128_v12  ;;  %v3396_v3 = vunpack.c.l.b16 %v7262_v25  ;;  %v7257_v30 = vld [vmem:[%s7546_s30 + $0x28] ss:$0 sps:$4 sm:$0x44]   ;;  %v3404_v35 = vrot.slane %v3388_v1, 4 }
 0x263   : > { %v3112_v7 = vsel %vm314_vm3, %v3111_v43, %v3110_v49  ;;  %v3132_v21 = vsel %vm323_vm6, %v3131_v28, %v3130_v47  ;;  %v3399_v43 = vunpack.c.l.b16 %v7265_v9  ;;  %v7259_v49 = vld [vmem:[%s7546_s30 + $0x40] ss:$0 sps:$4 sm:$0x44]   ;;  %v3401_v36 = vunpack.c.l.b16 %v7267_v17  ;;  %v7269_v28 = vld [vmem:[%s7546_s30 + $0xb8] ss:$0 sps:$4 sm:$0x44]  }
 0x264   : > { %v3114_v54 = vsel %vm317_vm4, %v3113_v18, %v3112_v7  ;;  %v3418_v32 = vrot.slane %v3396_v3, 4  ;;  %v7266_v18 = vld [vmem:[%s7546_s30 + $0x94] ss:$0 sps:$4 sm:$0x44]   ;;  %v3403_v58 = vunpack.c.l.b16 %v7269_v28 }
 0x265   : > { %v3116_v10 = vsel %vm320_vm5, %v3115_v31, %v3114_v54  ;;  %v3423_v7 = vrot.slane %v3399_v43, 1  ;;  %v3393_v31 = vunpack.c.l.b16 %v7259_v49  ;;  %v3392_v54 = vunpack.c.l.b16 %v7258_v48  ;;  %v7280_v43 = vld [vmem:[%s7546_s30 + $0x7c] ss:$0 sps:$4 sm:$0x44]  }
 0x266   : > { %v3118_v8 = vsel %vm323_vm6, %v3117_v27, %v3116_v10  ;;  %v3420_v39 = vsel %vm305_vm0, %v3419_v23, %v3418_v32  ;;  %v3400_v12 = vunpack.c.l.b16 %v7266_v18  ;;  %v7261_v27 = vld [vmem:[%s7546_s30 + $0x58] ss:$0 sps:$4 sm:$0x44]   ;;  %v3430_v46 = vrot.slane %v3403_v58, 5 }
 0x267   : > { %v8627_v26 = vpack.c.b16 %v3132_v21, %v3118_v8  ;;  %v3395_v25 = vunpack.c.l.b16 %v7261_v27  ;;  %v7273_v17 = vld [vmem:[%s7546_s30 + $0x28] ss:$0 sps:$4 sm:$0x44]   ;;  %v3697_v48 = vunpack.c.l.b16 %v7280_v43  ;;  %v7275_v58 = vld [vmem:[%s7546_s30 + $0x40] ss:$0 sps:$4 sm:$0x44]  }
 0x269   : > { %v3416_v3 = vrot.slane %v3395_v25, 5 }
 0x289   : > { %v8566_v57 = vpop.permute.xlu0 %2036 }
 0x28a   : > { %6483 = vmatpush3.bf16.msra.mxu1 %v8566_v57  ;;  %6499 = vmatpush3.bf16.msra.mxu0 %v8566_v57 }
 0x28b   : > { %6484 = vmatprep.subr.bf16.mxu1 %v7458_v50  ;;  %6500 = vmatprep.subr.bf16.mxu0 %v7458_v50 }
 0x28d   : > { %v8578_v20 = vpop.permute.xlu1 %2034 }
 0x28e   : > { %6485 = vmatpush3.bf16.msra.mxu1 %v8578_v20  ;;  %6501 = vmatpush3.bf16.msra.mxu0 %v8578_v20 }
 0x28f   : > { %6486 = vmatprep.subr.bf16.mxu1 %v7458_v50  ;;  %6502 = vmatprep.subr.bf16.mxu0 %v7458_v50 }
 0x291   : > { %v8588_v2 = vpop.permute.xlu0 %2032 }
 0x292   : > { %6487 = vmatpush3.bf16.msra.mxu1 %v8588_v2  ;;  %6503 = vmatpush3.bf16.msra.mxu0 %v8588_v2 }
 0x293   : > { %6488 = vmatprep.subr.bf16.mxu1 %v7458_v50  ;;  %6504 = vmatprep.subr.bf16.mxu0 %v7458_v50 }
 0x295   : > { %v2545_v22 = vpop.permute.xlu0 %2544 }
 0x296   : > { %v8600_v59 = vpop.permute.xlu1 %2030  ;;  %2634 = vrot.lane.b32.xlu0 %v2545_v22, %s7455_s6  ;;  %v7260_v22 = vld [vmem:[%s7546_s30 + $0x4c] ss:$0 sps:$4 sm:$0x44]  }
 0x297   : > { %6489 = vmatpush3.bf16.msra.mxu1 %v8600_v59  ;;  %6505 = vmatpush3.bf16.msra.mxu0 %v8600_v59  ;;  %v3394_v21 = vunpack.c.l.b16 %v7260_v22 }
 0x298   : > { %6490 = vmatprep.subr.bf16.mxu1 %v7458_v50  ;;  %6506 = vmatprep.subr.bf16.mxu0 %v7458_v50 }
 0x299   : > { %v8609_v15 = vpop.permute.xlu0 %2542  ;;  %v3414_v34 = vrot.slane %v3394_v21, 6 }
 0x29a   : > { %v8611_v62 = vpop.permute.xlu1 %2028  ;;  %2632 = vrot.lane.b32.xlu1 %v8609_v15, %s7455_s6 }
 0x29b   : > { %6491 = vmatpush3.bf16.msra.mxu1 %v8611_v62  ;;  %6507 = vmatpush3.bf16.msra.mxu0 %v8611_v62 }
 0x29c   : > { %6492 = vmatprep.subr.bf16.mxu1 %v7458_v50  ;;  %6508 = vmatprep.subr.bf16.mxu0 %v7458_v50 }
 0x29e   : > { %v2541_v33 = vpop.permute.xlu1 %2540 }
 0x29f   : > { %6493 = vmatpush3.bf16.msra.mxu1 %v8392_v41  ;;  %6509 = vmatpush3.bf16.msra.mxu0 %v8392_v41 }
 0x2a0   : > { %2630 = vrot.lane.b32.xlu0 %v2541_v33, %s7455_s6  ;;  %6514 = vmatprep.subr.bf16.mxu1 %v7458_v50  ;;  %v3402_v33 = vunpack.c.l.b16 %v7268_v11  ;;  %v7274_v11 = vld [vmem:[%s7546_s30 + $0x34] ss:$0 sps:$4 sm:$0x44]  }
 0x2a1   : > { %6530 = vmatprep.subr.bf16.mxu0 %v7458_v50 }
 0x2a2   : > { %v2539_v63 = vpop.permute.xlu1 %2538  ;;  %6495 = vmatmul.mubr.msk.bf16.vlgmr.msra.gmra.mxu1 %vm524_vm8, %v8635_v37  ;;  %6511 = vmatmul.mubr.msk.bf16.vlgmr.msra.gmra.mxu0 %vm524_vm8, %v8537_v0  ;;  %v3428_v52 = vrot.slane %v3402_v33, 6 }
 0x2a3   : > { %6515 = vmatpush3.bf16.msra.mxu1 %v8443_v16  ;;  %2628 = vrot.lane.b32.xlu1 %v2539_v63, %s7455_s6  ;;  %v3389_v16 = vunpack.c.l.b16 %v7255_v24 }
 0x2a4   : > { %3142 = vrot.lane.b32.xlu0 %v8627_v26, %s7453_s4  ;;  %6516 = vmatprep.subr.bf16.mxu1 %v7458_v50 }
 0x2a5   : > { %6526 = vmatprep.mubr.msk.bf16.mxu1 %vm7459_vm7, %v7458_v50  ;;  %6542 = vmatprep.mubr.msk.bf16.mxu0 %vm7459_vm7, %v7458_v50  ;;  %v3405_v42 = vrot.slane %v3389_v16, 3 }
 0x2a6   : > { %v2537_v44 = vpop.permute.xlu1 %2536 }
 0x2a7   : > { %6517 = vmatpush3.bf16.msra.mxu1 %v8455_v61  ;;  %2626 = vrot.lane.b32.xlu1 %v2537_v44, %s7455_s6  ;;  %v3391_v61 = vunpack.c.l.b16 %v7257_v30 }
 0x2a8   : > { %3140 = vrot.lane.b32.xlu0 %v8627_v26, %s7455_s6  ;;  %6518 = vmatprep.subr.bf16.mxu1 %v7458_v50 }
 0x2a9   : > { %v3409_v13 = vrot.slane %v3391_v61, 1 }
 0x2ab   : > { %6519 = vmatpush3.bf16.msra.mxu1 %v8471_v29  ;;  %3138 = vrot.lane.b32.xlu1 %v8627_v26, %s7454_s5  ;;  %v3406_v29 = vsel %vm305_vm0, %v3405_v42, %v3404_v35 }
 0x2ac   : > { %6520 = vmatprep.subr.bf16.mxu1 %v7458_v50  ;;  %v3408_v14 = vsel %vm308_vm1, %v3407_v55, %v3406_v29  ;;  %v7281_v29 = vld [vmem:[%s7546_s30 + $0x88] ss:$0 sps:$4 sm:$0x44]  }
 0x2ad   : > { %v8665_v40 = vpop.permute.xlu0 %2335  ;;  %v3410_v10 = vsel %vm311_vm2, %v3409_v13, %v3408_v14  ;;  %v7282_v14 = vld [vmem:[%s7546_s30 + $0x94] ss:$0 sps:$4 sm:$0x44]  }
 0x2ae   : > { %6531 = vmatpush3.bf16.msra.mxu0 %v8665_v40  ;;  %v3411_v24 = vsel %vm314_vm3, %v3392_v54, %v3410_v10  ;;  %v3691_v10 = vunpack.c.l.b16 %v7274_v11  ;;  %v7287_v11 = vld [vmem:[%s7546_s30 + $0x10] ss:$0 sps:$4 sm:$0x88]  }
 0x2af   : > { %6521 = vmatpush3.bf16.msra.mxu1 %v8477_v38  ;;  %3136 = vrot.lane.b32.xlu1 %v8627_v26, %s7456_s7  ;;  %v3422_v38 = vsel %vm308_vm1, %v3421_v51, %v3420_v39 }
 0x2b0   : > { %6522 = vmatprep.subr.bf16.mxu1 %v7458_v50  ;;  %6532 = vmatprep.subr.bf16.mxu0 %v7458_v50  ;;  %v3424_v47 = vsel %vm311_vm2, %v3423_v7, %v3422_v38  ;;  %v3690_v38 = vunpack.c.l.b16 %v7273_v17 }
 0x2b1   : > { %v8679_v6 = vpop.permute.xlu0 %2333  ;;  %v3425_v63 = vsel %vm314_vm3, %v3400_v12, %v3424_v47  ;;  %v3720_v12 = vrot.slane %v3697_v48, 3  ;;  %v3699_v47 = vunpack.c.l.b16 %v7282_v14 }
 0x2b2   : > { %6533 = vmatpush3.bf16.msra.mxu0 %v8679_v6  ;;  %v3708_v21 = vrot.slane %v3690_v38, 2  ;;  %v7294_v38 = vld [vmem:[%s7546_s30 + $0x64] ss:$0 sps:$4 sm:$0x88]  }
 0x2b3   : > { %6523 = vmatpush3.bf16.msra.mxu1 %v8489_v4  ;;  %3134 = vrot.lane.b32.xlu1 %v8627_v26, %s7457_s8  ;;  %v3412_v4 = vrot.slane %v3393_v31, 7  ;;  %v3426_v26 = vrot.slane %v3401_v36, 7  ;;  %v3698_v31 = vunpack.c.l.b16 %v7281_v29 }
 0x2b4   : > { %6524 = vmatprep.subr.bf16.mxu1 %v7458_v50  ;;  %6534 = vmatprep.subr.bf16.mxu0 %v7458_v50 }
 0x2b5   : > { %v8695_v8 = vpop.permute.xlu0 %2331  ;;  %v3427_v1 = vsel %vm317_vm4, %v3426_v26, %v3425_v63  ;;  %v3722_v33 = vrot.slane %v3698_v31, 2  ;;  %v7276_v26 = vld [vmem:[%s7546_s30 + $0x4c] ss:$0 sps:$4 sm:$0x44]  }
 0x2b6   : > { %6535 = vmatpush3.bf16.msra.mxu0 %v8695_v8  ;;  %v3429_v9 = vsel %vm320_vm5, %v3428_v52, %v3427_v1  ;;  %v3710_v52 = vrot.slane %v3691_v10, 1  ;;  %v7285_v1 = vld [vmem:[%s7546_s30 + $0xb8] ss:$0 sps:$4 sm:$0x44]   ;;  %v3987_v10 = vunpack.c.l.b16 %v7287_v11 }
 0x2b7   : > { %6525 = vmatpush3.bf16.msra.mxu1 %v8283_v56  ;;  %6536 = vmatprep.subr.bf16.mxu0 %v7458_v50  ;;  %v8700_v60 = vpop.permute.xlu1 %2329  ;;  %v3413_v56 = vsel %vm317_vm4, %v3412_v4, %v3411_v24  ;;  %v3431_v42 = vsel %vm323_vm6, %v3430_v46, %v3429_v9  ;;  %v7284_v24 = vld [vmem:[%s7546_s30 + $0xac] ss:$0 sps:$4 sm:$0x44]   ;;  %v7295_v31 = vld [vmem:[%s7546_s30 + $0x70] ss:$0 sps:$4 sm:$0x88]  }
 0x2b8   : > { %6546 = vmatprep.subr.bf16.mxu1 %v7458_v50  ;;  %v3415_v30 = vsel %vm320_vm5, %v3414_v34, %v3413_v56  ;;  %v7283_v34 = vld [vmem:[%s7546_s30 + $0xa0] ss:$0 sps:$4 sm:$0x44]   ;;  %v7277_v56 = vld [vmem:[%s7546_s30 + $0x58] ss:$0 sps:$4 sm:$0x44]   ;;  %v3701_v9 = vunpack.c.l.b16 %v7284_v24 }
 0x2b9   : > { %v3417_v35 = vsel %vm323_vm6, %v3416_v3, %v3415_v30  ;;  %v3693_v30 = vunpack.c.l.b16 %v7276_v26  ;;  %v7289_v26 = vld [vmem:[%s7546_s30 + $0x28] ss:$0 sps:$4 sm:$0x88]  }
 0x2ba   : > { %v2844_v44 = vpop.permute.xlu0 %2843  ;;  %6527 = vmatmul.mubr.msk.bf16.vlgmr.msra.gmra.mxu1 %vm524_vm8, %v8552_v19  ;;  %6537 = vmatpush3.bf16.msra.mxu0 %v8700_v60  ;;  %v3432_v23 = vpack.c.b16 %v3431_v42, %v3417_v35  ;;  %v3700_v35 = vunpack.c.l.b16 %v7283_v34  ;;  %v7297_v24 = vld [vmem:[%s7546_s30 + $0x88] ss:$0 sps:$4 sm:$0x88]  }
 0x2bb   : > { %6547 = vmatpush3.bf16.msra.mxu1 %v8665_v40  ;;  %2933 = vrot.lane.b32.xlu0 %v2844_v44, %s7455_s6  ;;  %v3724_v44 = vrot.slane %v3699_v47, 1  ;;  %v3994_v47 = vunpack.c.l.b16 %v7294_v38 }
 0x2bc   : > { %6538 = vmatprep.subr.bf16.mxu0 %v7458_v50  ;;  %6548 = vmatprep.subr.bf16.mxu1 %v7458_v50  ;;  %v8714_v16 = vpop.permute.xlu1 %2327 }
 0x2bd   : > { %6558 = vmatprep.mubr.msk.bf16.mxu1 %vm7459_vm7, %v7458_v50 }
 0x2be   : > { %v8720_v53 = vpop.permute.xlu0 %2841  ;;  %6539 = vmatpush3.bf16.msra.mxu0 %v8714_v16 }
 0x2bf   : > { %6549 = vmatpush3.bf16.msra.mxu1 %v8679_v6  ;;  %2931 = vrot.lane.b32.xlu0 %v8720_v53, %s7455_s6 }
 0x2c0   : > { %6540 = vmatprep.subr.bf16.mxu0 %v7458_v50  ;;  %6550 = vmatprep.subr.bf16.mxu1 %v7458_v50  ;;  %v2840_v5 = vpop.permute.xlu1 %2839 }
 0x2c2   : > { %6541 = vmatpush3.bf16.msra.mxu0 %v8494_v45  ;;  %v2838_v32 = vpop.permute.xlu0 %2837 }
 0x2c3   : > { %6551 = vmatpush3.bf16.msra.mxu1 %v8695_v8  ;;  %2929 = vrot.lane.b32.xlu0 %v2840_v5, %s7455_s6  ;;  %v3692_v5 = vunpack.c.l.b16 %v7275_v58 }
 0x2c4   : > { %6552 = vmatprep.subr.bf16.mxu1 %v7458_v50  ;;  %6562 = vmatprep.subr.bf16.mxu0 %v7458_v50  ;;  %v2836_v61 = vpop.permute.xlu1 %2835 }
 0x2c5   : > { %2927 = vrot.lane.b32.xlu1 %v2838_v32, %s7455_s6  ;;  %6543 = vmatmul.mubr.msk.bf16.vlgmr.msra.gmra.mxu0 %vm524_vm8, %v8635_v37 }
 0x2c6   : > { %6563 = vmatpush3.bf16.msra.mxu0 %v8566_v57  ;;  %6574 = vmatprep.mubr.msk.bf16.mxu0 %vm7459_vm7, %v7458_v50  ;;  %v7270_v57 = vld [vmem:[%s7546_s30 + $0x4] ss:$0 sps:$4 sm:$0x44]  }
 0x2c7   : > { %6553 = vmatpush3.bf16.msra.mxu1 %v8700_v60  ;;  %3441 = vrot.lane.b32.xlu0 %v3432_v23, %s7453_s4  ;;  %v3687_v55 = vunpack.c.l.b16 %v7270_v57  ;;  %v3702_v57 = vunpack.c.l.b16 %v7285_v1 }
 0x2c8   : > { %6554 = vmatprep.subr.bf16.mxu1 %v7458_v50  ;;  %6564 = vmatprep.subr.bf16.mxu0 %v7458_v50 }
 0x2c9   : > { %2925 = vrot.lane.b32.xlu1 %v2836_v61, %s7455_s6  ;;  %v3703_v18 = vrot.slane %v3687_v55, 5  ;;  %v3694_v61 = vunpack.c.l.b16 %v7277_v56 }
 0x2ca   : > { %6565 = vmatpush3.bf16.msra.mxu0 %v8578_v20  ;;  %v7271_v20 = vld [vmem:[%s7546_s30 + $0x10] ss:$0 sps:$4 sm:$0x44]  }
 0x2cb   : > { %6555 = vmatpush3.bf16.msra.mxu1 %v8714_v16  ;;  %3439 = vrot.lane.b32.xlu0 %v3432_v23, %s7455_s6  ;;  %v3688_v51 = vunpack.c.l.b16 %v7271_v20  ;;  %v3713_v20 = vrot.slane %v3693_v30, 7  ;;  %v621_v30 = vpop.f32.mrf.mxu1 }
 0x2cc   : > { %6556 = vmatprep.subr.bf16.mxu1 %v7458_v50  ;;  %6566 = vmatprep.subr.bf16.mxu0 %v7458_v50 }
 0x2cd   : > { %3437 = vrot.lane.b32.xlu1 %v3432_v23, %s7454_s5  ;;  %v3704_v13 = vrot.slane %v3688_v51, 4  ;;  %v3715_v51 = vrot.slane %v3694_v61, 6  ;;  %v6240_v61 = vpop.f32.mrf.mxu1 }
 0x2ce   : > { %6567 = vmatpush3.bf16.msra.mxu0 %v8588_v2  ;;  %v7278_v2 = vld [vmem:[%s7546_s30 + $0x64] ss:$0 sps:$4 sm:$0x44]  }
 0x2cf   : > { %6557 = vmatpush3.bf16.msra.mxu1 %v8494_v45  ;;  %6568 = vmatprep.subr.bf16.mxu0 %v7458_v50  ;;  %v3695_v49 = vunpack.c.l.b16 %v7278_v2  ;;  %v3705_v27 = vsel %vm305_vm0, %v3704_v13, %v3703_v18  ;;  %v3727_v2 = vrot.slane %v3701_v9, 7  ;;  %v3997_v9 = vunpack.c.l.b16 %v7297_v24 }
 0x2d0   : > { %3435 = vrot.lane.b32.xlu0 %v3432_v23, %s7456_s7  ;;  %6578 = vmatprep.subr.bf16.mxu1 %v7458_v50 }
 0x2d1   : > { %3433 = vrot.lane.b32.xlu1 %v3432_v23, %s7457_s8  ;;  %v3717_v7 = vrot.slane %v3695_v49, 5  ;;  %v3729_v49 = vrot.slane %v3702_v57, 6 }
 0x2d2   : > { %6569 = vmatpush3.bf16.msra.mxu0 %v8600_v59  ;;  %6559 = vmatmul.mubr.msk.bf16.vlgmr.msra.gmra.mxu1 %vm524_vm8, %v8537_v0  ;;  %v7279_v59 = vld [vmem:[%s7546_s30 + $0x70] ss:$0 sps:$4 sm:$0x44]  }
 0x2d3   : > { %6570 = vmatprep.subr.bf16.mxu0 %v7458_v50  ;;  %6590 = vmatprep.mubr.msk.bf16.mxu1 %vm7459_vm7, %v7458_v50 }
 0x2d6   : > { %6571 = vmatpush3.bf16.msra.mxu0 %v8611_v62  ;;  %v7272_v62 = vld [vmem:[%s7546_s30 + $0x1c] ss:$0 sps:$4 sm:$0x44]  }
 0x2d7   : > { %6572 = vmatprep.subr.bf16.mxu0 %v7458_v50  ;;  %v3689_v39 = vunpack.c.l.b16 %v7272_v62 }
 0x2d9   : > { %v3706_v54 = vrot.slane %v3689_v39, 3 }
 0x2da   : > { %6573 = vmatpush3.bf16.msra.mxu0 %v8392_v41  ;;  %v3696_v41 = vunpack.c.l.b16 %v7279_v59 }
 0x2db   : > { %6594 = vmatprep.subr.bf16.mxu0 %v7458_v50  ;;  %v3707_v63 = vsel %vm308_vm1, %v3706_v54, %v3705_v27  ;;  %v562_v54 = vpop.f32.mrf.mxu0  ;;  %v7296_v27 = vld [vmem:[%s7546_s30 + $0x7c] ss:$0 sps:$4 sm:$0x88]  }
 0x2dc   : > { %v3718_v22 = vrot.slane %v3696_v41, 4  ;;  %v3709_v3 = vsel %vm311_vm2, %v3708_v21, %v3707_v63  ;;  %v3995_v21 = vunpack.c.l.b16 %v7295_v31  ;;  %v3996_v58 = vunpack.c.l.b16 %v7296_v27  ;;  %v7293_v27 = vld [vmem:[%s7546_s30 + $0x58] ss:$0 sps:$4 sm:$0x88]  }
 0x2dd   : > { %6575 = vmatmul.mubr.msk.bf16.vlgmr.msra.gmra.mxu0 %vm524_vm8, %v8552_v19  ;;  %v3711_v32 = vsel %vm314_vm3, %v3710_v52, %v3709_v3  ;;  %v4003_v52 = vrot.slane %v3987_v10, 5  ;;  %v7290_v3 = vld [vmem:[%s7546_s30 + $0x34] ss:$0 sps:$4 sm:$0x88]  }
 0x2de   : > { %6606 = vmatprep.mubr.msk.bf16.mxu0 %vm7459_vm7, %v7458_v50  ;;  %v3719_v28 = vsel %vm305_vm0, %v3718_v22, %v3717_v7  ;;  %v3712_v62 = vsel %vm317_vm4, %v3692_v5, %v3711_v32  ;;  %v7286_v22 = vld [vmem:[%s7546_s30 + $0x4] ss:$0 sps:$4 sm:$0x88]   ;;  %v4017_v56 = vrot.slane %v3995_v21, 5  ;;  %v622_v5 = vadd.f32 %v621_v30, %v562_v54 }
 0x2df   : > { %v3721_v25 = vsel %vm308_vm1, %v3720_v12, %v3719_v28  ;;  %v3714_v41 = vsel %vm320_vm5, %v3713_v20, %v3712_v62  ;;  %v7288_v12 = vld [vmem:[%s7546_s30 + $0x1c] ss:$0 sps:$4 sm:$0x88]   ;;  %v7291_v20 = vld [vmem:[%s7546_s30 + $0x40] ss:$0 sps:$4 sm:$0x88]  }
 0x2e0   : > { %v3723_v46 = vsel %vm311_vm2, %v3722_v33, %v3721_v25  ;;  %v3716_v48 = vsel %vm323_vm6, %v3715_v51, %v3714_v41  ;;  %v6224_v33 = vpop.f32.mrf.mxu0  ;;  %v3988_v25 = vunpack.c.l.b16 %v7288_v12  ;;  %v3990_v51 = vunpack.c.l.b16 %v7290_v3  ;;  %v624_v41 = vpop.f32.mrf.mxu1  ;;  %v7300_v21 = vld [vmem:[%s7546_s30 + $0xac] ss:$0 sps:$4 sm:$0x88]  }
 0x2e1   : > { %v3725_v23 = vsel %vm314_vm3, %v3724_v44, %v3723_v46  ;;  %v4016_v44 = vrot.slane %v3994_v47, 6  ;;  %v7298_v46 = vld [vmem:[%s7546_s30 + $0x94] ss:$0 sps:$4 sm:$0x88]  }
 0x2e2   : > { %v3726_v43 = vsel %vm317_vm4, %v3700_v35, %v3725_v23  ;;  %v565_v63 = vpop.f32.mrf.mxu0  ;;  %v4005_v32 = vrot.slane %v3988_v25, 4  ;;  %v4019_v23 = vrot.slane %v3996_v58, 4  ;;  %v6241_v11 = vpop.f32.mrf.mxu1  ;;  %v4009_v54 = vrot.slane %v3990_v51, 2  ;;  %v7292_v47 = vld [vmem:[%s7546_s30 + $0x4c] ss:$0 sps:$4 sm:$0x88]  }
 0x2e3   : > { %v3728_v17 = vsel %vm320_vm5, %v3727_v2, %v3726_v43  ;;  %v7299_v2 = vld [vmem:[%s7546_s30 + $0xa0] ss:$0 sps:$4 sm:$0x88]   ;;  %v3993_v25 = vunpack.c.l.b16 %v7293_v27 }
 0x2e4   : > { %v3730_v18 = vsel %vm323_vm6, %v3729_v49, %v3728_v17  ;;  %v6225_v1 = vpop.f32.mrf.mxu0  ;;  %v3998_v49 = vunpack.c.l.b16 %v7298_v46  ;;  %v3999_v38 = vunpack.c.l.b16 %v7299_v2 }
 0x2e5   : > { %v8838_v7 = vpack.c.b16 %v3730_v18, %v3716_v48  ;;  %v4021_v48 = vrot.slane %v3997_v9, 3  ;;  %v4014_v3 = vrot.slane %v3993_v25, 7 }
 0x2e6   : > { %v680_v35 = vpop.f32.mrf.mxu0  ;;  %v4023_v12 = vrot.slane %v3998_v49, 2  ;;  %v4025_v24 = vrot.slane %v3999_v38, 1 }
 0x2e7   : > { %v8882_v43 = vadd.f32 %v680_v35, %v622_v5 }
 0x308   : > { %v8782_v36 = vpop.permute.xlu0 %2634 }
 0x309   : > { %6579 = vmatpush3.bf16.msra.mxu1 %v8782_v36  ;;  %6595 = vmatpush3.bf16.msra.mxu0 %v8782_v36 }
 0x30a   : > { %6580 = vmatprep.subr.bf16.mxu1 %v7458_v50  ;;  %6596 = vmatprep.subr.bf16.mxu0 %v7458_v50 }
 0x30c   : > { %v8790_v4 = vpop.permute.xlu1 %2632 }
 0x30d   : > { %6581 = vmatpush3.bf16.msra.mxu1 %v8790_v4  ;;  %6597 = vmatpush3.bf16.msra.mxu0 %v8790_v4 }
 0x30e   : > { %6582 = vmatprep.subr.bf16.mxu1 %v7458_v50  ;;  %6598 = vmatprep.subr.bf16.mxu0 %v7458_v50 }
 0x312   : > { %v8806_v42 = vpop.permute.xlu0 %2630 }
 0x313   : > { %6583 = vmatpush3.bf16.msra.mxu1 %v8806_v42  ;;  %6599 = vmatpush3.bf16.msra.mxu0 %v8806_v42 }
 0x314   : > { %6584 = vmatprep.subr.bf16.mxu1 %v7458_v50  ;;  %6600 = vmatprep.subr.bf16.mxu0 %v7458_v50 }
 0x315   : > { %v8814_v59 = vpop.permute.xlu1 %2628 }
 0x316   : > { %v3143_v55 = vpop.permute.xlu0 %3142 }
 0x317   : > { %3232 = vrot.lane.b32.xlu0 %v3143_v55, %s7455_s6  ;;  %6585 = vmatpush3.bf16.msra.mxu1 %v8814_v59  ;;  %v6256_v55 = vpop.f32.mrf.mxu0 }
 0x318   : > { %6601 = vmatpush3.bf16.msra.mxu0 %v8814_v59  ;;  %6586 = vmatprep.subr.bf16.mxu1 %v7458_v50 }
 0x319   : > { %6602 = vmatprep.subr.bf16.mxu0 %v7458_v50  ;;  %v8825_v29 = vpop.permute.xlu1 %2626  ;;  %v683_v18 = vpop.f32.mrf.mxu0 }
 0x31a   : > { %v8827_v39 = vpop.permute.xlu0 %3140 }
 0x31b   : > { %3230 = vrot.lane.b32.xlu1 %v8827_v39, %s7455_s6  ;;  %6587 = vmatpush3.bf16.msra.mxu1 %v8825_v29  ;;  %v6257_v31 = vpop.f32.mrf.mxu0 }
 0x31c   : > { %6603 = vmatpush3.bf16.msra.mxu0 %v8825_v29  ;;  %6588 = vmatprep.subr.bf16.mxu1 %v7458_v50 }
 0x31d   : > { %6604 = vmatprep.subr.bf16.mxu0 %v7458_v50  ;;  %v3139_v13 = vpop.permute.xlu1 %3138 }
 0x31e   : > { %3228 = vrot.lane.b32.xlu0 %v3139_v13, %s7455_s6 }
 0x31f   : > { %6589 = vmatpush3.bf16.msra.mxu1 %v8609_v15 }
 0x320   : > { %6605 = vmatpush3.bf16.msra.mxu0 %v8609_v15  ;;  %6610 = vmatprep.subr.bf16.mxu1 %v7458_v50 }
 0x321   : > { %v3137_v14 = vpop.permute.xlu1 %3136  ;;  %6626 = vmatprep.subr.bf16.mxu0 %v7458_v50 }
 0x322   : > { %6591 = vmatmul.mubr.msk.bf16.vlgmr.msra.gmra.mxu1 %vm524_vm8, %v8635_v37  ;;  %3740 = vrot.lane.b32.xlu0 %v8838_v7, %s7453_s4 }
 0x323   : > { %6611 = vmatpush3.bf16.msra.mxu1 %v8665_v40  ;;  %3226 = vrot.lane.b32.xlu1 %v3137_v14, %s7455_s6  ;;  %v3986_v40 = vunpack.c.l.b16 %v7286_v22 }
 0x324   : > { %6612 = vmatprep.subr.bf16.mxu1 %v7458_v50  ;;  %6607 = vmatmul.mubr.msk.bf16.vlgmr.msra.gmra.mxu0 %vm524_vm8, %v8537_v0 }
 0x325   : > { %v3135_v28 = vpop.permute.xlu1 %3134  ;;  %6622 = vmatprep.mubr.msk.bf16.mxu1 %vm7459_vm7, %v7458_v50  ;;  %6638 = vmatprep.mubr.msk.bf16.mxu0 %vm7459_vm7, %v7458_v50  ;;  %v4002_v34 = vrot.slane %v3986_v40, 6 }
 0x326   : > { %3738 = vrot.lane.b32.xlu0 %v8838_v7, %s7455_s6 }
 0x327   : > { %6613 = vmatpush3.bf16.msra.mxu1 %v8679_v6  ;;  %3224 = vrot.lane.b32.xlu1 %v3135_v28, %s7455_s6  ;;  %v3989_v6 = vunpack.c.l.b16 %v7289_v26  ;;  %v4004_v62 = vsel %vm305_vm0, %v4003_v52, %v4002_v34  ;;  %v7301_v28 = vld [vmem:[%s7546_s30 + $0xb8] ss:$0 sps:$4 sm:$0x88]   ;;  %v3992_v34 = vunpack.c.l.b16 %v7292_v47  ;;  %v4000_v52 = vunpack.c.l.b16 %v7300_v21  ;;  %v7310_v47 = vld [vmem:[%s7546_s30 + $0x64] ss:$0 sps:$4 sm:$0x88]  }
 0x328   : > { %6614 = vmatprep.subr.bf16.mxu1 %v7458_v50  ;;  %v4006_v13 = vsel %vm308_vm1, %v4005_v32, %v4004_v62  ;;  %v4001_v58 = vunpack.c.l.b16 %v7301_v28  ;;  %v7311_v21 = vld [vmem:[%s7546_s30 + $0x70] ss:$0 sps:$4 sm:$0x88]   ;;  %v4293_v25 = vunpack.c.l.b16 %v7310_v47  ;;  %v7317_v47 = vld [vmem:[%s7546_s30 + $0xb8] ss:$0 sps:$4 sm:$0x88]  }
 0x329   : > { %v4007_v17 = vrot.slane %v3989_v6, 3 }
 0x32a   : > { %v4028_v46 = vrot.slane %v4001_v58, 7  ;;  %v4294_v58 = vunpack.c.l.b16 %v7311_v21 }
 0x32b   : > { %6615 = vmatpush3.bf16.msra.mxu1 %v8695_v8  ;;  %3736 = vrot.lane.b32.xlu1 %v8838_v7, %s7454_s5  ;;  %v4018_v8 = vsel %vm305_vm0, %v4017_v56, %v4016_v44  ;;  %v4008_v40 = vsel %vm311_vm2, %v4007_v17, %v4006_v13  ;;  %v8984_v17 = vld [vmem:[%s10211_s1] sm:$0xf] }
 0x32c   : > { %6616 = vmatprep.subr.bf16.mxu1 %v7458_v50  ;;  %v4020_v22 = vsel %vm308_vm1, %v4019_v23, %v4018_v8 }
 0x32d   : > { %v8876_v57 = vpop.permute.xlu0 %2933  ;;  %v4022_v10 = vsel %vm311_vm2, %v4021_v48, %v4020_v22 }
 0x32e   : > { %6627 = vmatpush3.bf16.msra.mxu0 %v8876_v57 }
 0x32f   : > { %6617 = vmatpush3.bf16.msra.mxu1 %v8700_v60  ;;  %3734 = vrot.lane.b32.xlu1 %v8838_v7, %s7456_s7  ;;  %v3991_v60 = vunpack.c.l.b16 %v7291_v20 }
 0x330   : > { %6618 = vmatprep.subr.bf16.mxu1 %v7458_v50  ;;  %6628 = vmatprep.subr.bf16.mxu0 %v7458_v50 }
 0x331   : > { %v8892_v14 = vpop.permute.xlu0 %2931  ;;  %v4011_v26 = vrot.slane %v3991_v60, 1 }
 0x332   : > { %6629 = vmatpush3.bf16.msra.mxu0 %v8892_v14 }
 0x333   : > { %6619 = vmatpush3.bf16.msra.mxu1 %v8714_v16  ;;  %3732 = vrot.lane.b32.xlu1 %v8838_v7, %s7457_s8  ;;  %v4010_v16 = vsel %vm314_vm3, %v4009_v54, %v4008_v40  ;;  %v4024_v7 = vsel %vm314_vm3, %v4023_v12, %v4022_v10  ;;  %v7302_v40 = vld [vmem:[%s7546_s30 + $0x4] ss:$0 sps:$4 sm:$0x88]   ;;  %v7303_v10 = vld [vmem:[%s7546_s30 + $0x10] ss:$0 sps:$4 sm:$0x88]  }
 0x334   : > { %6620 = vmatprep.subr.bf16.mxu1 %v7458_v50  ;;  %6630 = vmatprep.subr.bf16.mxu0 %v7458_v50  ;;  %v4012_v56 = vsel %vm317_vm4, %v4011_v26, %v4010_v16  ;;  %v4026_v1 = vsel %vm317_vm4, %v4025_v24, %v4024_v7  ;;  %v7304_v26 = vld [vmem:[%s7546_s30 + $0x1c] ss:$0 sps:$4 sm:$0x88]   ;;  %v4285_v16 = vunpack.c.l.b16 %v7302_v40  ;;  %v4286_v7 = vunpack.c.l.b16 %v7303_v10  ;;  %v7309_v10 = vld [vmem:[%s7546_s30 + $0x58] ss:$0 sps:$4 sm:$0x88]  }
 0x335   : > { %v8906_v33 = vpop.permute.xlu0 %2929  ;;  %v4013_v30 = vsel %vm320_vm5, %v3992_v34, %v4012_v56  ;;  %v4027_v6 = vsel %vm320_vm5, %v4000_v52, %v4026_v1  ;;  %v7312_v24 = vld [vmem:[%s7546_s30 + $0x7c] ss:$0 sps:$4 sm:$0x88]   ;;  %v7305_v34 = vld [vmem:[%s7546_s30 + $0x28] ss:$0 sps:$4 sm:$0x88]  }
 0x336   : > { %6631 = vmatpush3.bf16.msra.mxu0 %v8906_v33  ;;  %v4015_v5 = vsel %vm323_vm6, %v4014_v3, %v4013_v30  ;;  %v4029_v35 = vsel %vm323_vm6, %v4028_v46, %v4027_v6  ;;  %v7313_v52 = vld [vmem:[%s7546_s30 + $0x88] ss:$0 sps:$4 sm:$0x88]   ;;  %v4295_v56 = vunpack.c.l.b16 %v7312_v24  ;;  %v4301_v1 = vrot.slane %v4285_v16, 7 }
 0x337   : > { %6621 = vmatpush3.bf16.msra.mxu1 %v8494_v45  ;;  %6632 = vmatprep.subr.bf16.mxu0 %v7458_v50  ;;  %v8913_v63 = vpop.permute.xlu1 %2927  ;;  %v4030_v23 = vpack.c.b16 %v4029_v35, %v4015_v5  ;;  %v4302_v3 = vrot.slane %v4286_v7, 6  ;;  %v4315_v46 = vrot.slane %v4293_v25, 7  ;;  %v4316_v30 = vrot.slane %v4294_v58, 6  ;;  %v7306_v6 = vld [vmem:[%s7546_s30 + $0x34] ss:$0 sps:$4 sm:$0x88]  }
 0x338   : > { %6642 = vmatprep.subr.bf16.mxu1 %v7458_v50  ;;  %v4288_v5 = vunpack.c.l.b16 %v7305_v34  ;;  %v4296_v35 = vunpack.c.l.b16 %v7313_v52  ;;  %v4292_v58 = vunpack.c.l.b16 %v7309_v10  ;;  %v4300_v34 = vunpack.c.l.b16 %v7317_v47  ;;  %v7322_v47 = vld [vmem:[%s7546_s30 + $0x38] ss:$0 sps:$4 sm:$0x11]  }
 0x339   : > { %v3442_v44 = vpop.permute.xlu0 %3441 }
 0x33a   : > { %6623 = vmatmul.mubr.msk.bf16.vlgmr.msra.gmra.mxu1 %vm524_vm8, %v8552_v19  ;;  %3531 = vrot.lane.b32.xlu0 %v3442_v44, %s7455_s6  ;;  %v4287_v44 = vunpack.c.l.b16 %v7304_v26 }
 0x33b   : > { %6643 = vmatpush3.bf16.msra.mxu1 %v8876_v57  ;;  %6633 = vmatpush3.bf16.msra.mxu0 %v8913_v63  ;;  %v8923_v45 = vpop.permute.xlu1 %2925 }
 0x33c   : > { %6634 = vmatprep.subr.bf16.mxu0 %v7458_v50  ;;  %6644 = vmatprep.subr.bf16.mxu1 %v7458_v50 }
 0x33d   : > { %v8929_v9 = vpop.permute.xlu0 %3439  ;;  %6654 = vmatprep.mubr.msk.bf16.mxu1 %vm7459_vm7, %v7458_v50 }
 0x33e   : > { %3529 = vrot.lane.b32.xlu0 %v8929_v9, %s7455_s6 }
 0x33f   : > { %6645 = vmatpush3.bf16.msra.mxu1 %v8892_v14  ;;  %6635 = vmatpush3.bf16.msra.mxu0 %v8923_v45  ;;  %v3438_v19 = vpop.permute.xlu1 %3437 }
 0x340   : > { %6636 = vmatprep.subr.bf16.mxu0 %v7458_v50  ;;  %6646 = vmatprep.subr.bf16.mxu1 %v7458_v50 }
 0x342   : > { %3527 = vrot.lane.b32.xlu0 %v3438_v19, %s7455_s6  ;;  %v3436_v32 = vpop.permute.xlu0 %3435  ;;  %v7314_v19 = vld [vmem:[%s7546_s30 + $0x94] ss:$0 sps:$4 sm:$0x88]  }
 0x343   : > { %6637 = vmatpush3.bf16.msra.mxu0 %v8720_v53  ;;  %6647 = vmatpush3.bf16.msra.mxu1 %v8906_v33  ;;  %v3434_v61 = vpop.permute.xlu1 %3433 }
 0x344   : > { %6648 = vmatprep.subr.bf16.mxu1 %v7458_v50  ;;  %6658 = vmatprep.subr.bf16.mxu0 %v7458_v50 }
 0x345   : > { %3525 = vrot.lane.b32.xlu1 %v3436_v32, %s7455_s6 }
 0x346   : > { %6639 = vmatmul.mubr.msk.bf16.vlgmr.msra.gmra.mxu0 %vm524_vm8, %v8635_v37  ;;  %4039 = vrot.lane.b32.xlu0 %v4030_v23, %s7453_s4  ;;  %v776_v37 = vpop.f32.mrf.mxu1 }
 0x347   : > { %6649 = vmatpush3.bf16.msra.mxu1 %v8913_v63  ;;  %6659 = vmatpush3.bf16.msra.mxu0 %v8782_v36  ;;  %v816_v36 = vpop.f32.mrf.mxu0 }
 0x348   : > { %6650 = vmatprep.subr.bf16.mxu1 %v7458_v50  ;;  %6660 = vmatprep.subr.bf16.mxu0 %v7458_v50 }
 0x349   : > { %3523 = vrot.lane.b32.xlu1 %v3434_v61, %s7455_s6  ;;  %6670 = vmatprep.mubr.msk.bf16.mxu0 %vm7459_vm7, %v7458_v50  ;;  %v6288_v20 = vpop.f32.mrf.mxu0  ;;  %v4318_v61 = vrot.slane %v4295_v56, 5 }
 0x34a   : > { %4037 = vrot.lane.b32.xlu0 %v4030_v23, %s7455_s6  ;;  %v4289_v20 = vunpack.c.l.b16 %v7306_v6 }
 0x34b   : > { %6651 = vmatpush3.bf16.msra.mxu1 %v8923_v45  ;;  %6661 = vmatpush3.bf16.msra.mxu0 %v8790_v4  ;;  %v817_v4 = vadd.f32 %v816_v36, %v776_v37  ;;  %v819_v62 = vpop.f32.mrf.mxu0  ;;  %v7307_v37 = vld [vmem:[%s7546_s30 + $0x40] ss:$0 sps:$4 sm:$0x88]  }
 0x34c   : > { %6652 = vmatprep.subr.bf16.mxu1 %v7458_v50  ;;  %6662 = vmatprep.subr.bf16.mxu0 %v7458_v50  ;;  %v7315_v36 = vld [vmem:[%s7546_s30 + $0xa0] ss:$0 sps:$4 sm:$0x88]   ;;  %v4306_v62 = vrot.slane %v4288_v5, 4 }
 0x34d   : > { %4035 = vrot.lane.b32.xlu1 %v4030_v23, %s7454_s5 }
 0x34e   : > { %4033 = vrot.lane.b32.xlu0 %v4030_v23, %s7456_s7 }
 0x34f   : > { %6653 = vmatpush3.bf16.msra.mxu1 %v8720_v53  ;;  %6663 = vmatpush3.bf16.msra.mxu0 %v8806_v42  ;;  %v6272_v42 = vpop.f32.mrf.mxu1 }
 0x350   : > { %6664 = vmatprep.subr.bf16.mxu0 %v7458_v50  ;;  %6674 = vmatprep.subr.bf16.mxu1 %v7458_v50  ;;  %v4317_v42 = vsel %vm305_vm0, %v4316_v30, %v4315_v46 }
 0x351   : > { %4031 = vrot.lane.b32.xlu1 %v4030_v23, %s7457_s8  ;;  %v779_v2 = vpop.f32.mrf.mxu1  ;;  %v4304_v23 = vrot.slane %v4287_v44, 5 }
 0x352   : > { %6655 = vmatmul.mubr.msk.bf16.vlgmr.msra.gmra.mxu1 %vm524_vm8, %v8537_v0  ;;  %v6289_v0 = vpop.f32.mrf.mxu0  ;;  %v4297_v2 = vunpack.c.l.b16 %v7314_v19 }
 0x353   : > { %6665 = vmatpush3.bf16.msra.mxu0 %v8814_v59  ;;  %6686 = vmatprep.mubr.msk.bf16.mxu1 %vm7459_vm7, %v7458_v50  ;;  %v6273_v8 = vpop.f32.mrf.mxu1 }
 0x354   : > { %6666 = vmatprep.subr.bf16.mxu0 %v7458_v50  ;;  %v1085_v51 = vpop.f32.mrf.mxu0  ;;  %v4320_v8 = vrot.slane %v4296_v35, 4 }
 0x355   : > { %v872_v55 = vpop.f32.mrf.mxu1 }
 0x356   : > { %v8978_v59 = vadd.f32 %v872_v55, %v817_v4  ;;  %v6320_v41 = vpop.f32.mrf.mxu0  ;;  %v4303_v4 = vsel %vm305_vm0, %v4302_v3, %v4301_v1  ;;  %v7308_v55 = vld [vmem:[%s7546_s30 + $0x4c] ss:$0 sps:$4 sm:$0x88]  }
 0x357   : > { %6667 = vmatpush3.bf16.msra.mxu0 %v8825_v29  ;;  %v6304_v49 = vpop.f32.mrf.mxu1  ;;  %v4319_v41 = vsel %vm308_vm1, %v4318_v61, %v4317_v42 }
 0x358   : > { %6668 = vmatprep.subr.bf16.mxu0 %v7458_v50  ;;  %v1088_v48 = vpop.f32.mrf.mxu0  ;;  %v4305_v49 = vsel %vm308_vm1, %v4304_v23, %v4303_v4 }
 0x359   : > { %v875_v29 = vpop.f32.mrf.mxu1  ;;  %v4298_v48 = vunpack.c.l.b16 %v7315_v36  ;;  %v7327_v36 = vld [vmem:[%s7546_s30 + $0x74] ss:$0 sps:$4 sm:$0x11]  }
 0x35a   : > { %v6321_v18 = vpop.f32.mrf.mxu0  ;;  %v4290_v29 = vunpack.c.l.b16 %v7307_v37  ;;  %v7319_v37 = vld [vmem:[%s7546_s30 + $0x14] ss:$0 sps:$4 sm:$0x11]  }
 0x35b   : > { %6669 = vmatpush3.bf16.msra.mxu0 %v8609_v15  ;;  %v6305_v15 = vpop.f32.mrf.mxu1  ;;  %v4322_v18 = vrot.slane %v4297_v2, 3  ;;  %v9076_v2 = vld [vmem:[%s10211_s1 + $0x4] sm:$0xf] }
 0x35c   : > { %6690 = vmatprep.subr.bf16.mxu0 %v7458_v50  ;;  %v1181_v22 = vpop.f32.mrf.mxu0  ;;  %v4308_v15 = vrot.slane %v4289_v20, 3  ;;  %v9069_v20 = vld [vmem:[%s10211_s1 + $0x8] sm:$0xf] }
 0x35d   : > { %v1125_v13 = vpop.f32.mrf.mxu1 }
 0x35e   : > { %6671 = vmatmul.mubr.msk.bf16.vlgmr.msra.gmra.mxu0 %vm524_vm8, %v8984_v17  ;;  %v1126_v11 = vadd.f32 %v1125_v13, %v1085_v51  ;;  %v6352_v38 = vpop.f32.mrf.mxu0  ;;  %v7316_v51 = vld [vmem:[%s7546_s30 + $0xac] ss:$0 sps:$4 sm:$0x88]  }
 0x35f   : > { %6702 = vmatprep.mubr.msk.bf16.mxu0 %vm7459_vm7, %v7458_v50  ;;  %v6336_v60 = vpop.f32.mrf.mxu1  ;;  %v4299_v38 = vunpack.c.l.b16 %v7316_v51  ;;  %v7328_v51 = vld [vmem:[%s7546_s30 + $0x80] ss:$0 sps:$4 sm:$0x11]  }
 0x360   : > { %v8990_v31 = vadd.f32 %v1181_v22, %v1126_v11  ;;  %v1184_v12 = vpop.f32.mrf.mxu0  ;;  %v4307_v22 = vsel %vm311_vm2, %v4306_v62, %v4305_v49  ;;  %v4321_v11 = vsel %vm311_vm2, %v4320_v8, %v4319_v41  ;;  %v4291_v60 = vunpack.c.l.b16 %v7308_v55  ;;  %v7320_v55 = vld [vmem:[%s7546_s30 + $0x20] ss:$0 sps:$4 sm:$0x11]   ;;  %v7326_v41 = vld [vmem:[%s7546_s30 + $0x68] ss:$0 sps:$4 sm:$0x11]  }
 0x361   : > { %v1128_v54 = vpop.f32.mrf.mxu1  ;;  %v4324_v12 = vrot.slane %v4298_v48, 2  ;;  %v4326_v24 = vrot.slane %v4299_v38, 1  ;;  %v4593_v48 = vunpack.c.l.b16 %v7327_v36  ;;  %v4586_v38 = vunpack.c.l.b16 %v7320_v55 }
 0x362   : > { %v6353_v28 = vpop.f32.mrf.mxu0  ;;  %v4310_v54 = vrot.slane %v4290_v29, 2  ;;  %v4312_v26 = vrot.slane %v4291_v60, 1  ;;  %v4585_v29 = vunpack.c.l.b16 %v7319_v37  ;;  %v7329_v60 = vld [vmem:[%s7546_s30 + $0x8c] ss:$0 sps:$4 sm:$0x11]  }
 0x363   : > { %v6337_v27 = vpop.f32.mrf.mxu1  ;;  %v4323_v28 = vsel %vm314_vm3, %v4322_v18, %v4321_v11  ;;  %v7321_v11 = vld [vmem:[%s7546_s30 + $0x2c] ss:$0 sps:$4 sm:$0x11]   ;;  %v4614_v10 = vrot.slane %v4593_v48, 7 }
 0x364   : > { %v4309_v27 = vsel %vm314_vm3, %v4308_v15, %v4307_v22  ;;  %v4325_v7 = vsel %vm317_vm4, %v4324_v12, %v4323_v28  ;;  %v1424_v30 = vpop.f32.mrf.mxu0  ;;  %v4592_v28 = vunpack.c.l.b16 %v7326_v41 }
 0x365   : > { %v4311_v16 = vsel %vm317_vm4, %v4310_v54, %v4309_v27  ;;  %v4327_v56 = vsel %vm320_vm5, %v4326_v24, %v4325_v7  ;;  %v1384_v1 = vpop.f32.mrf.mxu1  ;;  %v4594_v54 = vunpack.c.l.b16 %v7328_v51  ;;  %v4587_v24 = vunpack.c.l.b16 %v7321_v11 }
 0x366   : > { %v4313_v44 = vsel %vm320_vm5, %v4312_v26, %v4311_v16  ;;  %v4328_v46 = vsel %vm323_vm6, %v4300_v34, %v4327_v56  ;;  %v1425_v5 = vadd.f32 %v1424_v30, %v1384_v1  ;;  %v6384_v35 = vpop.f32.mrf.mxu0  ;;  %v4595_v16 = vunpack.c.l.b16 %v7329_v60  ;;  %v7331_v56 = vld [vmem:[%s7546_s30 + $0xa4] ss:$0 sps:$4 sm:$0x11]  }
 0x367   : > { %v4314_v3 = vsel %vm323_vm6, %v4292_v58, %v4313_v44  ;;  %v6368_v19 = vpop.f32.mrf.mxu1  ;;  %v4602_v7 = vrot.slane %v4586_v38, 6  ;;  %v4616_v58 = vrot.slane %v4594_v54, 6  ;;  %v7323_v44 = vld [vmem:[%s7546_s30 + $0x44] ss:$0 sps:$4 sm:$0x11]   ;;  %v4604_v30 = vrot.slane %v4587_v24, 5 }
 0x368   : > { %v9061_v23 = vpack.c.b16 %v4328_v46, %v4314_v3  ;;  %v1427_v4 = vpop.f32.mrf.mxu0  ;;  %v4615_v3 = vsel %vm305_vm0, %v4614_v10, %v4592_v28  ;;  %v7324_v19 = vld [vmem:[%s7546_s30 + $0x50] ss:$0 sps:$4 sm:$0x11]   ;;  %v4597_v36 = vunpack.c.l.b16 %v7331_v56 }
 0x369   : > { %v1387_v61 = vpop.f32.mrf.mxu1 }
 0x36a   : > { %v6385_v8 = vpop.f32.mrf.mxu0  ;;  %v4617_v61 = vsel %vm308_vm1, %v4616_v58, %v4615_v3 }
 0x36b   : > { %v6369_v62 = vpop.f32.mrf.mxu1  ;;  %v7333_v8 = vld [vmem:[%s7546_s30 + $0xbc] ss:$0 sps:$4 sm:$0x11]  }
 0x36c   : > { %v7325_v62 = vld [vmem:[%s7546_s30 + $0x5c] ss:$0 sps:$4 sm:$0x11]   ;;  %v1683_v41 = vpop.f32.mrf.mxu0  ;;  %v4599_v60 = vunpack.c.l.b16 %v7333_v8 }
 0x36d   : > { %v1480_v49 = vpop.f32.mrf.mxu1  ;;  %v4591_v11 = vunpack.c.l.b16 %v7325_v62 }
 0x36e   : > { %v9093_v15 = vadd.f32 %v1480_v49, %v1425_v5  ;;  %v7332_v5 = vld [vmem:[%s7546_s30 + $0xb0] ss:$0 sps:$4 sm:$0x11]   ;;  %v4590_v49 = vunpack.c.l.b16 %v7324_v19 }
 0x36f   : > { %v6400_v22 = vpop.f32.mrf.mxu1 }
 0x370   : > { %v6416_v22 = vpop.f32.mrf.mxu0  ;;  %v4610_v54 = vrot.slane %v4590_v49, 2 }
 0x371   : > { %v1483_v12 = vpop.f32.mrf.mxu1 }
 0x373   : > { %v6401_v26 = vpop.f32.mrf.mxu1 }
 0x375   : > { %v1723_v26 = vpop.f32.mrf.mxu1 }
 0x376   : > { %v1724_v58 = vadd.f32 %v1723_v26, %v1683_v41  ;;  %v7344_v26 = vld [vmem:[%s7546_s30 + $0x80] ss:$0 sps:$4 sm:$0x11]  }
 0x389   : > { %v9002_v32 = vpop.permute.xlu0 %3232 }
 0x38a   : > { %6675 = vmatpush3.bf16.msra.mxu1 %v9002_v32  ;;  %6691 = vmatpush3.bf16.msra.mxu0 %v9002_v32 }
 0x38b   : > { %6676 = vmatprep.subr.bf16.mxu1 %v7458_v50  ;;  %6692 = vmatprep.subr.bf16.mxu0 %v7458_v50 }
 0x38d   : > { %v9012_v0 = vpop.permute.xlu1 %3230 }
 0x38e   : > { %6677 = vmatpush3.bf16.msra.mxu1 %v9012_v0  ;;  %6693 = vmatpush3.bf16.msra.mxu0 %v9012_v0 }
 0x38f   : > { %6678 = vmatprep.subr.bf16.mxu1 %v7458_v50  ;;  %6694 = vmatprep.subr.bf16.mxu0 %v7458_v50 }
 0x390   : > { %v9022_v13 = vpop.permute.xlu0 %3228 }
 0x392   : > { %6679 = vmatpush3.bf16.msra.mxu1 %v9022_v13  ;;  %6695 = vmatpush3.bf16.msra.mxu0 %v9022_v13 }
 0x393   : > { %6680 = vmatprep.subr.bf16.mxu1 %v7458_v50  ;;  %6696 = vmatprep.subr.bf16.mxu0 %v7458_v50 }
 0x394   : > { %v3741_v40 = vpop.permute.xlu0 %3740 }
 0x395   : > { %v9034_v21 = vpop.permute.xlu1 %3226  ;;  %3830 = vrot.lane.b32.xlu0 %v3741_v40, %s7455_s6  ;;  %v4600_v40 = vrot.slane %v4585_v29, 7 }
 0x396   : > { %6681 = vmatpush3.bf16.msra.mxu1 %v9034_v21  ;;  %6697 = vmatpush3.bf16.msra.mxu0 %v9034_v21 }
 0x397   : > { %6682 = vmatprep.subr.bf16.mxu1 %v7458_v50  ;;  %6698 = vmatprep.subr.bf16.mxu0 %v7458_v50 }
 0x398   : > { %v9043_v25 = vpop.permute.xlu0 %3738 }
 0x399   : > { %v9045_v52 = vpop.permute.xlu1 %3224  ;;  %3828 = vrot.lane.b32.xlu1 %v9043_v25, %s7455_s6 }
 0x39a   : > { %6683 = vmatpush3.bf16.msra.mxu1 %v9045_v52  ;;  %6699 = vmatpush3.bf16.msra.mxu0 %v9045_v52 }
 0x39b   : > { %6684 = vmatprep.subr.bf16.mxu1 %v7458_v50  ;;  %6700 = vmatprep.subr.bf16.mxu0 %v7458_v50 }
 0x39d   : > { %v3737_v6 = vpop.permute.xlu1 %3736 }
 0x39e   : > { %6685 = vmatpush3.bf16.msra.mxu1 %v8827_v39  ;;  %6701 = vmatpush3.bf16.msra.mxu0 %v8827_v39 }
 0x39f   : > { %3826 = vrot.lane.b32.xlu0 %v3737_v6, %s7455_s6  ;;  %6706 = vmatprep.subr.bf16.mxu1 %v7458_v50  ;;  %v4618_v6 = vrot.slane %v4595_v16, 5 }
 0x3a0   : > { %6722 = vmatprep.subr.bf16.mxu0 %v7458_v50 }
 0x3a1   : > { %v3735_v42 = vpop.permute.xlu1 %3734  ;;  %6687 = vmatmul.mubr.msk.bf16.vlgmr.msra.gmra.mxu1 %vm524_vm8, %v9069_v20  ;;  %6703 = vmatmul.mubr.msk.bf16.vlgmr.msra.gmra.mxu0 %vm524_vm8, %v9076_v2  ;;  %v4619_v51 = vsel %vm311_vm2, %v4618_v6, %v4617_v61 }
 0x3a2   : > { %6707 = vmatpush3.bf16.msra.mxu1 %v8876_v57  ;;  %3824 = vrot.lane.b32.xlu1 %v3735_v42, %s7455_s6  ;;  %v7318_v57 = vld [vmem:[%s7546_s30 + $0x8] ss:$0 sps:$4 sm:$0x11]  }
 0x3a3   : > { %4338 = vrot.lane.b32.xlu0 %v9061_v23, %s7453_s4  ;;  %6708 = vmatprep.subr.bf16.mxu1 %v7458_v50  ;;  %v4584_v27 = vunpack.c.l.b16 %v7318_v57  ;;  %v4598_v57 = vunpack.c.l.b16 %v7332_v5 }
 0x3a4   : > { %6718 = vmatprep.mubr.msk.bf16.mxu1 %vm7459_vm7, %v7458_v50  ;;  %6734 = vmatprep.mubr.msk.bf16.mxu0 %vm7459_vm7, %v7458_v50 }
 0x3a5   : > { %v3733_v18 = vpop.permute.xlu1 %3732  ;;  %v4601_v1 = vsel %vm305_vm0, %v4600_v40, %v4584_v27  ;;  %v4624_v12 = vrot.slane %v4598_v57, 2  ;;  %v1686_v27 = vpop.f32.mrf.mxu0 }
 0x3a6   : > { %6709 = vmatpush3.bf16.msra.mxu1 %v8892_v14  ;;  %3822 = vrot.lane.b32.xlu1 %v3733_v18, %s7455_s6  ;;  %v7330_v14 = vld [vmem:[%s7546_s30 + $0x98] ss:$0 sps:$4 sm:$0x11]   ;;  %v4603_v35 = vsel %vm308_vm1, %v4602_v7, %v4601_v1  ;;  %v6432_v1 = vpop.f32.mrf.mxu1 }
 0x3a7   : > { %4336 = vrot.lane.b32.xlu0 %v9061_v23, %s7455_s6  ;;  %6710 = vmatprep.subr.bf16.mxu1 %v7458_v50  ;;  %v4596_v46 = vunpack.c.l.b16 %v7330_v14  ;;  %v4605_v55 = vsel %vm311_vm2, %v4604_v30, %v4603_v35  ;;  %v4626_v14 = vrot.slane %v4599_v60, 1  ;;  %v7337_v1 = vld [vmem:[%s7546_s30 + $0x2c] ss:$0 sps:$4 sm:$0x11]  }
 0x3a8   : > { %v1726_v6 = vpop.f32.mrf.mxu1 }
 0x3a9   : > { %v4620_v42 = vrot.slane %v4596_v46, 4 }
 0x3aa   : > { %6711 = vmatpush3.bf16.msra.mxu1 %v8906_v33  ;;  %4334 = vrot.lane.b32.xlu1 %v9061_v23, %s7454_s5  ;;  %v4588_v33 = vunpack.c.l.b16 %v7322_v47  ;;  %v4612_v47 = vrot.slane %v4591_v11, 1  ;;  %v6433_v61 = vpop.f32.mrf.mxu1 }
 0x3ab   : > { %6712 = vmatprep.subr.bf16.mxu1 %v7458_v50  ;;  %v4621_v18 = vsel %vm314_vm3, %v4620_v42, %v4619_v51  ;;  %v7338_v61 = vld [vmem:[%s7546_s30 + $0x38] ss:$0 sps:$4 sm:$0x11]  }
 0x3ac   : > { %v9108_v34 = vpop.permute.xlu0 %3531  ;;  %v4606_v4 = vrot.slane %v4588_v33, 4 }
 0x3ad   : > { %6723 = vmatpush3.bf16.msra.mxu0 %v9108_v34 }
 0x3ae   : > { %6713 = vmatpush3.bf16.msra.mxu1 %v8913_v63  ;;  %4332 = vrot.lane.b32.xlu1 %v9061_v23, %s7456_s7  ;;  %v4589_v63 = vunpack.c.l.b16 %v7323_v44 }
 0x3af   : > { %6714 = vmatprep.subr.bf16.mxu1 %v7458_v50  ;;  %6724 = vmatprep.subr.bf16.mxu0 %v7458_v50 }
 0x3b0   : > { %v9124_v37 = vpop.permute.xlu0 %3529  ;;  %v4608_v48 = vrot.slane %v4589_v63, 3 }
 0x3b1   : > { %6725 = vmatpush3.bf16.msra.mxu0 %v9124_v37 }
 0x3b2   : > { %6715 = vmatpush3.bf16.msra.mxu1 %v8923_v45  ;;  %4330 = vrot.lane.b32.xlu1 %v9061_v23, %s7457_s8  ;;  %v4622_v45 = vrot.slane %v4597_v36, 3  ;;  %v4607_v23 = vsel %vm314_vm3, %v4606_v4, %v4605_v55 }
 0x3b3   : > { %6716 = vmatprep.subr.bf16.mxu1 %v7458_v50  ;;  %6726 = vmatprep.subr.bf16.mxu0 %v7458_v50  ;;  %v4609_v40 = vsel %vm317_vm4, %v4608_v48, %v4607_v23 }
 0x3b4   : > { %v9136_v29 = vpop.permute.xlu0 %3527  ;;  %v4623_v10 = vsel %vm317_vm4, %v4622_v45, %v4621_v18  ;;  %v4611_v16 = vsel %vm320_vm5, %v4610_v54, %v4609_v40 }
 0x3b5   : > { %6727 = vmatpush3.bf16.msra.mxu0 %v9136_v29  ;;  %v4625_v7 = vsel %vm320_vm5, %v4624_v12, %v4623_v10  ;;  %v4613_v46 = vsel %vm323_vm6, %v4612_v47, %v4611_v16  ;;  %v7342_v47 = vld [vmem:[%s7546_s30 + $0x68] ss:$0 sps:$4 sm:$0x11]   ;;  %v7335_v16 = vld [vmem:[%s7546_s30 + $0x14] ss:$0 sps:$4 sm:$0x11]  }
 0x3b6   : > { %6717 = vmatpush3.bf16.msra.mxu1 %v8720_v53  ;;  %6728 = vmatprep.subr.bf16.mxu0 %v7458_v50  ;;  %v6417_v53 = vpop.f32.mrf.mxu0  ;;  %v4627_v30 = vsel %vm323_vm6, %v4626_v14, %v4625_v7  ;;  %v7336_v14 = vld [vmem:[%s7546_s30 + $0x20] ss:$0 sps:$4 sm:$0x11]   ;;  %v7343_v7 = vld [vmem:[%s7546_s30 + $0x74] ss:$0 sps:$4 sm:$0x11]   ;;  %v4884_v6 = vunpack.c.l.b16 %v7335_v16 }
 0x3b7   : > { %6738 = vmatprep.subr.bf16.mxu1 %v7458_v50  ;;  %v9144_v38 = vpop.permute.xlu1 %3525  ;;  %v4628_v63 = vpack.c.b16 %v4627_v30, %v4613_v46  ;;  %v7334_v53 = vld [vmem:[%s7546_s30 + $0x8] ss:$0 sps:$4 sm:$0x11]   ;;  %v4885_v46 = vunpack.c.l.b16 %v7336_v14  ;;  %v4893_v30 = vunpack.c.l.b16 %v7344_v26 }
 0x3b8   : > { %v4040_v28 = vpop.permute.xlu0 %4039  ;;  %v1779_v44 = vpop.f32.mrf.mxu0 }
 0x3b9   : > { %6719 = vmatmul.mubr.msk.bf16.vlgmr.msra.gmra.mxu1 %vm524_vm8, %v8984_v17  ;;  %4129 = vrot.lane.b32.xlu0 %v4040_v28, %s7455_s6  ;;  %v9165_v3 = vadd.f32 %v1779_v44, %v1724_v58  ;;  %v4883_v58 = vunpack.c.l.b16 %v7334_v53  ;;  %v4891_v44 = vunpack.c.l.b16 %v7342_v47 }
 0x3ba   : > { %6739 = vmatpush3.bf16.msra.mxu1 %v9108_v34  ;;  %6729 = vmatpush3.bf16.msra.mxu0 %v9144_v38  ;;  %v6448_v33 = vpop.f32.mrf.mxu0 }
 0x3bb   : > { %6730 = vmatprep.subr.bf16.mxu0 %v7458_v50  ;;  %6740 = vmatprep.subr.bf16.mxu1 %v7458_v50  ;;  %v9155_v24 = vpop.permute.xlu1 %3523  ;;  %v7345_v33 = vld [vmem:[%s7546_s30 + $0x8c] ss:$0 sps:$4 sm:$0x11]  }
 0x3bc   : > { %v9159_v56 = vpop.permute.xlu0 %4037  ;;  %6750 = vmatprep.mubr.msk.bf16.mxu1 %vm7459_vm7, %v7458_v50  ;;  %v1782_v5 = vpop.f32.mrf.mxu0 }
 0x3bd   : > { %4127 = vrot.lane.b32.xlu0 %v9159_v56, %s7455_s6  ;;  %v4899_v5 = vrot.slane %v4883_v58, 1 }
 0x3be   : > { %6741 = vmatpush3.bf16.msra.mxu1 %v9124_v37  ;;  %6731 = vmatpush3.bf16.msra.mxu0 %v9155_v24  ;;  %v6449_v36 = vpop.f32.mrf.mxu0 }
 0x3bf   : > { %6732 = vmatprep.subr.bf16.mxu0 %v7458_v50  ;;  %6742 = vmatprep.subr.bf16.mxu1 %v7458_v50  ;;  %v4036_v19 = vpop.permute.xlu1 %4035  ;;  %v4886_v36 = vunpack.c.l.b16 %v7337_v1 }
 0x3c0   : > { %v4034_v35 = vpop.permute.xlu0 %4033 }
 0x3c1   : > { %4125 = vrot.lane.b32.xlu0 %v4036_v19, %s7455_s6  ;;  %4123 = vrot.lane.b32.xlu1 %v4034_v35, %s7455_s6  ;;  %v4892_v19 = vunpack.c.l.b16 %v7343_v7  ;;  %v4913_v35 = vrot.slane %v4891_v44, 1 }
 0x3c2   : > { %6733 = vmatpush3.bf16.msra.mxu0 %v8929_v9  ;;  %6743 = vmatpush3.bf16.msra.mxu1 %v9136_v29 }
 0x3c3   : > { %6744 = vmatprep.subr.bf16.mxu1 %v7458_v50  ;;  %6754 = vmatprep.subr.bf16.mxu0 %v7458_v50  ;;  %v4032_v4 = vpop.permute.xlu1 %4031 }
 0x3c5   : > { %6735 = vmatmul.mubr.msk.bf16.vlgmr.msra.gmra.mxu0 %vm524_vm8, %v9069_v20  ;;  %4637 = vrot.lane.b32.xlu0 %v4628_v63, %s7453_s4 }
 0x3c6   : > { %6745 = vmatpush3.bf16.msra.mxu1 %v9144_v38  ;;  %6755 = vmatpush3.bf16.msra.mxu0 %v9002_v32  ;;  %v1982_v32 = vpop.f32.mrf.mxu1 }
 0x3c7   : > { %6746 = vmatprep.subr.bf16.mxu1 %v7458_v50  ;;  %6756 = vmatprep.subr.bf16.mxu0 %v7458_v50 }
 0x3c8   : > { %4121 = vrot.lane.b32.xlu1 %v4032_v4, %s7455_s6  ;;  %6766 = vmatprep.mubr.msk.bf16.mxu0 %vm7459_vm7, %v7458_v50  ;;  %v6464_v42 = vpop.f32.mrf.mxu1  ;;  %v4894_v4 = vunpack.c.l.b16 %v7345_v33 }
 0x3c9   : > { %4635 = vrot.lane.b32.xlu0 %v4628_v63, %s7455_s6  ;;  %v7339_v42 = vld [vmem:[%s7546_s30 + $0x44] ss:$0 sps:$4 sm:$0x11]  }
 0x3ca   : > { %6747 = vmatpush3.bf16.msra.mxu1 %v9155_v24  ;;  %6757 = vmatpush3.bf16.msra.mxu0 %v9012_v0  ;;  %v2022_v0 = vpop.f32.mrf.mxu0  ;;  %v1985_v8 = vpop.f32.mrf.mxu1 }
 0x3cb   : > { %6748 = vmatprep.subr.bf16.mxu1 %v7458_v50  ;;  %6758 = vmatprep.subr.bf16.mxu0 %v7458_v50  ;;  %v4900_v8 = vsel %vm305_vm0, %v4884_v6, %v4899_v5 }
 0x3cc   : > { %4633 = vrot.lane.b32.xlu1 %v4628_v63, %s7454_s5  ;;  %v6480_v62 = vpop.f32.mrf.mxu0 }
 0x3cd   : > { %4631 = vrot.lane.b32.xlu0 %v4628_v63, %s7456_s7  ;;  %v7347_v62 = vld [vmem:[%s7546_s30 + $0xa4] ss:$0 sps:$4 sm:$0x11]  }
 0x3ce   : > { %6749 = vmatpush3.bf16.msra.mxu1 %v8929_v9  ;;  %6759 = vmatpush3.bf16.msra.mxu0 %v9022_v13  ;;  %v2023_v13 = vadd.f32 %v2022_v0, %v1982_v32  ;;  %v4901_v0 = vrot.slane %v4885_v46, 7 }
 0x3cf   : > { %6760 = vmatprep.subr.bf16.mxu0 %v7458_v50  ;;  %6770 = vmatprep.subr.bf16.mxu1 %v7458_v50 }
 0x3d0   : > { %4629 = vrot.lane.b32.xlu1 %v4628_v63, %s7457_s8  ;;  %v7346_v63 = vld [vmem:[%s7546_s30 + $0x98] ss:$0 sps:$4 sm:$0x11]  }
 0x3d1   : > { %6751 = vmatmul.mubr.msk.bf16.vlgmr.msra.gmra.mxu1 %vm524_vm8, %v9076_v2 }
 0x3d2   : > { %6761 = vmatpush3.bf16.msra.mxu0 %v9034_v21  ;;  %6782 = vmatprep.mubr.msk.bf16.mxu1 %vm7459_vm7, %v7458_v50  ;;  %v2025_v21 = vpop.f32.mrf.mxu0 }
 0x3d3   : > { %6762 = vmatprep.subr.bf16.mxu0 %v7458_v50  ;;  %v4914_v21 = vsel %vm305_vm0, %v4892_v19, %v4913_v35 }
 0x3d4   : > { %v6481_v55 = vpop.f32.mrf.mxu0 }
 0x3d5   : > { %v4895_v55 = vunpack.c.l.b16 %v7346_v63 }
 0x3d6   : > { %6763 = vmatpush3.bf16.msra.mxu0 %v9045_v52  ;;  %v6465_v52 = vpop.f32.mrf.mxu1  ;;  %v2281_v49 = vpop.f32.mrf.mxu0 }
 0x3d7   : > { %6764 = vmatprep.subr.bf16.mxu0 %v7458_v50  ;;  %v4887_v52 = vunpack.c.l.b16 %v7338_v61 }
 0x3d8   : > { %v2078_v51 = vpop.f32.mrf.mxu1 }
 0x3d9   : > { %v9215_v57 = vadd.f32 %v2078_v51, %v2023_v13  ;;  %v4915_v13 = vrot.slane %v4893_v30, 7  ;;  %v4903_v51 = vrot.slane %v4886_v36, 6 }
 0x3da   : > { %6765 = vmatpush3.bf16.msra.mxu0 %v8827_v39  ;;  %v6496_v41 = vpop.f32.mrf.mxu1  ;;  %v6512_v39 = vpop.f32.mrf.mxu0 }
 0x3db   : > { %6786 = vmatprep.subr.bf16.mxu0 %v7458_v50  ;;  %v7340_v39 = vld [vmem:[%s7546_s30 + $0x50] ss:$0 sps:$4 sm:$0x11]  }
 0x3dc   : > { %v2081_v48 = vpop.f32.mrf.mxu1  ;;  %v2284_v45 = vpop.f32.mrf.mxu0 }
 0x3dd   : > { %6767 = vmatmul.mubr.msk.bf16.vlgmr.msra.gmra.mxu0 %vm524_vm8, %v8984_v17  ;;  %v7348_v48 = vld [vmem:[%s7546_s30 + $0xb0] ss:$0 sps:$4 sm:$0x11]   ;;  %v4902_v45 = vsel %vm308_vm1, %v4901_v0, %v4900_v8  ;;  %v7351_v8 = vld [vmem:[%s7546_s30 + $0x14] ss:$0 sps:$4 sm:$0x22]  }
 0x3de   : > { %6798 = vmatprep.mubr.msk.bf16.mxu0 %vm7459_vm7, %v7458_v50  ;;  %v6497_v23 = vpop.f32.mrf.mxu1  ;;  %v6513_v17 = vpop.f32.mrf.mxu0 }
 0x3df   : > { %v4916_v23 = vsel %vm308_vm1, %v4915_v13, %v4914_v21  ;;  %v4888_v17 = vunpack.c.l.b16 %v7339_v42 }
 0x3e0   : > { %v2321_v18 = vpop.f32.mrf.mxu1  ;;  %v2377_v22 = vpop.f32.mrf.mxu0 }
 0x3e1   : > { %v2322_v11 = vadd.f32 %v2321_v18, %v2281_v49  ;;  %v4917_v49 = vrot.slane %v4894_v4, 6  ;;  %v4896_v18 = vunpack.c.l.b16 %v7347_v62  ;;  %v4907_v53 = vrot.slane %v4888_v17, 4  ;;  %v7350_v62 = vld [vmem:[%s7546_s30 + $0x8] ss:$0 sps:$4 sm:$0x22]  }
 0x3e2   : > { %v6528_v60 = vpop.f32.mrf.mxu1  ;;  %v6544_v54 = vpop.f32.mrf.mxu0 }
 0x3e3   : > { %v9217_v12 = vadd.f32 %v2377_v22, %v2322_v11  ;;  %v4905_v22 = vrot.slane %v4887_v52, 5  ;;  %v4919_v11 = vrot.slane %v4895_v55, 5  ;;  %v7341_v60 = vld [vmem:[%s7546_s30 + $0x5c] ss:$0 sps:$4 sm:$0x11]   ;;  %v4921_v47 = vrot.slane %v4896_v18, 4 }
 0x3e4   : > { %v2324_v27 = vpop.f32.mrf.mxu1  ;;  %v2380_v28 = vpop.f32.mrf.mxu0  ;;  %v7349_v54 = vld [vmem:[%s7546_s30 + $0xbc] ss:$0 sps:$4 sm:$0x11]   ;;  %v4890_v7 = vunpack.c.l.b16 %v7341_v60  ;;  %v7358_v52 = vld [vmem:[%s7546_s30 + $0x68] ss:$0 sps:$4 sm:$0x22]  }
 0x3e5   : > { %v4904_v27 = vsel %vm311_vm2, %v4903_v51, %v4902_v45  ;;  %v4918_v28 = vsel %vm311_vm2, %v4917_v49, %v4916_v23  ;;  %v4898_v58 = vunpack.c.l.b16 %v7349_v54  ;;  %v7359_v55 = vld [vmem:[%s7546_s30 + $0x74] ss:$0 sps:$4 sm:$0x22]   ;;  %v5182_v49 = vunpack.c.l.b16 %v7350_v62  ;;  %v7353_v45 = vld [vmem:[%s7546_s30 + $0x2c] ss:$0 sps:$4 sm:$0x22]  }
 0x3e6   : > { %v6529_v40 = vpop.f32.mrf.mxu1  ;;  %v6545_v10 = vpop.f32.mrf.mxu0  ;;  %v4906_v26 = vsel %vm314_vm3, %v4905_v22, %v4904_v27  ;;  %v4920_v16 = vsel %vm314_vm3, %v4919_v11, %v4918_v28  ;;  %v4911_v19 = vrot.slane %v4890_v7, 2  ;;  %v7361_v23 = vld [vmem:[%s7546_s30 + $0x8c] ss:$0 sps:$4 sm:$0x22]  }
 0x3e7   : > { %v4889_v40 = vunpack.c.l.b16 %v7340_v39  ;;  %v4897_v10 = vunpack.c.l.b16 %v7348_v48  ;;  %v4908_v46 = vsel %vm317_vm4, %v4907_v53, %v4906_v26  ;;  %v4922_v30 = vsel %vm317_vm4, %v4921_v47, %v4920_v16  ;;  %v7352_v18 = vld [vmem:[%s7546_s30 + $0x20] ss:$0 sps:$4 sm:$0x22]  }
 0x3e8   : > { %v4925_v5 = vrot.slane %v4898_v58, 2  ;;  %v5183_v39 = vunpack.c.l.b16 %v7351_v8  ;;  %v5190_v48 = vunpack.c.l.b16 %v7358_v52  ;;  %v2580_v17 = vpop.f32.mrf.mxu1  ;;  %v7360_v22 = vld [vmem:[%s7546_s30 + $0x80] ss:$0 sps:$4 sm:$0x22]   ;;  %v5198_v11 = vrot.slane %v5182_v49, 2  ;;  %v2620_v53 = vpop.f32.mrf.mxu0 }
 0x3e9   : > { %v4909_v44 = vrot.slane %v4889_v40, 3  ;;  %v4923_v1 = vrot.slane %v4897_v10, 3  ;;  %v7354_v40 = vld [vmem:[%s7546_s30 + $0x38] ss:$0 sps:$4 sm:$0x22]   ;;  %v5193_v47 = vunpack.c.l.b16 %v7361_v23  ;;  %v2621_v26 = vadd.f32 %v2620_v53, %v2580_v17 }
 0x3ea   : > { %v5199_v60 = vrot.slane %v5183_v39, 1  ;;  %v5212_v54 = vrot.slane %v5190_v48, 2  ;;  %v6560_v28 = vpop.f32.mrf.mxu1  ;;  %v7362_v10 = vld [vmem:[%s7546_s30 + $0x98] ss:$0 sps:$4 sm:$0x22]   ;;  %v5184_v58 = vunpack.c.l.b16 %v7352_v18 }
 0x3eb   : > { %v4910_v35 = vsel %vm320_vm5, %v4909_v44, %v4908_v46  ;;  %v4924_v61 = vsel %vm320_vm5, %v4923_v1, %v4922_v30  ;;  %v5192_v44 = vunpack.c.l.b16 %v7360_v22  ;;  %v6576_v1 = vpop.f32.mrf.mxu0  ;;  %v7355_v46 = vld [vmem:[%s7546_s30 + $0x44] ss:$0 sps:$4 sm:$0x22]   ;;  %v7356_v8 = vld [vmem:[%s7546_s30 + $0x50] ss:$0 sps:$4 sm:$0x22]  }
 0x3ec   : > { %v4912_v4 = vsel %vm323_vm6, %v4911_v19, %v4910_v35  ;;  %v4926_v0 = vsel %vm323_vm6, %v4925_v5, %v4924_v61  ;;  %v2583_v16 = vpop.f32.mrf.mxu1  ;;  %v7363_v30 = vld [vmem:[%s7546_s30 + $0xa4] ss:$0 sps:$4 sm:$0x22]   ;;  %v5186_v5 = vunpack.c.l.b16 %v7354_v40  ;;  %v5194_v35 = vunpack.c.l.b16 %v7362_v10  ;;  %v7357_v17 = vld [vmem:[%s7546_s30 + $0x5c] ss:$0 sps:$4 sm:$0x22]  }
 0x3ed   : > { %v9285_v42 = vpack.c.b16 %v4926_v0, %v4912_v4  ;;  %v2623_v61 = vpop.f32.mrf.mxu0  ;;  %v5216_v0 = vrot.slane %v5193_v47, 7  ;;  %v5187_v49 = vunpack.c.l.b16 %v7355_v46  ;;  %v5195_v39 = vunpack.c.l.b16 %v7363_v30  ;;  %v7365_v18 = vld [vmem:[%s7546_s30 + $0xbc] ss:$0 sps:$4 sm:$0x22]  }
 0x3ee   : > { %v6561_v19 = vpop.f32.mrf.mxu1  ;;  %v5188_v28 = vunpack.c.l.b16 %v7356_v8  ;;  %v5197_v16 = vunpack.c.l.b16 %v7365_v18 }
 0x3ef   : > { %v5220_v10 = vrot.slane %v5195_v39, 5 }
 0x3f0   : > { %v5208_v1 = vrot.slane %v5188_v28, 4 }
 0x407   : > { %v9229_v32 = vpop.permute.xlu0 %3830 }
 0x408   : > { %6771 = vmatpush3.bf16.msra.mxu1 %v9229_v32  ;;  %6787 = vmatpush3.bf16.msra.mxu0 %v9229_v32 }
 0x409   : > { %6772 = vmatprep.subr.bf16.mxu1 %v7458_v50  ;;  %6788 = vmatprep.subr.bf16.mxu0 %v7458_v50 }
 0x40b   : > { %v9239_v41 = vpop.permute.xlu1 %3828 }
 0x40c   : > { %6773 = vmatpush3.bf16.msra.mxu1 %v9239_v41  ;;  %6789 = vmatpush3.bf16.msra.mxu0 %v9239_v41 }
 0x40d   : > { %6774 = vmatprep.subr.bf16.mxu1 %v7458_v50  ;;  %6790 = vmatprep.subr.bf16.mxu0 %v7458_v50 }
 0x411   : > { %v9253_v14 = vpop.permute.xlu0 %3826 }
 0x412   : > { %6775 = vmatpush3.bf16.msra.mxu1 %v9253_v14  ;;  %6791 = vmatpush3.bf16.msra.mxu0 %v9253_v14 }
 0x413   : > { %6776 = vmatprep.subr.bf16.mxu1 %v7458_v50  ;;  %6792 = vmatprep.subr.bf16.mxu0 %v7458_v50 }
 0x414   : > { %v9261_v33 = vpop.permute.xlu1 %3824 }
 0x415   : > { %v4339_v6 = vpop.permute.xlu0 %4338 }
 0x416   : > { %4428 = vrot.lane.b32.xlu0 %v4339_v6, %s7455_s6  ;;  %6777 = vmatpush3.bf16.msra.mxu1 %v9261_v33 }
 0x417   : > { %6793 = vmatpush3.bf16.msra.mxu0 %v9261_v33  ;;  %6778 = vmatprep.subr.bf16.mxu1 %v7458_v50 }
 0x418   : > { %6794 = vmatprep.subr.bf16.mxu0 %v7458_v50  ;;  %v9272_v63 = vpop.permute.xlu1 %3822 }
 0x419   : > { %v9274_v36 = vpop.permute.xlu0 %4336 }
 0x41a   : > { %4426 = vrot.lane.b32.xlu1 %v9274_v36, %s7455_s6  ;;  %6779 = vmatpush3.bf16.msra.mxu1 %v9272_v63 }
 0x41b   : > { %6795 = vmatpush3.bf16.msra.mxu0 %v9272_v63  ;;  %6780 = vmatprep.subr.bf16.mxu1 %v7458_v50 }
 0x41c   : > { %6796 = vmatprep.subr.bf16.mxu0 %v7458_v50  ;;  %v4335_v13 = vpop.permute.xlu1 %4334 }
 0x41d   : > { %4424 = vrot.lane.b32.xlu0 %v4335_v13, %s7455_s6  ;;  %v2676_v13 = vpop.f32.mrf.mxu1 }
 0x41e   : > { %6781 = vmatpush3.bf16.msra.mxu1 %v9043_v25 }
 0x41f   : > { %6797 = vmatpush3.bf16.msra.mxu0 %v9043_v25  ;;  %6802 = vmatprep.subr.bf16.mxu1 %v7458_v50  ;;  %v6592_v48 = vpop.f32.mrf.mxu1 }
 0x420   : > { %v4333_v21 = vpop.permute.xlu1 %4332  ;;  %6818 = vmatprep.subr.bf16.mxu0 %v7458_v50 }
 0x421   : > { %6783 = vmatmul.mubr.msk.bf16.vlgmr.msra.gmra.mxu1 %vm524_vm8, %v9069_v20  ;;  %4936 = vrot.lane.b32.xlu0 %v9285_v42, %s7453_s4 }
 0x422   : > { %6803 = vmatpush3.bf16.msra.mxu1 %v9108_v34  ;;  %4422 = vrot.lane.b32.xlu1 %v4333_v21, %s7455_s6  ;;  %v5191_v34 = vunpack.c.l.b16 %v7359_v55  ;;  %v7364_v21 = vld [vmem:[%s7546_s30 + $0xb0] ss:$0 sps:$4 sm:$0x22]   ;;  %s10153_s30 = scalar_lea.hbm %s10213_s3, %s5852_s18 }
 0x423   : > { %6804 = vmatprep.subr.bf16.mxu1 %v7458_v50  ;;  %6799 = vmatmul.mubr.msk.bf16.vlgmr.msra.gmra.mxu0 %vm524_vm8, %v9076_v2  ;;  %v5196_v40 = vunpack.c.l.b16 %v7364_v21 }
 0x424   : > { %v4331_v51 = vpop.permute.xlu1 %4330  ;;  %6814 = vmatprep.mubr.msk.bf16.mxu1 %vm7459_vm7, %v7458_v50  ;;  %6830 = vmatprep.mubr.msk.bf16.mxu0 %vm7459_vm7, %v7458_v50  ;;  %v5213_v27 = vrot.slane %v5191_v34, 1  ;;  %v5204_v34 = vrot.slane %v5186_v5, 6 }
 0x425   : > { %4934 = vrot.lane.b32.xlu0 %v9285_v42, %s7455_s6  ;;  %v5222_v46 = vrot.slane %v5196_v40, 4 }
 0x426   : > { %6805 = vmatpush3.bf16.msra.mxu1 %v9124_v37  ;;  %4420 = vrot.lane.b32.xlu1 %v4331_v51, %s7455_s6  ;;  %v5185_v37 = vunpack.c.l.b16 %v7353_v45  ;;  %v5214_v6 = vsel %vm305_vm0, %v5213_v27, %v5212_v54  ;;  %v9341_v51 = vadd.f32 %v2676_v13, %v2621_v26  ;;  %v5218_v45 = vrot.slane %v5194_v35, 6 }
 0x427   : > { %6806 = vmatprep.subr.bf16.mxu1 %v7458_v50  ;;  %v5215_v55 = vsel %vm308_vm1, %v5192_v44, %v5214_v6  ;;  %v5189_v26 = vunpack.c.l.b16 %v7357_v17 }
 0x428   : > { %v5202_v4 = vrot.slane %v5185_v37, 7 }
 0x42a   : > { %6807 = vmatpush3.bf16.msra.mxu1 %v9136_v29  ;;  %4932 = vrot.lane.b32.xlu1 %v9285_v42, %s7454_s5  ;;  %v5200_v29 = vsel %vm305_vm0, %v5199_v60, %v5198_v11  ;;  %v5217_v11 = vsel %vm311_vm2, %v5216_v0, %v5215_v55  ;;  %v2679_v60 = vpop.f32.mrf.mxu1  ;;  %v5224_v0 = vrot.slane %v5197_v16, 3 }
 0x42b   : > { %v9322_v7 = vpop.permute.xlu0 %4129  ;;  %6808 = vmatprep.subr.bf16.mxu1 %v7458_v50  ;;  %v5201_v52 = vsel %vm308_vm1, %v5184_v58, %v5200_v29  ;;  %v5219_v47 = vsel %vm314_vm3, %v5218_v45, %v5217_v11 }
 0x42c   : > { %6819 = vmatpush3.bf16.msra.mxu0 %v9322_v7  ;;  %v5203_v22 = vsel %vm311_vm2, %v5202_v4, %v5201_v52  ;;  %v6593_v53 = vpop.f32.mrf.mxu1  ;;  %v5221_v6 = vsel %vm317_vm4, %v5220_v10, %v5219_v47  ;;  %v5210_v4 = vrot.slane %v5189_v26, 3 }
 0x42d   : > { %6820 = vmatprep.subr.bf16.mxu0 %v7458_v50  ;;  %v5205_v37 = vsel %vm314_vm3, %v5204_v34, %v5203_v22  ;;  %v5223_v52 = vsel %vm320_vm5, %v5222_v46, %v5221_v6 }
 0x42e   : > { %6809 = vmatpush3.bf16.msra.mxu1 %v9144_v38  ;;  %4930 = vrot.lane.b32.xlu1 %v9285_v42, %s7456_s7  ;;  %v6577_v38 = vpop.f32.mrf.mxu0  ;;  %v2919_v30 = vpop.f32.mrf.mxu1  ;;  %v5225_v45 = vsel %vm323_vm6, %v5224_v0, %v5223_v52 }
 0x42f   : > { %v9334_v62 = vpop.permute.xlu0 %4127  ;;  %6810 = vmatprep.subr.bf16.mxu1 %v7458_v50 }
 0x430   : > { %6821 = vmatpush3.bf16.msra.mxu0 %v9334_v62  ;;  %v2879_v23 = vpop.f32.mrf.mxu0  ;;  %v6624_v35 = vpop.f32.mrf.mxu1 }
 0x431   : > { %6822 = vmatprep.subr.bf16.mxu0 %v7458_v50  ;;  %v2920_v19 = vadd.f32 %v2919_v30, %v2879_v23 }
 0x432   : > { %6811 = vmatpush3.bf16.msra.mxu1 %v9155_v24  ;;  %4928 = vrot.lane.b32.xlu1 %v9285_v42, %s7457_s8  ;;  %v5206_v24 = vrot.slane %v5187_v49, 5  ;;  %v6608_v42 = vpop.f32.mrf.mxu0  ;;  %v2922_v38 = vpop.f32.mrf.mxu1 }
 0x433   : > { %v9352_v54 = vpop.permute.xlu0 %4125  ;;  %6812 = vmatprep.subr.bf16.mxu1 %v7458_v50  ;;  %v9355_v27 = vpop.permute.xlu1 %4123 }
 0x434   : > { %6823 = vmatpush3.bf16.msra.mxu0 %v9352_v54  ;;  %v2882_v58 = vpop.f32.mrf.mxu0  ;;  %v5207_v29 = vsel %vm317_vm4, %v5206_v24, %v5205_v37  ;;  %v6625_v39 = vpop.f32.mrf.mxu1 }
 0x435   : > { %6824 = vmatprep.subr.bf16.mxu0 %v7458_v50  ;;  %v5209_v21 = vsel %vm320_vm5, %v5208_v1, %v5207_v29 }
 0x436   : > { %6813 = vmatpush3.bf16.msra.mxu1 %v8929_v9  ;;  %v6609_v5 = vpop.f32.mrf.mxu0  ;;  %v9370_v9 = vld [vmem:[%s10211_s1] sm:$0xf]  ;;  %v5211_v34 = vsel %vm323_vm6, %v5210_v4, %v5209_v21  ;;  %v3178_v18 = vpop.f32.mrf.mxu1 }
 0x437   : > { %v4638_v44 = vpop.permute.xlu0 %4637  ;;  %6834 = vmatprep.subr.bf16.mxu1 %v7458_v50  ;;  %v5226_v11 = vpack.c.b16 %v5225_v45, %v5211_v34 }
 0x438   : > { %4727 = vrot.lane.b32.xlu0 %v4638_v44, %s7455_s6  ;;  %6825 = vmatpush3.bf16.msra.mxu0 %v9355_v27  ;;  %v2975_v13 = vpop.f32.mrf.mxu0  ;;  %v6656_v60 = vpop.f32.mrf.mxu1 }
 0x439   : > { %6815 = vmatmul.mubr.msk.bf16.vlgmr.msra.gmra.mxu1 %vm524_vm8, %v9370_v9  ;;  %6826 = vmatprep.subr.bf16.mxu0 %v7458_v50  ;;  %v9385_v55 = vadd.f32 %v2975_v13, %v2920_v19  ;;  %v9493_v60 = vld [vmem:[%s10211_s1 + $0x4] sm:$0xf] }
 0x43a   : > { %6835 = vmatpush3.bf16.msra.mxu1 %v9322_v7  ;;  %v9376_v61 = vpop.permute.xlu1 %4121  ;;  %6846 = vmatprep.mubr.msk.bf16.mxu1 %vm7459_vm7, %v7458_v50  ;;  %v6640_v49 = vpop.f32.mrf.mxu0 }
 0x43b   : > { %v9380_v8 = vpop.permute.xlu0 %4635  ;;  %6836 = vmatprep.subr.bf16.mxu1 %v7458_v50  ;;  %v3181_v10 = vpop.f32.mrf.mxu1 }
 0x43c   : > { %4725 = vrot.lane.b32.xlu0 %v9380_v8, %s7455_s6  ;;  %6827 = vmatpush3.bf16.msra.mxu0 %v9376_v61  ;;  %v2978_v23 = vpop.f32.mrf.mxu0 }
 0x43d   : > { %6828 = vmatprep.subr.bf16.mxu0 %v7458_v50  ;;  %v6657_v53 = vpop.f32.mrf.mxu1 }
 0x43e   : > { %6837 = vmatpush3.bf16.msra.mxu1 %v9334_v62  ;;  %v4634_v48 = vpop.permute.xlu1 %4633  ;;  %v6641_v22 = vpop.f32.mrf.mxu0 }
 0x43f   : > { %v4632_v17 = vpop.permute.xlu0 %4631  ;;  %6838 = vmatprep.subr.bf16.mxu1 %v7458_v50  ;;  %v9486_v22 = vld [vmem:[%s10211_s1 + $0x8] sm:$0xf] }
 0x440   : > { %4721 = vrot.lane.b32.xlu1 %v4632_v17, %s7455_s6  ;;  %6829 = vmatpush3.bf16.msra.mxu0 %v9159_v56  ;;  %v3218_v40 = vpop.f32.mrf.mxu0 }
 0x441   : > { %4723 = vrot.lane.b32.xlu0 %v4634_v48, %s7455_s6  ;;  %6850 = vmatprep.subr.bf16.mxu0 %v7458_v50  ;;  %v3219_v24 = vadd.f32 %v3218_v40, %v3178_v18 }
 0x442   : > { %6839 = vmatpush3.bf16.msra.mxu1 %v9352_v54  ;;  %v4630_v28 = vpop.permute.xlu1 %4629  ;;  %v6672_v42 = vpop.f32.mrf.mxu0 }
 0x443   : > { %6831 = vmatmul.mubr.msk.bf16.vlgmr.msra.gmra.mxu0 %vm524_vm8, %v9069_v20  ;;  %6840 = vmatprep.subr.bf16.mxu1 %v7458_v50 }
 0x444   : > { %6851 = vmatpush3.bf16.msra.mxu0 %v9229_v32  ;;  %4719 = vrot.lane.b32.xlu1 %v4630_v28, %s7455_s6  ;;  %v3221_v20 = vpop.f32.mrf.mxu0 }
 0x445   : > { %5235 = vrot.lane.b32.xlu0 %v5226_v11, %s7453_s4  ;;  %6852 = vmatprep.subr.bf16.mxu0 %v7458_v50  ;;  %v9552_v20 = vld [vmem:[%s10212_s2] sm:$0xff]  ;;  %s7463_s4 = smov [#allocation2]  }
 0x446   : > { %6841 = vmatpush3.bf16.msra.mxu1 %v9355_v27  ;;  %6862 = vmatprep.mubr.msk.bf16.mxu0 %vm7459_vm7, %v7458_v50  ;;  %v6673_v32 = vpop.f32.mrf.mxu0 }
 0x447   : > { %6842 = vmatprep.subr.bf16.mxu1 %v7458_v50 }
 0x448   : > { %6853 = vmatpush3.bf16.msra.mxu0 %v9239_v41  ;;  %5231 = vrot.lane.b32.xlu1 %v5226_v11, %s7454_s5  ;;  %s7379_s5 = sshll.u32 %s7463_s4, 4  ;;  %s7380_s5 = int_to_ptr.vmem [resolvable:$false] %s7379_s5 }
 0x449   : > { %5233 = vrot.lane.b32.xlu0 %v5226_v11, %s7455_s6  ;;  %6854 = vmatprep.subr.bf16.mxu0 %v7458_v50  ;;  %p7382_p1 = scmp.lt.s32.totalorder %s10155_s19, %s7380_s5 }
 0x44a   : > { %6843 = vmatpush3.bf16.msra.mxu1 %v9376_v61 }
 0x44b   : > { %6844 = vmatprep.subr.bf16.mxu1 %v7458_v50 }
 0x44c   : > { %6855 = vmatpush3.bf16.msra.mxu0 %v9253_v14  ;;  %5227 = vrot.lane.b32.xlu1 %v5226_v11, %s7457_s8 }
 0x44d   : > { %5229 = vrot.lane.b32.xlu0 %v5226_v11, %s7456_s7  ;;  %6856 = vmatprep.subr.bf16.mxu0 %v7458_v50  ;;  %s7381_s7 = scalar_lea.vmem %s7380_s5, 4096 }
 0x44e   : > { %6845 = vmatpush3.bf16.msra.mxu1 %v9159_v56  ;;  %p7383_p2 = scmp.lt.s32.totalorder %s7381_s7, %s7375_s26 }
 0x44f   : > { %6866 = vmatprep.subr.bf16.mxu1 %v7458_v50 }
 0x450   : > { %6857 = vmatpush3.bf16.msra.mxu0 %v9261_v33  ;;  %p7384_p3 = por %p7383_p2, %p7382_p1 }
 0x451   : > { %6858 = vmatprep.subr.bf16.mxu0 %v7458_v50  ;;  %6847 = vmatmul.mubr.msk.bf16.vlgmr.msra.gmra.mxu1 %vm524_vm8, %v9076_v2 }
 0x452   : > { %6878 = vmatprep.mubr.msk.bf16.mxu1 %vm7459_vm7, %v7458_v50  ;;  %p7385_p5 = pnand %p7384_p3, %p7378_p0 }
 0x454   : > { %6859 = vmatpush3.bf16.msra.mxu0 %v9272_v63 }
 0x455   : > { %6860 = vmatprep.subr.bf16.mxu0 %v7458_v50 }
 0x458   : > { %6861 = vmatpush3.bf16.msra.mxu0 %v9043_v25 }
 0x459   : > { %6882 = vmatprep.subr.bf16.mxu0 %v7458_v50 }
 0x45b   : > { %6863 = vmatmul.mubr.msk.bf16.vlgmr.msra.gmra.mxu0 %vm524_vm8, %v9370_v9 }
 0x45c   : > { %6894 = vmatprep.mubr.msk.bf16.mxu0 %vm7459_vm7, %v7458_v50 }
 0x461   : > { %v3274_v41 = vpop.f32.mrf.mxu1  ;;  %v3477_v14 = vpop.f32.mrf.mxu0 }
 0x462   : > { %v9437_v2 = vadd.f32 %v3274_v41, %v3219_v24  ;;  %v9560_v41 = vadd.f32 %v8882_v43, %v9552_v20  ;;  %v9576_v43 = vadd.f32 %v8990_v31, %v9552_v20  ;;  %v9594_v31 = vadd.f32 %v9165_v3, %v9552_v20 }
 0x463   : > { %v6688_v33 = vpop.f32.mrf.mxu1  ;;  %v6704_v37 = vpop.f32.mrf.mxu0  ;;  %v9610_v3 = vadd.f32 %v9217_v12, %v9552_v20  ;;  %v9629_v12 = vadd.f32 %v9385_v55, %v9552_v20 }
 0x464   : > { %v9633_v33 = vadd.f32 %v9437_v2, %v9552_v20 }
 0x465   : > { %v3277_v47 = vpop.f32.mrf.mxu1  ;;  %v3480_v63 = vpop.f32.mrf.mxu0 }
 0x467   : > { %v6689_v26 = vpop.f32.mrf.mxu1  ;;  %v6705_v16 = vpop.f32.mrf.mxu0 }
 0x479   : > { %v3517_v58 = vpop.f32.mrf.mxu1 }
 0x47a   : > { %v3518_v25 = vadd.f32 %v3517_v58, %v3477_v14  ;;  %v9566_v14 = vadd.f32 %v8978_v59, %v9552_v20  ;;  %v9586_v59 = vadd.f32 %v9093_v15, %v9552_v20  ;;  %v9602_v15 = vadd.f32 %v9215_v57, %v9552_v20 }
 0x47b   : > { %v6720_v44 = vpop.f32.mrf.mxu1  ;;  %v9618_v57 = vadd.f32 %v9341_v51, %v9552_v20 }
 0x47d   : > { %v3520_v1 = vpop.f32.mrf.mxu1 }
 0x47f   : > { %v6721_v46 = vpop.f32.mrf.mxu1 }
 0x485   : > { %v3573_v30 = vpop.f32.mrf.mxu0 }
 0x486   : > { %v9439_v29 = vadd.f32 %v3573_v30, %v3518_v25 }
 0x487   : > { %v6736_v6 = vpop.f32.mrf.mxu0 }
 0x488   : > { %v9441_v19 = vpop.permute.xlu0 %4428  ;;  %v9640_v51 = vadd.f32 %v9439_v29, %v9552_v20 }
 0x489   : > { %6867 = vmatpush3.bf16.msra.mxu1 %v9441_v19  ;;  %6883 = vmatpush3.bf16.msra.mxu0 %v9441_v19  ;;  %v3576_v5 = vpop.f32.mrf.mxu0 }
 0x48a   : > { %6868 = vmatprep.subr.bf16.mxu1 %v7458_v50  ;;  %6884 = vmatprep.subr.bf16.mxu0 %v7458_v50 }
 0x48b   : > { %v6737_v35 = vpop.f32.mrf.mxu0 }
 0x48c   : > { %v9447_v4 = vpop.permute.xlu1 %4426 }
 0x48d   : > { %6869 = vmatpush3.bf16.msra.mxu1 %v9447_v4  ;;  %6885 = vmatpush3.bf16.msra.mxu0 %v9447_v4 }
 0x48e   : > { %6870 = vmatprep.subr.bf16.mxu1 %v7458_v50  ;;  %6886 = vmatprep.subr.bf16.mxu0 %v7458_v50 }
 0x48f   : > { %v9453_v0 = vpop.permute.xlu0 %4424 }
 0x491   : > { %6871 = vmatpush3.bf16.msra.mxu1 %v9453_v0  ;;  %6887 = vmatpush3.bf16.msra.mxu0 %v9453_v0  ;;  %v3776_v13 = vpop.f32.mrf.mxu1 }
 0x492   : > { %6872 = vmatprep.subr.bf16.mxu1 %v7458_v50  ;;  %6888 = vmatprep.subr.bf16.mxu0 %v7458_v50 }
 0x493   : > { %v4937_v21 = vpop.permute.xlu0 %4936  ;;  %v6752_v52 = vpop.f32.mrf.mxu1 }
 0x494   : > { %v9459_v38 = vpop.permute.xlu1 %4422  ;;  %5026 = vrot.lane.b32.xlu0 %v4937_v21, %s7455_s6 }
 0x495   : > { %6873 = vmatpush3.bf16.msra.mxu1 %v9459_v38  ;;  %6889 = vmatpush3.bf16.msra.mxu0 %v9459_v38  ;;  %v3779_v49 = vpop.f32.mrf.mxu1 }
 0x496   : > { %6874 = vmatprep.subr.bf16.mxu1 %v7458_v50  ;;  %6890 = vmatprep.subr.bf16.mxu0 %v7458_v50 }
 0x497   : > { %v9466_v39 = vpop.permute.xlu0 %4934  ;;  %v6753_v48 = vpop.f32.mrf.mxu1 }
 0x498   : > { %v9468_v34 = vpop.permute.xlu1 %4420  ;;  %5024 = vrot.lane.b32.xlu1 %v9466_v39, %s7455_s6 }
 0x499   : > { %6875 = vmatpush3.bf16.msra.mxu1 %v9468_v34  ;;  %6891 = vmatpush3.bf16.msra.mxu0 %v9468_v34 }
 0x49a   : > { %6876 = vmatprep.subr.bf16.mxu1 %v7458_v50  ;;  %6892 = vmatprep.subr.bf16.mxu0 %v7458_v50 }
 0x49c   : > { %v4933_v45 = vpop.permute.xlu1 %4932 }
 0x49d   : > { %6877 = vmatpush3.bf16.msra.mxu1 %v9274_v36  ;;  %6893 = vmatpush3.bf16.msra.mxu0 %v9274_v36  ;;  %v3816_v23 = vpop.f32.mrf.mxu0 }
 0x49e   : > { %5022 = vrot.lane.b32.xlu0 %v4933_v45, %s7455_s6  ;;  %6898 = vmatprep.subr.bf16.mxu1 %v7458_v50  ;;  %v9480_v17 = vadd.f32 %v3816_v23, %v3776_v13 }
 0x49f   : > { %6914 = vmatprep.subr.bf16.mxu0 %v7458_v50  ;;  %v6768_v18 = vpop.f32.mrf.mxu0 }
 0x4a0   : > { %6879 = vmatmul.mubr.msk.bf16.vlgmr.msra.gmra.mxu1 %vm524_vm8, %v9486_v22  ;;  %v4931_v11 = vpop.permute.xlu1 %4930  ;;  %6895 = vmatmul.mubr.msk.bf16.vlgmr.msra.gmra.mxu0 %vm524_vm8, %v9493_v60 }
 0x4a1   : > { %6899 = vmatpush3.bf16.msra.mxu1 %v9322_v7  ;;  %5020 = vrot.lane.b32.xlu1 %v4931_v11, %s7455_s6  ;;  %v3819_v28 = vpop.f32.mrf.mxu0 }
 0x4a2   : > { %6900 = vmatprep.subr.bf16.mxu1 %v7458_v50  ;;  %6910 = vmatprep.mubr.msk.bf16.mxu1 %vm7459_vm7, %v7458_v50 }
 0x4a3   : > { %6926 = vmatprep.mubr.msk.bf16.mxu0 %vm7459_vm7, %v7458_v50  ;;  %v6769_v40 = vpop.f32.mrf.mxu0 }
 0x4a4   : > { %v4929_v24 = vpop.permute.xlu1 %4928 }
 0x4a5   : > { %6901 = vmatpush3.bf16.msra.mxu1 %v9334_v62  ;;  %5018 = vrot.lane.b32.xlu0 %v4929_v24, %s7455_s6 }
 0x4a6   : > { %6902 = vmatprep.subr.bf16.mxu1 %v7458_v50 }
 0x4a9   : > { %6903 = vmatpush3.bf16.msra.mxu1 %v9352_v54 }
 0x4aa   : > { %v9508_v7 = vpop.permute.xlu0 %4727  ;;  %6904 = vmatprep.subr.bf16.mxu1 %v7458_v50 }
 0x4ab   : > { %6915 = vmatpush3.bf16.msra.mxu0 %v9508_v7 }
 0x4ac   : > { %6916 = vmatprep.subr.bf16.mxu0 %v7458_v50 }
 0x4ad   : > { %6905 = vmatpush3.bf16.msra.mxu1 %v9355_v27 }
 0x4ae   : > { %v9514_v10 = vpop.permute.xlu0 %4725  ;;  %6906 = vmatprep.subr.bf16.mxu1 %v7458_v50 }
 0x4af   : > { %6917 = vmatpush3.bf16.msra.mxu0 %v9514_v10 }
 0x4b0   : > { %6918 = vmatprep.subr.bf16.mxu0 %v7458_v50 }
 0x4b1   : > { %6907 = vmatpush3.bf16.msra.mxu1 %v9376_v61 }
 0x4b2   : > { %6908 = vmatprep.subr.bf16.mxu1 %v7458_v50  ;;  %v9521_v62 = vpop.permute.xlu1 %4721 }
 0x4b3   : > { %v9523_v54 = vpop.permute.xlu0 %4723 }
 0x4b4   : > { %6919 = vmatpush3.bf16.msra.mxu0 %v9523_v54 }
 0x4b5   : > { %6909 = vmatpush3.bf16.msra.mxu1 %v9159_v56  ;;  %6920 = vmatprep.subr.bf16.mxu0 %v7458_v50 }
 0x4b6   : > { %6930 = vmatprep.subr.bf16.mxu1 %v7458_v50  ;;  %v9529_v27 = vpop.permute.xlu1 %4719 }
 0x4b7   : > { %v5236_v42 = vpop.permute.xlu0 %5235 }
 0x4b8   : > { %6911 = vmatmul.mubr.msk.bf16.vlgmr.msra.gmra.mxu1 %vm524_vm8, %v9370_v9  ;;  %5325 = vrot.lane.b32.xlu1 %v5236_v42, %s7455_s6 }
 0x4b9   : > { %6931 = vmatpush3.bf16.msra.mxu1 %v9508_v7  ;;  %6921 = vmatpush3.bf16.msra.mxu0 %v9521_v62 }
 0x4ba   : > { %6922 = vmatprep.subr.bf16.mxu0 %v7458_v50  ;;  %6932 = vmatprep.subr.bf16.mxu1 %v7458_v50  ;;  %v5232_v56 = vpop.permute.xlu1 %5231 }
 0x4bb   : > { %v9538_v61 = vpop.permute.xlu0 %5233  ;;  %6942 = vmatprep.mubr.msk.bf16.mxu1 %vm7459_vm7, %v7458_v50 }
 0x4bc   : > { %5323 = vrot.lane.b32.xlu0 %v9538_v61, %s7455_s6  ;;  %5321 = vrot.lane.b32.xlu1 %v5232_v56, %s7455_s6 }
 0x4bd   : > { %6933 = vmatpush3.bf16.msra.mxu1 %v9514_v10  ;;  %6923 = vmatpush3.bf16.msra.mxu0 %v9529_v27 }
 0x4be   : > { %6924 = vmatprep.subr.bf16.mxu0 %v7458_v50  ;;  %6934 = vmatprep.subr.bf16.mxu1 %v7458_v50  ;;  %v5228_v53 = vpop.permute.xlu1 %5227 }
 0x4bf   : > { %v5230_v32 = vpop.permute.xlu0 %5229 }
 0x4c0   : > { %5319 = vrot.lane.b32.xlu0 %v5230_v32, %s7455_s6  ;;  %5317 = vrot.lane.b32.xlu1 %v5228_v53, %s7455_s6  ;;  %s7460_s6 = smov 32  }
 0x4c1   : > { %6935 = vmatpush3.bf16.msra.mxu1 %v9523_v54  ;;  %6925 = vmatpush3.bf16.msra.mxu0 %v9380_v8 }
 0x4c2   : > { %6936 = vmatprep.subr.bf16.mxu1 %v7458_v50  ;;  %6946 = vmatprep.subr.bf16.mxu0 %v7458_v50 }
 0x4c4   : > { %6927 = vmatmul.mubr.msk.bf16.vlgmr.msra.gmra.mxu0 %vm524_vm8, %v9486_v22  ;;  %689 = vrot.lane.b32.xlu0 %v9560_v41, %s7460_s6 }
 0x4c5   : > { %6937 = vmatpush3.bf16.msra.mxu1 %v9521_v62  ;;  %6947 = vmatpush3.bf16.msra.mxu0 %v9441_v19 }
 0x4c6   : > { %880 = vrot.lane.b32.xlu1 %v9566_v14, %s7460_s6  ;;  %6938 = vmatprep.subr.bf16.mxu1 %v7458_v50 }
 0x4c7   : > { %6948 = vmatprep.subr.bf16.mxu0 %v7458_v50  ;;  %6958 = vmatprep.mubr.msk.bf16.mxu0 %vm7459_vm7, %v7458_v50 }
 0x4c8   : > { %1189 = vrot.lane.b32.xlu0 %v9576_v43, %s7460_s6 }
 0x4c9   : > { %6939 = vmatpush3.bf16.msra.mxu1 %v9529_v27  ;;  %6949 = vmatpush3.bf16.msra.mxu0 %v9447_v4 }
 0x4ca   : > { %1488 = vrot.lane.b32.xlu1 %v9586_v59, %s7460_s6  ;;  %6940 = vmatprep.subr.bf16.mxu1 %v7458_v50 }
 0x4cb   : > { %6950 = vmatprep.subr.bf16.mxu0 %v7458_v50 }
 0x4cc   : > { %1787 = vrot.lane.b32.xlu0 %v9594_v31, %s7460_s6 }
 0x4cd   : > { %6941 = vmatpush3.bf16.msra.mxu1 %v9380_v8  ;;  %6951 = vmatpush3.bf16.msra.mxu0 %v9453_v0 }
 0x4ce   : > { %2086 = vrot.lane.b32.xlu1 %v9602_v15, %s7460_s6  ;;  %6952 = vmatprep.subr.bf16.mxu0 %v7458_v50 }
 0x4cf   : > { %6962 = vmatprep.subr.bf16.mxu1 %v7458_v50 }
 0x4d0   : > { %2385 = vrot.lane.b32.xlu0 %v9610_v3, %s7460_s6  ;;  %6943 = vmatmul.mubr.msk.bf16.vlgmr.msra.gmra.mxu1 %vm524_vm8, %v9493_v60 }
 0x4d1   : > { %6953 = vmatpush3.bf16.msra.mxu0 %v9459_v38  ;;  %6974 = vmatprep.mubr.msk.bf16.mxu1 %vm7459_vm7, %v7458_v50 }
 0x4d2   : > { %2684 = vrot.lane.b32.xlu1 %v9618_v57, %s7460_s6  ;;  %6954 = vmatprep.subr.bf16.mxu0 %v7458_v50 }
 0x4d4   : > { %2983 = vrot.lane.b32.xlu0 %v9629_v12, %s7460_s6 }
 0x4d5   : > { %6955 = vmatpush3.bf16.msra.mxu0 %v9468_v34 }
 0x4d6   : > { %3282 = vrot.lane.b32.xlu1 %v9633_v33, %s7460_s6  ;;  %6956 = vmatprep.subr.bf16.mxu0 %v7458_v50 }
 0x4d8   : > { %3581 = vrot.lane.b32.xlu0 %v9640_v51, %s7460_s6 }
 0x4d9   : > { %6957 = vmatpush3.bf16.msra.mxu0 %v9274_v36 }
 0x4da   : > { %6978 = vmatprep.subr.bf16.mxu0 %v7458_v50 }
 0x4dc   : > { %6959 = vmatmul.mubr.msk.bf16.vlgmr.msra.gmra.mxu0 %vm524_vm8, %v9370_v9 }
 0x4dd   : > { %6990 = vmatprep.mubr.msk.bf16.mxu0 %vm7459_vm7, %v7458_v50 }
 0x4e1   : > { %v3872_v55 = vpop.f32.mrf.mxu1 }
 0x4e2   : > { %v3878_v2 = vadd.f32 %v3872_v55, %v9480_v17 }
 0x4e3   : > { %v6784_v37 = vpop.f32.mrf.mxu1  ;;  %v4075_v47 = vpop.f32.mrf.mxu0 }
 0x4e4   : > { %v9658_v63 = vadd.f32 %v3878_v2, %v9552_v20 }
 0x4e5   : > { %v3875_v26 = vpop.f32.mrf.mxu1  ;;  %v6800_v16 = vpop.f32.mrf.mxu0 }
 0x4e6   : > { %3880 = vrot.lane.b32.xlu1 %v9658_v63, %s7460_s6 }
 0x4e7   : > { %v6785_v36 = vpop.f32.mrf.mxu1  ;;  %v4078_v58 = vpop.f32.mrf.mxu0 }
 0x4e9   : > { %v6801_v25 = vpop.f32.mrf.mxu0 }
 0x4f9   : > { %v4115_v44 = vpop.f32.mrf.mxu1 }
 0x4fa   : > { %v4116_v29 = vadd.f32 %v4115_v44, %v4075_v47 }
 0x4fb   : > { %v6816_v1 = vpop.f32.mrf.mxu1 }
 0x4fd   : > { %v4118_v46 = vpop.f32.mrf.mxu1 }
 0x4ff   : > { %v6817_v30 = vpop.f32.mrf.mxu1 }
 0x503   : > { %v4171_v6 = vpop.f32.mrf.mxu0 }
 0x504   : > { %v4177_v19 = vadd.f32 %v4171_v6, %v4116_v29 }
 0x505   : > { %v6832_v5 = vpop.f32.mrf.mxu0 }
 0x506   : > { %v9663_v35 = vadd.f32 %v4177_v19, %v9552_v20  ;;  %v5027_v4 = vpop.permute.xlu0 %5026 }
 0x507   : > { %6963 = vmatpush3.bf16.msra.mxu1 %v5027_v4  ;;  %6979 = vmatpush3.bf16.msra.mxu0 %v5027_v4  ;;  %v4174_v0 = vpop.f32.mrf.mxu0 }
 0x508   : > { %4179 = vrot.lane.b32.xlu0 %v9663_v35, %s7460_s6  ;;  %6964 = vmatprep.subr.bf16.mxu1 %v7458_v50 }
 0x509   : > { %6980 = vmatprep.subr.bf16.mxu0 %v7458_v50  ;;  %v6833_v13 = vpop.f32.mrf.mxu0 }
 0x50a   : > { %v5025_v21 = vpop.permute.xlu1 %5024 }
 0x50b   : > { %6965 = vmatpush3.bf16.msra.mxu1 %v5025_v21  ;;  %6981 = vmatpush3.bf16.msra.mxu0 %v5025_v21 }
 0x50c   : > { %6966 = vmatprep.subr.bf16.mxu1 %v7458_v50  ;;  %6982 = vmatprep.subr.bf16.mxu0 %v7458_v50 }
 0x510   : > { %v5023_v52 = vpop.permute.xlu0 %5022 }
 0x511   : > { %6967 = vmatpush3.bf16.msra.mxu1 %v5023_v52  ;;  %6983 = vmatpush3.bf16.msra.mxu0 %v5023_v52  ;;  %v4374_v38 = vpop.f32.mrf.mxu1 }
 0x512   : > { %6968 = vmatprep.subr.bf16.mxu1 %v7458_v50  ;;  %6984 = vmatprep.subr.bf16.mxu0 %v7458_v50 }
 0x513   : > { %v5021_v49 = vpop.permute.xlu1 %5020  ;;  %v6848_v48 = vpop.f32.mrf.mxu1 }
 0x515   : > { %6969 = vmatpush3.bf16.msra.mxu1 %v5021_v49  ;;  %6985 = vmatpush3.bf16.msra.mxu0 %v5021_v49  ;;  %v4377_v34 = vpop.f32.mrf.mxu1 }
 0x516   : > { %6970 = vmatprep.subr.bf16.mxu1 %v7458_v50  ;;  %6986 = vmatprep.subr.bf16.mxu0 %v7458_v50 }
 0x517   : > { %v5019_v45 = vpop.permute.xlu0 %5018  ;;  %v6849_v23 = vpop.f32.mrf.mxu1 }
 0x519   : > { %6971 = vmatpush3.bf16.msra.mxu1 %v5019_v45  ;;  %6987 = vmatpush3.bf16.msra.mxu0 %v5019_v45 }
 0x51a   : > { %6972 = vmatprep.subr.bf16.mxu1 %v7458_v50  ;;  %6988 = vmatprep.subr.bf16.mxu0 %v7458_v50 }
 0x51b   : > { %v4414_v17 = vpop.f32.mrf.mxu0 }
 0x51c   : > { %v4415_v18 = vadd.f32 %v4414_v17, %v4374_v38 }
 0x51d   : > { %6973 = vmatpush3.bf16.msra.mxu1 %v9466_v39  ;;  %6989 = vmatpush3.bf16.msra.mxu0 %v9466_v39  ;;  %v6864_v11 = vpop.f32.mrf.mxu0 }
 0x51e   : > { %6994 = vmatprep.subr.bf16.mxu1 %v7458_v50  ;;  %7010 = vmatprep.subr.bf16.mxu0 %v7458_v50 }
 0x51f   : > { %v4417_v28 = vpop.f32.mrf.mxu0 }
 0x520   : > { %6975 = vmatmul.mubr.msk.bf16.vlgmr.msra.gmra.mxu1 %vm524_vm8, %v9486_v22  ;;  %6991 = vmatmul.mubr.msk.bf16.vlgmr.msra.gmra.mxu0 %vm524_vm8, %v9493_v60 }
 0x521   : > { %6995 = vmatpush3.bf16.msra.mxu1 %v9508_v7  ;;  %7006 = vmatprep.mubr.msk.bf16.mxu1 %vm7459_vm7, %v7458_v50  ;;  %v6865_v40 = vpop.f32.mrf.mxu0 }
 0x522   : > { %6996 = vmatprep.subr.bf16.mxu1 %v7458_v50  ;;  %7022 = vmatprep.mubr.msk.bf16.mxu0 %vm7459_vm7, %v7458_v50 }
 0x525   : > { %6997 = vmatpush3.bf16.msra.mxu1 %v9514_v10 }
 0x526   : > { %6998 = vmatprep.subr.bf16.mxu1 %v7458_v50 }
 0x529   : > { %6999 = vmatpush3.bf16.msra.mxu1 %v9523_v54 }
 0x52a   : > { %7000 = vmatprep.subr.bf16.mxu1 %v7458_v50  ;;  %v5326_v39 = vpop.permute.xlu1 %5325 }
 0x52b   : > { %7011 = vmatpush3.bf16.msra.mxu0 %v5326_v39 }
 0x52c   : > { %7012 = vmatprep.subr.bf16.mxu0 %v7458_v50 }
 0x52d   : > { %7001 = vmatpush3.bf16.msra.mxu1 %v9521_v62 }
 0x52e   : > { %v5324_v60 = vpop.permute.xlu0 %5323  ;;  %7002 = vmatprep.subr.bf16.mxu1 %v7458_v50  ;;  %v5322_v24 = vpop.permute.xlu1 %5321 }
 0x52f   : > { %7013 = vmatpush3.bf16.msra.mxu0 %v5324_v60 }
 0x530   : > { %7014 = vmatprep.subr.bf16.mxu0 %v7458_v50 }
 0x531   : > { %7003 = vmatpush3.bf16.msra.mxu1 %v9529_v27 }
 0x532   : > { %7004 = vmatprep.subr.bf16.mxu1 %v7458_v50  ;;  %v5320_v7 = vpop.permute.xlu0 %5319  ;;  %v5318_v10 = vpop.permute.xlu1 %5317 }
 0x533   : > { %7015 = vmatpush3.bf16.msra.mxu0 %v5322_v24 }
 0x534   : > { %7016 = vmatprep.subr.bf16.mxu0 %v7458_v50 }
 0x535   : > { %7005 = vmatpush3.bf16.msra.mxu1 %v9380_v8 }
 0x536   : > { %v690_v0 = vpop.permute.xlu0 %689 }
 0x537   : > { %7017 = vmatpush3.bf16.msra.mxu0 %v5320_v7  ;;  %v691_v28 = vsel %vm688_vm9, %v690_v0, %v9560_v41 }
 0x538   : > { %7007 = vmatmul.mubr.msk.bf16.vlgmr.msra.gmra.mxu1 %vm524_vm8, %v9370_v9  ;;  %7018 = vmatprep.subr.bf16.mxu0 %v7458_v50 }
 0x53a   : > { %v1190_v52 = vpop.permute.xlu0 %1189 }
 0x53b   : > { %7019 = vmatpush3.bf16.msra.mxu0 %v5318_v10  ;;  %v1191_v40 = vsel %vm688_vm9, %v1190_v52, %v9576_v43 }
 0x53c   : > { %7020 = vmatprep.subr.bf16.mxu0 %v7458_v50 }
 0x53e   : > { %v1788_v11 = vpop.permute.xlu0 %1787 }
 0x53f   : > { %7021 = vmatpush3.bf16.msra.mxu0 %v9538_v61  ;;  %v1789_v60 = vsel %vm688_vm9, %v1788_v11, %v9594_v31 }
 0x542   : > { %7023 = vmatmul.mubr.msk.bf16.vlgmr.msra.gmra.mxu0 %vm524_vm8, %v9486_v22  ;;  %v2386_v39 = vpop.permute.xlu0 %2385 }
 0x543   : > { %v2387_v7 = vsel %vm688_vm9, %v2386_v39, %v9610_v3 }
 0x546   : > { %v2984_v24 = vpop.permute.xlu0 %2983 }
 0x547   : > { %v2985_v10 = vsel %vm688_vm9, %v2984_v24, %v9629_v12 }
 0x560   : > { %v4470_v62 = vpop.f32.mrf.mxu1  ;;  %v4673_v54 = vpop.f32.mrf.mxu0 }
 0x561   : > { %v4476_v27 = vadd.f32 %v4470_v62, %v4415_v18 }
 0x562   : > { %v6880_v8 = vpop.f32.mrf.mxu1  ;;  %v6896_v42 = vpop.f32.mrf.mxu0 }
 0x563   : > { %v9711_v56 = vadd.f32 %v4476_v27, %v9552_v20 }
 0x564   : > { %v4473_v9 = vpop.f32.mrf.mxu1  ;;  %v4676_v53 = vpop.f32.mrf.mxu0 }
 0x565   : > { %4478 = vrot.lane.b32.xlu1 %v9711_v56, %s7460_s6 }
 0x566   : > { %v6881_v32 = vpop.f32.mrf.mxu1  ;;  %v6897_v50 = vpop.f32.mrf.mxu0 }
 0x567   : > { %v881_v32 = vpop.permute.xlu1 %880 }
 0x578   : > { %v4713_v55 = vpop.f32.mrf.mxu1 }
 0x579   : > { %v4714_v22 = vadd.f32 %v4713_v55, %v4673_v54  ;;  %v3582_v54 = vpop.permute.xlu0 %3581 }
 0x57a   : > { %v6912_v61 = vpop.f32.mrf.mxu1  ;;  %v3583_v8 = vsel %vm688_vm9, %v3582_v54, %v9640_v51 }
 0x57c   : > { %v4716_v2 = vpop.f32.mrf.mxu1 }
 0x57d   : > { %v4180_v9 = vpop.permute.xlu0 %4179 }
 0x57e   : > { %v6913_v37 = vpop.f32.mrf.mxu1  ;;  %v4181_v50 = vsel %vm688_vm9, %v4180_v9, %v9663_v35 }
 0x584   : > { %v4769_v47 = vpop.f32.mrf.mxu0 }
 0x585   : > { %v4775_v26 = vadd.f32 %v4769_v47, %v4714_v22 }
 0x586   : > { %v6928_v16 = vpop.f32.mrf.mxu0 }
 0x587   : > { %v9716_v36 = vadd.f32 %v4775_v26, %v9552_v20  ;;  %v1489_v26 = vpop.permute.xlu1 %1488 }
 0x588   : > { %v4772_v58 = vpop.f32.mrf.mxu0 }
 0x589   : > { %4777 = vrot.lane.b32.xlu0 %v9716_v36, %s7460_s6 }
 0x58a   : > { %v6929_v25 = vpop.f32.mrf.mxu0 }
 0x590   : > { %v4972_v44 = vpop.f32.mrf.mxu1 }
 0x592   : > { %v6944_v1 = vpop.f32.mrf.mxu1 }
 0x593   : > { %v2087_v1 = vpop.permute.xlu1 %2086 }
 0x594   : > { %v4975_v46 = vpop.f32.mrf.mxu1 }
 0x595   : > { %v1490_v46 = vsel %vm688_vm9, %v1489_v26, %v9586_v59 }
 0x596   : > { %v6945_v30 = vpop.f32.mrf.mxu1 }
 0x597   : > { %v2088_v30 = vsel %vm688_vm9, %v2087_v1, %v9602_v15 }
 0x59c   : > { %v5012_v29 = vpop.f32.mrf.mxu0 }
 0x59d   : > { %v5013_v6 = vadd.f32 %v5012_v29, %v4972_v44  ;;  %v882_v44 = vsel %vm688_vm9, %v881_v32, %v9566_v14 }
 0x59e   : > { %v6960_v19 = vpop.f32.mrf.mxu0 }
 0x5a0   : > { %v5015_v5 = vpop.f32.mrf.mxu0 }
 0x5a2   : > { %v6961_v4 = vpop.f32.mrf.mxu0 }
 0x5e0   : > { %v5068_v13 = vpop.f32.mrf.mxu1  ;;  %v5271_v21 = vpop.f32.mrf.mxu0 }
 0x5e1   : > { %v5074_v38 = vadd.f32 %v5068_v13, %v5013_v6 }
 0x5e2   : > { %v6976_v49 = vpop.f32.mrf.mxu1  ;;  %v6992_v48 = vpop.f32.mrf.mxu0 }
 0x5e3   : > { %v9721_v34 = vadd.f32 %v5074_v38, %v9552_v20 }
 0x5e4   : > { %v5071_v45 = vpop.f32.mrf.mxu1  ;;  %v5274_v23 = vpop.f32.mrf.mxu0 }
 0x5e5   : > { %5076 = vrot.lane.b32.xlu1 %v9721_v34, %s7460_s6 }
 0x5e6   : > { %v6977_v17 = vpop.f32.mrf.mxu1  ;;  %v6993_v18 = vpop.f32.mrf.mxu0 }
 0x5e9   : > { %692 = vrot.lane.b32.xlu1 %v691_v28, %s7460_s6 }
 0x5ed   : > { %1192 = vrot.lane.b32.xlu1 %v1191_v40, %s7460_s6 }
 0x5f1   : > { %1790 = vrot.lane.b32.xlu1 %v1789_v60, %s7460_s6 }
 0x5f5   : > { %2388 = vrot.lane.b32.xlu1 %v2387_v7, %s7460_s6 }
 0x5f8   : > { %v5311_v62 = vpop.f32.mrf.mxu1 }
 0x5f9   : > { %2986 = vrot.lane.b32.xlu1 %v2985_v10, %s7460_s6  ;;  %v5312_v55 = vadd.f32 %v5311_v62, %v5271_v21 }
 0x5fa   : > { %v7008_v27 = vpop.f32.mrf.mxu1 }
 0x5fb   : > { %v4778_v61 = vpop.permute.xlu0 %4777 }
 0x5fc   : > { %v5314_v42 = vpop.f32.mrf.mxu1  ;;  %v4779_v22 = vsel %vm688_vm9, %v4778_v61, %v9716_v36 }
 0x5fd   : > { %3584 = vrot.lane.b32.xlu1 %v3583_v8, %s7460_s6 }
 0x5fe   : > { %v7009_v53 = vpop.f32.mrf.mxu1 }
 0x601   : > { %4182 = vrot.lane.b32.xlu1 %v4181_v50, %s7460_s6 }
 0x602   : > { %v5367_v2 = vpop.f32.mrf.mxu0 }
 0x603   : > { %v5373_v37 = vadd.f32 %v5367_v2, %v5312_v55 }
 0x604   : > { %v7024_v47 = vpop.f32.mrf.mxu0 }
 0x605   : > { %v9749_v16 = vadd.f32 %v5373_v37, %v9552_v20  ;;  %4780 = vrot.lane.b32.xlu1 %v4779_v22, %s7460_s6  ;;  %v2685_v20 = vpop.permute.xlu1 %2684 }
 0x606   : > { %v5370_v58 = vpop.f32.mrf.mxu0  ;;  %v2686_v29 = vsel %vm688_vm9, %v2685_v20, %v9618_v57 }
 0x607   : > { %5375 = vrot.lane.b32.xlu0 %v9749_v16, %s7460_s6 }
 0x608   : > { %v7025_v25 = vpop.f32.mrf.mxu0 }
 0x609   : > { %v3283_v6 = vpop.permute.xlu1 %3282 }
 0x60a   : > { %v3284_v19 = vsel %vm688_vm9, %v3283_v6, %v9633_v33 }
 0x60b   : > { %883 = vrot.lane.b32.xlu0 %v882_v44, %s7460_s6 }
 0x60d   : > { %v3881_v5 = vpop.permute.xlu1 %3880 }
 0x60e   : > { %v3882_v4 = vsel %vm688_vm9, %v3881_v5, %v9658_v63 }
 0x60f   : > { %1491 = vrot.lane.b32.xlu0 %v1490_v46, %s7460_s6 }
 0x611   : > { %v4479_v0 = vpop.permute.xlu1 %4478 }
 0x612   : > { %v4480_v13 = vsel %vm688_vm9, %v4479_v0, %v9711_v56 }
 0x613   : > { %2089 = vrot.lane.b32.xlu0 %v2088_v30, %s7460_s6 }
 0x617   : > { %2687 = vrot.lane.b32.xlu0 %v2686_v29, %s7460_s6  ;;  %v205_v29 = vlaneseq }
 0x619   : > { %v9829_v6 = vand.u32 127, %v205_v29  ;;  %v209_v5 = vshrl.u32 %v205_v29, 7 }
 0x61b   : > { %3285 = vrot.lane.b32.xlu0 %v3284_v19, %s7460_s6  ;;  %vm207_vm10 = vcmp.eq.s32.totalorder %v9829_v6, 0 }
 0x61f   : > { %3883 = vrot.lane.b32.xlu0 %v3882_v4, %s7460_s6  ;;  %v7462_v4 = vmov 1983009808  }
 0x620   : > { %v908_v0 = vunpack.c.l.s4 %v7462_v4 }
 0x623   : > { %4481 = vrot.lane.b32.xlu0 %v4480_v13, %s7460_s6 }
 0x657   : > { %v5077_v21 = vpop.permute.xlu1 %5076 }
 0x658   : > { %v5078_v52 = vsel %vm688_vm9, %v5077_v21, %v9721_v34 }
 0x659   : > { %5079 = vrot.lane.b32.xlu0 %v5078_v52, %s7460_s6 }
 0x65b   : > { %v693_v38 = vpop.permute.xlu1 %692 }
 0x65c   : > { %v694_v49 = vsel %vm688_vm9, %v693_v38, %v9560_v41 }
 0x65d   : > { %698 = vrot.lane.b32.xlu0 %v694_v49, %s7461_s29  ;;  %v214_v49 = vand.u32 1, %v209_v5 }
 0x65f   : > { %v1193_v48 = vpop.permute.xlu1 %1192  ;;  %vm9858_vm11 = vcmp.eq.s32.totalorder %v214_v49, 0 }
 0x660   : > { %v1194_v45 = vsel %vm688_vm9, %v1193_v48, %v9576_v43 }
 0x661   : > { %1196 = vrot.lane.b32.xlu0 %v1194_v45, %s7461_s29 }
 0x663   : > { %v1791_v23 = vpop.permute.xlu1 %1790 }
 0x664   : > { %v1792_v17 = vsel %vm688_vm9, %v1791_v23, %v9594_v31  ;;  %v909_v23 = vunpack.c.0.s8 %v908_v0 }
 0x665   : > { %1794 = vrot.lane.b32.xlu0 %v1792_v17, %s7461_s29 }
 0x667   : > { %v2389_v18 = vpop.permute.xlu1 %2388 }
 0x668   : > { %v2390_v11 = vsel %vm688_vm9, %v2389_v18, %v9610_v3 }
 0x669   : > { %2392 = vrot.lane.b32.xlu0 %v2390_v11, %s7461_s29 }
 0x66b   : > { %v2987_v28 = vpop.permute.xlu1 %2986 }
 0x66c   : > { %v2988_v40 = vsel %vm688_vm9, %v2987_v28, %v9629_v12 }
 0x66d   : > { %2990 = vrot.lane.b32.xlu0 %v2988_v40, %s7461_s29 }
 0x66f   : > { %v3585_v39 = vpop.permute.xlu1 %3584 }
 0x670   : > { %v3586_v60 = vsel %vm688_vm9, %v3585_v39, %v9640_v51 }
 0x671   : > { %3588 = vrot.lane.b32.xlu0 %v3586_v60, %s7461_s29 }
 0x673   : > { %v4183_v24 = vpop.permute.xlu1 %4182 }
 0x674   : > { %v4184_v7 = vsel %vm688_vm9, %v4183_v24, %v9663_v35 }
 0x675   : > { %4186 = vrot.lane.b32.xlu0 %v4184_v7, %s7461_s29  ;;  %v9868_v7 = vsub.s32 %v909_v23, %v209_v5 }
 0x677   : > { %v4781_v10 = vpop.permute.xlu1 %4780 }
 0x678   : > { %v4782_v62 = vsel %vm688_vm9, %v4781_v10, %v9716_v36 }
 0x679   : > { %4784 = vrot.lane.b32.xlu0 %v4782_v62, %s7461_s29  ;;  %v5376_v54 = vpop.permute.xlu0 %5375 }
 0x67a   : > { %v5377_v27 = vsel %vm688_vm9, %v5376_v54, %v9749_v16 }
 0x67b   : > { %5378 = vrot.lane.b32.xlu1 %v5377_v27, %s7460_s6 }
 0x67d   : > { %v884_v8 = vpop.permute.xlu0 %883 }
 0x67e   : > { %v885_v42 = vsel %vm688_vm9, %v884_v8, %v9566_v14 }
 0x67f   : > { %887 = vrot.lane.b32.xlu1 %v885_v42, %s7461_s29 }
 0x681   : > { %v1492_v9 = vpop.permute.xlu0 %1491 }
 0x682   : > { %v1493_v53 = vsel %vm688_vm9, %v1492_v9, %v9586_v59 }
 0x683   : > { %1495 = vrot.lane.b32.xlu1 %v1493_v53, %s7461_s29 }
 0x685   : > { %v2090_v32 = vpop.permute.xlu0 %2089 }
 0x686   : > { %v2091_v50 = vsel %vm688_vm9, %v2090_v32, %v9602_v15 }
 0x687   : > { %2093 = vrot.lane.b32.xlu1 %v2091_v50, %s7461_s29 }
 0x689   : > { %v2688_v55 = vpop.permute.xlu0 %2687 }
 0x68a   : > { %v2689_v61 = vsel %vm688_vm9, %v2688_v55, %v9618_v57 }
 0x68b   : > { %2691 = vrot.lane.b32.xlu1 %v2689_v61, %s7461_s29 }
 0x68d   : > { %v3286_v2 = vpop.permute.xlu0 %3285 }
 0x68e   : > { %v3287_v37 = vsel %vm688_vm9, %v3286_v2, %v9633_v33 }
 0x68f   : > { %3289 = vrot.lane.b32.xlu1 %v3287_v37, %s7461_s29 }
 0x691   : > { %v3884_v22 = vpop.permute.xlu0 %3883 }
 0x692   : > { %v3885_v47 = vsel %vm688_vm9, %v3884_v22, %v9658_v63 }
 0x693   : > { %3887 = vrot.lane.b32.xlu1 %v3885_v47, %s7461_s29 }
 0x695   : > { %v4482_v26 = vpop.permute.xlu0 %4481 }
 0x696   : > { %v4483_v58 = vsel %vm688_vm9, %v4482_v26, %v9711_v56 }
 0x697   : > { %4485 = vrot.lane.b32.xlu1 %v4483_v58, %s7461_s29 }
 0x6cb   : > { %v5080_v25 = vpop.permute.xlu0 %5079 }
 0x6cc   : > { %v5081_v44 = vsel %vm688_vm9, %v5080_v25, %v9721_v34 }
 0x6cd   : > { %5083 = vrot.lane.b32.xlu1 %v5081_v44, %s7461_s29 }
 0x6cf   : > { %v699_v1 = vpop.permute.xlu0 %698 }
 0x6d0   : > { %v701_v13 = vsel %vm207_vm10, %v9560_v41, %v699_v1 }
 0x6d1   : > { %v702_v18 = vadd.f32 %v701_v13, %v9560_v41 }
 0x6d3   : > { %v1197_v46 = vpop.permute.xlu0 %1196  ;;  %v892_v54 = vrot.slane %v702_v18, 1 }
 0x6d4   : > { %v1199_v21 = vsel %vm207_vm10, %v9576_v43, %v1197_v46 }
 0x6d5   : > { %v1200_v11 = vadd.f32 %v1199_v21, %v9576_v43 }
 0x6d7   : > { %v1795_v20 = vpop.permute.xlu0 %1794  ;;  %v1202_v27 = vrot.slane %v1200_v11, 7  ;;  %v1500_v8 = vrot.slane %v1200_v11, 1 }
 0x6d8   : > { %v1797_v48 = vsel %vm207_vm10, %v9594_v31, %v1795_v20 }
 0x6d9   : > { %v9853_v40 = vadd.f32 %v1797_v48, %v9594_v31 }
 0x6db   : > { %v2393_v30 = vpop.permute.xlu0 %2392  ;;  %v1800_v42 = vrot.slane %v9853_v40, 7  ;;  %v2098_v9 = vrot.slane %v9853_v40, 1 }
 0x6dc   : > { %v2395_v17 = vsel %vm207_vm10, %v9610_v3, %v2393_v30 }
 0x6dd   : > { %v9863_v41 = vadd.f32 %v2395_v17, %v9610_v3 }
 0x6df   : > { %v2991_v19 = vpop.permute.xlu0 %2990  ;;  %v2398_v50 = vrot.slane %v9863_v41, 7  ;;  %v2696_v55 = vrot.slane %v9863_v41, 1 }
 0x6e0   : > { %v2993_v28 = vsel %vm207_vm10, %v9629_v12, %v2991_v19 }
 0x6e1   : > { %v9871_v31 = vadd.f32 %v2993_v28, %v9629_v12 }
 0x6e3   : > { %v3589_v52 = vpop.permute.xlu0 %3588  ;;  %v2996_v61 = vrot.slane %v9871_v31, 7  ;;  %v3294_v47 = vrot.slane %v9871_v31, 1 }
 0x6e4   : > { %v3591_v39 = vsel %vm207_vm10, %v9640_v51, %v3589_v52 }
 0x6e5   : > { %v9876_v3 = vadd.f32 %v3591_v39, %v9640_v51 }
 0x6e7   : > { %v4187_v10 = vpop.permute.xlu0 %4186  ;;  %v3594_v26 = vrot.slane %v9876_v3, 7  ;;  %v3892_v29 = vrot.slane %v9876_v3, 1 }
 0x6ed   : > { %v5379_v38 = vpop.permute.xlu1 %5378 }
 0x6ee   : > { %v5380_v45 = vsel %vm688_vm9, %v5379_v38, %v9749_v16 }
 0x6ef   : > { %5382 = vrot.lane.b32.xlu0 %v5380_v45, %s7461_s29 }
 0x6f1   : > { %v888_v60 = vpop.permute.xlu1 %887 }
 0x6f2   : > { %v890_v43 = vsel %vm207_vm10, %v9566_v14, %v888_v60 }
 0x6f3   : > { %v891_v62 = vadd.f32 %v890_v43, %v9566_v14  ;;  %v4189_v14 = vsel %vm207_vm10, %v9663_v35, %v4187_v10 }
 0x6f4   : > { %v9901_v44 = vadd.f32 %v4189_v14, %v9663_v35 }
 0x6f5   : > { %v893_v53 = vrot.slane %v891_v62, 7  ;;  %v1201_v32 = vrot.slane %v891_v62, 1  ;;  %v1496_v12 = vpop.permute.xlu1 %1495 }
 0x6f6   : > { %v1498_v51 = vsel %vm207_vm10, %v9586_v59, %v1496_v12  ;;  %v4192_v48 = vrot.slane %v9901_v44, 7 }
 0x6f7   : > { %v896_v2 = vsel %vm9858_vm11, %v892_v54, %v893_v53  ;;  %v1203_v37 = vsel %vm9858_vm11, %v1201_v32, %v1202_v27  ;;  %v1499_v22 = vadd.f32 %v1498_v51, %v9586_v59 }
 0x6f8   : > { %v903_v58 = vsel %vm9858_vm11, %v891_v62, %v896_v2  ;;  %v1204_v25 = vadd.f32 %v1203_v37, %v1200_v11  ;;  %v4785_v2 = vpop.permute.xlu0 %4784 }
 0x6f9   : > { %v904_v1 = vadd.f32 %v903_v58, %v891_v62  ;;  %v1501_v46 = vrot.slane %v1499_v22, 7  ;;  %v1799_v20 = vrot.slane %v1499_v22, 1  ;;  %v2094_v30 = vpop.permute.xlu1 %2093  ;;  %v4490_v58 = vrot.slane %v9901_v44, 1 }
 0x6fa   : > { %v1206_v19 = vcombine.high %v1204_v25, %v1204_v25  ;;  %v1213_v59 = vrot.slane %v1204_v25, %v9868_v7  ;;  %v2096_v5 = vsel %vm207_vm10, %v9602_v15, %v2094_v30 }
 0x6fb   : > { %v906_v4 = vcombine.high %v904_v1, %v904_v1  ;;  %v913_v0 = vrot.slane %v904_v1, %v9868_v7  ;;  %v1502_v35 = vsel %vm9858_vm11, %v1500_v8, %v1501_v46  ;;  %v1801_v13 = vsel %vm9858_vm11, %v1799_v20, %v1800_v42 }
 0x6fc   : > { %v1220_v21 = vrot.slane %v1206_v19, %v9868_v7  ;;  %v1221_v52 = vcombine.high %v1213_v59, %v1213_v59  ;;  %1227 = vst.msk [vmem:[%s9914_s11 + $0x2] sm:$0x3] %vm927_vm12, %v1213_v59  ;;  %v1503_v38 = vadd.f32 %v1502_v35, %v1499_v22  ;;  %v1802_v49 = vadd.f32 %v1801_v13, %v9853_v40 }
 0x6fd   : > { %v920_v45 = vrot.slane %v906_v4, %v9868_v7  ;;  %v921_v23 = vcombine.high %v913_v0, %v913_v0  ;;  %928 = vst.msk [vmem:[%s9914_s11] sm:$0x3] %vm927_vm12, %v913_v0  ;;  %v2097_v17 = vadd.f32 %v2096_v5, %v9602_v15  ;;  %v2692_v18 = vpop.permute.xlu1 %2691  ;;  %v4787_v19 = vsel %vm207_vm10, %v9716_v36, %v4785_v2 }
 0x6fe   : > { %v1222_v11 = vcombine.high %v1220_v21, %v1220_v21  ;;  %1228 = vst.msk [vmem:[%s9914_s11 + $0x22] sm:$0x3] %vm927_vm12, %v1221_v52  ;;  %1229 = vst.msk [vmem:[%s9914_s11 + $0x42] sm:$0x3] %vm927_vm12, %v1220_v21  ;;  %v1505_v28 = vcombine.high %v1503_v38, %v1503_v38  ;;  %v1512_v39 = vrot.slane %v1503_v38, %v9868_v7 }
 0x6ff   : > { %v1804_v60 = vcombine.high %v1802_v49, %v1802_v49  ;;  %v922_v43 = vcombine.high %v920_v45, %v920_v45  ;;  %929 = vst.msk [vmem:[%s9914_s11 + $0x20] sm:$0x3] %vm927_vm12, %v921_v23  ;;  %930 = vst.msk [vmem:[%s9914_s11 + $0x40] sm:$0x3] %vm927_vm12, %v920_v45  ;;  %v1811_v15 = vrot.slane %v1802_v49, %v9868_v7  ;;  %v2099_v10 = vrot.slane %v2097_v17, 7 }
 0x700   : > { %v2397_v62 = vrot.slane %v2097_v17, 1  ;;  %1230 = vst.msk [vmem:[%s9914_s11 + $0x62] sm:$0x3] %vm927_vm12, %v1222_v11  ;;  %v1519_v54 = vrot.slane %v1505_v28, %v9868_v7  ;;  %v1520_v27 = vcombine.high %v1512_v39, %v1512_v39  ;;  %1526 = vst.msk [vmem:[%s9914_s11 + $0x4] sm:$0x3] %vm927_vm12, %v1512_v39  ;;  %v2694_v42 = vsel %vm207_vm10, %v9618_v57, %v2692_v18 }
 0x701   : > { %v1818_v8 = vrot.slane %v1804_v60, %v9868_v7  ;;  %931 = vst.msk [vmem:[%s9914_s11 + $0x60] sm:$0x3] %vm927_vm12, %v922_v43  ;;  %v1819_v53 = vcombine.high %v1811_v15, %v1811_v15  ;;  %1825 = vst.msk [vmem:[%s9914_s11 + $0x6] sm:$0x3] %vm927_vm12, %v1811_v15  ;;  %v2100_v32 = vsel %vm9858_vm11, %v2098_v9, %v2099_v10  ;;  %v3290_v51 = vpop.permute.xlu1 %3289 }
 0x702   : > { %v2399_v12 = vsel %vm9858_vm11, %v2397_v62, %v2398_v50  ;;  %v2695_v14 = vadd.f32 %v2694_v42, %v9618_v57  ;;  %v1521_v37 = vcombine.high %v1519_v54, %v1519_v54  ;;  %1527 = vst.msk [vmem:[%s9914_s11 + $0x24] sm:$0x3] %vm927_vm12, %v1520_v27  ;;  %1528 = vst.msk [vmem:[%s9914_s11 + $0x44] sm:$0x3] %vm927_vm12, %v1519_v54 }
 0x703   : > { %v1820_v22 = vcombine.high %v1818_v8, %v1818_v8  ;;  %1827 = vst.msk [vmem:[%s9914_s11 + $0x46] sm:$0x3] %vm927_vm12, %v1818_v8  ;;  %v2101_v40 = vadd.f32 %v2100_v32, %v2097_v17  ;;  %v2400_v9 = vadd.f32 %v2399_v12, %v9863_v41  ;;  %1826 = vst.msk [vmem:[%s9914_s11 + $0x26] sm:$0x3] %vm927_vm12, %v1819_v53 }
 0x704   : > { %v2697_v50 = vrot.slane %v2695_v14, 7  ;;  %v2995_v57 = vrot.slane %v2695_v14, 1  ;;  %v3292_v25 = vsel %vm207_vm10, %v9633_v33, %v3290_v51  ;;  %1529 = vst.msk [vmem:[%s9914_s11 + $0x64] sm:$0x3] %vm927_vm12, %v1521_v37  ;;  %v9993_v38 = vadd.f32 %v4787_v19, %v9716_v36 }
 0x705   : > { %1828 = vst.msk [vmem:[%s9914_s11 + $0x66] sm:$0x3] %vm927_vm12, %v1820_v22  ;;  %v2103_v1 = vcombine.high %v2101_v40, %v2101_v40  ;;  %v2110_v46 = vrot.slane %v2101_v40, %v9868_v7  ;;  %v2402_v20 = vcombine.high %v2400_v9, %v2400_v9  ;;  %v2409_v30 = vrot.slane %v2400_v9, %v9868_v7  ;;  %v3888_v0 = vpop.permute.xlu1 %3887 }
 0x706   : > { %v2698_v59 = vsel %vm9858_vm11, %v2696_v55, %v2697_v50  ;;  %v2997_v5 = vsel %vm9858_vm11, %v2995_v57, %v2996_v61  ;;  %v3293_v4 = vadd.f32 %v3292_v25, %v9633_v33  ;;  %v3890_v23 = vsel %vm207_vm10, %v9658_v63, %v3888_v0 }
 0x707   : > { %v2117_v35 = vrot.slane %v2103_v1, %v9868_v7  ;;  %v2118_v13 = vcombine.high %v2110_v46, %v2110_v46  ;;  %2124 = vst.msk [vmem:[%s9914_s11 + $0x8] sm:$0x3] %vm927_vm12, %v2110_v46  ;;  %v2416_v41 = vrot.slane %v2402_v20, %v9868_v7  ;;  %v2417_v55 = vcombine.high %v2409_v30, %v2409_v30 }
 0x708   : > { %2423 = vst.msk [vmem:[%s9914_s11 + $0xa] sm:$0x3] %vm927_vm12, %v2409_v30  ;;  %v2699_v21 = vadd.f32 %v2698_v59, %v2695_v14  ;;  %v2998_v52 = vadd.f32 %v2997_v5, %v9871_v31  ;;  %v3295_v61 = vrot.slane %v3293_v4, 7  ;;  %v3593_v33 = vrot.slane %v3293_v4, 1 }
 0x709   : > { %v2119_v49 = vcombine.high %v2117_v35, %v2117_v35  ;;  %2125 = vst.msk [vmem:[%s9914_s11 + $0x28] sm:$0x3] %vm927_vm12, %v2118_v13  ;;  %2126 = vst.msk [vmem:[%s9914_s11 + $0x48] sm:$0x3] %vm927_vm12, %v2117_v35  ;;  %v2418_v45 = vcombine.high %v2416_v41, %v2416_v41  ;;  %v4486_v28 = vpop.permute.xlu1 %4485  ;;  %v3891_v43 = vadd.f32 %v3890_v23, %v9658_v63  ;;  %v4790_v8 = vrot.slane %v9993_v38, 7 }
 0x70a   : > { %2424 = vst.msk [vmem:[%s9914_s11 + $0x2a] sm:$0x3] %vm927_vm12, %v2417_v55  ;;  %2425 = vst.msk [vmem:[%s9914_s11 + $0x4a] sm:$0x3] %vm927_vm12, %v2416_v41  ;;  %v2701_v17 = vcombine.high %v2699_v21, %v2699_v21  ;;  %v2708_v36 = vrot.slane %v2699_v21, %v9868_v7  ;;  %v3000_v18 = vcombine.high %v2998_v52, %v2998_v52 }
 0x70b   : > { %v3007_v11 = vrot.slane %v2998_v52, %v9868_v7  ;;  %2127 = vst.msk [vmem:[%s9914_s11 + $0x68] sm:$0x3] %vm927_vm12, %v2119_v49  ;;  %2426 = vst.msk [vmem:[%s9914_s11 + $0x6a] sm:$0x3] %vm927_vm12, %v2418_v45  ;;  %v3296_v39 = vsel %vm9858_vm11, %v3294_v47, %v3295_v61  ;;  %v3595_v60 = vsel %vm9858_vm11, %v3593_v33, %v3594_v26  ;;  %v3893_v54 = vrot.slane %v3891_v43, 7 }
 0x70c   : > { %v4488_v15 = vsel %vm207_vm10, %v9711_v56, %v4486_v28  ;;  %v2715_v10 = vrot.slane %v2701_v17, %v9868_v7  ;;  %v2716_v31 = vcombine.high %v2708_v36, %v2708_v36  ;;  %2722 = vst.msk [vmem:[%s9914_s11 + $0xc] sm:$0x3] %vm927_vm12, %v2708_v36  ;;  %v3014_v47 = vrot.slane %v3000_v18, %v9868_v7 }
 0x70d   : > { %v3015_v62 = vcombine.high %v3007_v11, %v3007_v11  ;;  %3021 = vst.msk [vmem:[%s9914_s11 + $0xe] sm:$0x3] %vm927_vm12, %v3007_v11  ;;  %v3297_v26 = vadd.f32 %v3296_v39, %v3293_v4  ;;  %v3596_v63 = vadd.f32 %v3595_v60, %v9876_v3  ;;  %v4191_v27 = vrot.slane %v3891_v43, 1 }
 0x70e   : > { %v2717_v42 = vcombine.high %v2715_v10, %v2715_v10  ;;  %2723 = vst.msk [vmem:[%s9914_s11 + $0x2c] sm:$0x3] %vm927_vm12, %v2716_v31  ;;  %2724 = vst.msk [vmem:[%s9914_s11 + $0x4c] sm:$0x3] %vm927_vm12, %v2715_v10  ;;  %v3016_v53 = vcombine.high %v3014_v47, %v3014_v47  ;;  %v4489_v32 = vadd.f32 %v4488_v15, %v9711_v56  ;;  %v5088_v60 = vrot.slane %v9993_v38, 1 }
 0x70f   : > { %3022 = vst.msk [vmem:[%s9914_s11 + $0x2e] sm:$0x3] %vm927_vm12, %v3015_v62  ;;  %3023 = vst.msk [vmem:[%s9914_s11 + $0x4e] sm:$0x3] %vm927_vm12, %v3014_v47  ;;  %v3299_v12 = vcombine.high %v3297_v26, %v3297_v26  ;;  %v3306_v14 = vrot.slane %v3297_v26, %v9868_v7  ;;  %v3598_v51 = vcombine.high %v3596_v63, %v3596_v63 }
 0x710   : > { %v3605_v2 = vrot.slane %v3596_v63, %v9868_v7  ;;  %2725 = vst.msk [vmem:[%s9914_s11 + $0x6c] sm:$0x3] %vm927_vm12, %v2717_v42  ;;  %3024 = vst.msk [vmem:[%s9914_s11 + $0x6e] sm:$0x3] %vm927_vm12, %v3016_v53  ;;  %v3894_v37 = vsel %vm9858_vm11, %v3892_v29, %v3893_v54  ;;  %v4193_v56 = vsel %vm9858_vm11, %v4191_v27, %v4192_v48  ;;  %v4491_v22 = vrot.slane %v4489_v32, 7 }
 0x711   : > { %v4789_v40 = vrot.slane %v4489_v32, 1  ;;  %v3313_v9 = vrot.slane %v3299_v12, %v9868_v7  ;;  %v3314_v50 = vcombine.high %v3306_v14, %v3306_v14  ;;  %3320 = vst.msk [vmem:[%s9914_s11 + $0x10] sm:$0x3] %vm927_vm12, %v3306_v14  ;;  %v3612_v3 = vrot.slane %v3598_v51, %v9868_v7 }
 0x712   : > { %v3613_v57 = vcombine.high %v3605_v2, %v3605_v2  ;;  %3619 = vst.msk [vmem:[%s9914_s11 + $0x12] sm:$0x3] %vm927_vm12, %v3605_v2  ;;  %v3895_v29 = vadd.f32 %v3894_v37, %v3891_v43  ;;  %v4194_v25 = vadd.f32 %v4193_v56, %v9901_v44  ;;  %v4492_v48 = vsel %vm9858_vm11, %v4490_v58, %v4491_v22 }
 0x713   : > { %v4791_v1 = vsel %vm9858_vm11, %v4789_v40, %v4790_v8  ;;  %v3315_v46 = vcombine.high %v3313_v9, %v3313_v9  ;;  %3321 = vst.msk [vmem:[%s9914_s11 + $0x30] sm:$0x3] %vm927_vm12, %v3314_v50  ;;  %3322 = vst.msk [vmem:[%s9914_s11 + $0x50] sm:$0x3] %vm927_vm12, %v3313_v9  ;;  %v3614_v20 = vcombine.high %v3612_v3, %v3612_v3 }
 0x714   : > { %3620 = vst.msk [vmem:[%s9914_s11 + $0x32] sm:$0x3] %vm927_vm12, %v3613_v57  ;;  %3621 = vst.msk [vmem:[%s9914_s11 + $0x52] sm:$0x3] %vm927_vm12, %v3612_v3  ;;  %v4493_v30 = vadd.f32 %v4492_v48, %v4489_v32  ;;  %v4792_v44 = vadd.f32 %v4791_v1, %v9993_v38  ;;  %v3897_v19 = vcombine.high %v3895_v29, %v3895_v29 }
 0x715   : > { %v3904_v58 = vrot.slane %v3895_v29, %v9868_v7  ;;  %v4196_v59 = vcombine.high %v4194_v25, %v4194_v25  ;;  %v4203_v5 = vrot.slane %v4194_v25, %v9868_v7  ;;  %3323 = vst.msk [vmem:[%s9914_s11 + $0x70] sm:$0x3] %vm927_vm12, %v3315_v46  ;;  %3622 = vst.msk [vmem:[%s9914_s11 + $0x72] sm:$0x3] %vm927_vm12, %v3614_v20 }
 0x716   : > { %v4495_v4 = vcombine.high %v4493_v30, %v4493_v30  ;;  %v4502_v0 = vrot.slane %v4493_v30, %v9868_v7  ;;  %v4794_v35 = vcombine.high %v4792_v44, %v4792_v44  ;;  %v4801_v13 = vrot.slane %v4792_v44, %v9868_v7 }
 0x717   : > { %v3911_v41 = vrot.slane %v3897_v19, %v9868_v7  ;;  %v3912_v55 = vcombine.high %v3904_v58, %v3904_v58  ;;  %3918 = vst.msk [vmem:[%s9914_s11 + $0x14] sm:$0x3] %vm927_vm12, %v3904_v58  ;;  %v4210_v21 = vrot.slane %v4196_v59, %v9868_v7  ;;  %v4211_v52 = vcombine.high %v4203_v5, %v4203_v5 }
 0x718   : > { %4217 = vst.msk [vmem:[%s9914_s11 + $0x16] sm:$0x3] %vm927_vm12, %v4203_v5  ;;  %v4509_v61 = vrot.slane %v4495_v4, %v9868_v7  ;;  %v4510_v33 = vcombine.high %v4502_v0, %v4502_v0  ;;  %4516 = vst.msk [vmem:[%s9914_s11 + $0x18] sm:$0x3] %vm927_vm12, %v4502_v0  ;;  %v4808_v49 = vrot.slane %v4794_v35, %v9868_v7 }
 0x719   : > { %v4809_v45 = vcombine.high %v4801_v13, %v4801_v13  ;;  %4815 = vst.msk [vmem:[%s9914_s11 + $0x1a] sm:$0x3] %vm927_vm12, %v4801_v13  ;;  %v3913_v23 = vcombine.high %v3911_v41, %v3911_v41  ;;  %3919 = vst.msk [vmem:[%s9914_s11 + $0x34] sm:$0x3] %vm927_vm12, %v3912_v55  ;;  %v4212_v17 = vcombine.high %v4210_v21, %v4210_v21 }
 0x71a   : > { %3920 = vst.msk [vmem:[%s9914_s11 + $0x54] sm:$0x3] %vm927_vm12, %v3911_v41  ;;  %4218 = vst.msk [vmem:[%s9914_s11 + $0x36] sm:$0x3] %vm927_vm12, %v4211_v52  ;;  %v4511_v36 = vcombine.high %v4509_v61, %v4509_v61  ;;  %v4810_v18 = vcombine.high %v4808_v49, %v4808_v49 }
 0x71b   : > { %4219 = vst.msk [vmem:[%s9914_s11 + $0x56] sm:$0x3] %vm927_vm12, %v4210_v21  ;;  %4517 = vst.msk [vmem:[%s9914_s11 + $0x38] sm:$0x3] %vm927_vm12, %v4510_v33 }
 0x71c   : > { %4518 = vst.msk [vmem:[%s9914_s11 + $0x58] sm:$0x3] %vm927_vm12, %v4509_v61  ;;  %4816 = vst.msk [vmem:[%s9914_s11 + $0x3a] sm:$0x3] %vm927_vm12, %v4809_v45 }
 0x71d   : > { %4817 = vst.msk [vmem:[%s9914_s11 + $0x5a] sm:$0x3] %vm927_vm12, %v4808_v49  ;;  %3921 = vst.msk [vmem:[%s9914_s11 + $0x74] sm:$0x3] %vm927_vm12, %v3913_v23 }
 0x71e   : > { %4220 = vst.msk [vmem:[%s9914_s11 + $0x76] sm:$0x3] %vm927_vm12, %v4212_v17  ;;  %4519 = vst.msk [vmem:[%s9914_s11 + $0x78] sm:$0x3] %vm927_vm12, %v4511_v36 }
 0x71f   : > { %4818 = vst.msk [vmem:[%s9914_s11 + $0x7a] sm:$0x3] %vm927_vm12, %v4810_v18 }
 0x73f   : > { %v5084_v11 = vpop.permute.xlu1 %5083 }
 0x740   : > { %v5086_v28 = vsel %vm207_vm10, %v9721_v34, %v5084_v11 }
 0x741   : > { %v5087_v39 = vadd.f32 %v5086_v28, %v9721_v34 }
 0x743   : > { %v5089_v43 = vrot.slane %v5087_v39, 7  ;;  %v5387_v27 = vrot.slane %v5087_v39, 1 }
 0x745   : > { %v5090_v15 = vsel %vm9858_vm11, %v5088_v60, %v5089_v43 }
 0x746   : > { %v5091_v10 = vadd.f32 %v5090_v15, %v5087_v39 }
 0x748   : > { %v5093_v31 = vcombine.high %v5091_v10, %v5091_v10  ;;  %v5100_v47 = vrot.slane %v5091_v10, %v9868_v7 }
 0x74a   : > { %v5107_v62 = vrot.slane %v5093_v31, %v9868_v7  ;;  %v5108_v26 = vcombine.high %v5100_v47, %v5100_v47  ;;  %5114 = vst.msk [vmem:[%s9914_s11 + $0x1c] sm:$0x3] %vm927_vm12, %v5100_v47 }
 0x74c   : > { %v5109_v63 = vcombine.high %v5107_v62, %v5107_v62  ;;  %5115 = vst.msk [vmem:[%s9914_s11 + $0x3c] sm:$0x3] %vm927_vm12, %v5108_v26  ;;  %5116 = vst.msk [vmem:[%s9914_s11 + $0x5c] sm:$0x3] %vm927_vm12, %v5107_v62 }
 0x74e   : > { %5117 = vst.msk [vmem:[%s9914_s11 + $0x7c] sm:$0x3] %vm927_vm12, %v5109_v63 }
 0x761   : > { %v5383_v34 = vpop.permute.xlu0 %5382 }
 0x762   : > { %v5385_v38 = vsel %vm207_vm10, %v9749_v16, %v5383_v34 }
 0x763   : > { %v5386_v54 = vadd.f32 %v5385_v38, %v9749_v16 }
 0x765   : > { %v5388_v8 = vrot.slane %v5386_v54, 7 }
 0x767   : > { %v5389_v42 = vsel %vm9858_vm11, %v5387_v27, %v5388_v8 }
 0x768   : > { %v5390_v53 = vadd.f32 %v5389_v42, %v5386_v54 }
 0x76a   : > { %v5392_v32 = vcombine.high %v5390_v53, %v5390_v53  ;;  %v5399_v12 = vrot.slane %v5390_v53, %v9868_v7 }
 0x76c   : > { %v5406_v6 = vrot.slane %v5392_v32, %v9868_v7  ;;  %v5407_v14 = vcombine.high %v5399_v12, %v5399_v12  ;;  %5413 = vst.msk [vmem:[%s9914_s11 + $0x1e] sm:$0x3] %vm927_vm12, %v5399_v12 }
 0x76e   : > { %v5408_v16 = vcombine.high %v5406_v6, %v5406_v6  ;;  %5414 = vst.msk [vmem:[%s9914_s11 + $0x3e] sm:$0x3] %vm927_vm12, %v5407_v14  ;;  %5415 = vst.msk [vmem:[%s9914_s11 + $0x5e] sm:$0x3] %vm927_vm12, %v5406_v6 }
 0x770   : > { %5416 = vst.msk [vmem:[%s9914_s11 + $0x7e] sm:$0x3] %vm927_vm12, %v5408_v16 }
 0x771   : > { %7388 = shalt.err (!%p7385_p5)
}
 0x772   : > { %s7389_s8 = scalar_lea.hbm %s10153_s30, 2048  ;;  %s7393_s6 = scalar_lea.hbm %s10213_s3, 4096 }
 0x773   : > { %p7390_p6 = scmp.ne.s32.totalorder %s10153_s30, %s7389_s8  ;;  %p7394_p10 = scmp.lt.s32.totalorder %s10153_s30, %s10213_s3 }
 0x774   : > { %p7395_p11 = scmp.lt.s32.totalorder %s7393_s6, %s7389_s8 }
 0x775   : > { %p7391_p7 = pnand %p7390_p6, %p7526_p4 }
 0x776   : > { %p7396_p12 = por %p7395_p11, %p7394_p10 }
 0x777   : > { %p7392_p9 = pneg %p7391_p7 }
 0x779   : > { %p7397_p13 = pnand %p7396_p12, %p7392_p9 }
 0x77b   : > { %7400 = shalt.err (!%p7397_p13)
}
 0x77c   : > { %s7464_s10 = smov 128   ;;  %s7465_s11 = smov 8  }
 0x77d   : > { %7027 = dma.vmem_to_hbm [thread:$0]  (%p7526_p4), %s10155_s19, 2048, %s10153_s30, %s10165_s15, %s7464_s10, %s7464_s10, %s7465_s11  }
 0x77e PF: > { %p7033_p0 = scmp.ge.s32.totalorder %s7451_s17, 2  ;;  %s5448_s18 = sand.u32 1, %s7431_s12  }
 0x77f   : > { %s5449_s21 = scalar_lea.sflag [#allocation3], %s5448_s18 }
 0x780   : > { %p7030_p1 = pnand %p7033_p0, %p7533_p8 }
 0x782   : > { %p7031_p2 = pneg %p7030_p1 }
 0x784   : > { %7426 = dma.done.wait (%p7031_p2), %s5449_s21, 2048  }
 0x785   : > { %7428 = vsyncadd (%p7031_p2), %s5449_s21, 4294965248  ;;  %s16_s17 = sadd.s32 1, %s7451_s17   ;;  %s10246_s12 = smov %s7435_s13 }
 0x786   : > { %p13_p3 = scmp.ge.s32.totalorder %s16_s17, 4   ;;  %s10247_s13 = smov %s7439_s14 }
 0x787   : > { %s10248_s14 = smov %s7539_s25  ;;  %s10249_s15 = smov %s7447_s16 }
 0x788   : > { %s10250_s16 = smov %s10252_s20  ;;  %15 = sbr.rel (!%p13_p3) target bundleno = 4 (0x4), region = 69 }
 0x78d   :  { %5454 = vsyncpa [#allocation3], 1 }
 0x78e   :  { %5456 = vsyncpa [#allocation3 + $0x1], 1 }

</bundles_post_ra>
